<compile_context>
chip_gen: v7x
topology: tpu7x:2x2x1
jax: 0.10.0
libtpu: 0.0.40
codegen_flags: <defaults>
</compile_context>

<pallas_src>
import functools

import numpy as np
import jax
import jax.numpy as jnp
from jax import lax
from jax.experimental import pallas as pl
from jax.experimental.pallas import tpu as pltpu


# ---------------------------------------------------------------------------
# complex64 <-> interleaved float32 pairs (glue; zero extra HBM traffic when
# bitcast of complex dtypes is supported, otherwise a cheap explicit fallback).
# ---------------------------------------------------------------------------
_COMPLEX_BITCAST_OK = None


def _complex_bitcast_ok() -> bool:
    """Probe (eagerly, once) whether complex64 <-> float32 bitcast works end-to-end."""
    global _COMPLEX_BITCAST_OK
    if _COMPLEX_BITCAST_OK is None:
        try:
            jax.block_until_ready(
                lax.bitcast_convert_type(jnp.zeros((8,), jnp.complex64), jnp.float32))
            jax.block_until_ready(
                lax.bitcast_convert_type(jnp.zeros((8, 2), jnp.float32), jnp.complex64))
            _COMPLEX_BITCAST_OK = True
        except Exception:
            _COMPLEX_BITCAST_OK = False
    return _COMPLEX_BITCAST_OK


def _complex_to_pairs(x: jax.Array) -> jax.Array:
    """complex64 (..., W) -> float32 (..., 2*W) with lanes [re0, im0, re1, im1, ...]."""
    if _complex_bitcast_ok():
        xf = lax.bitcast_convert_type(x, jnp.float32)          # (..., W, 2), pure view
    else:
        xf = jnp.stack((jnp.real(x), jnp.imag(x)), axis=-1)    # fallback: one extra pass
    return xf.reshape(*x.shape[:-1], 2 * x.shape[-1])


def _pairs_to_complex(xf: jax.Array) -> jax.Array:
    """float32 (..., 2*W) interleaved [re, im] -> complex64 (..., W)."""
    xp = xf.reshape(*xf.shape[:-1], xf.shape[-1] // 2, 2)
    if _complex_bitcast_ok():
        return lax.bitcast_convert_type(xp, jnp.complex64)
    return lax.complex(xp[..., 0], xp[..., 1])


# ---------------------------------------------------------------------------
# Pallas kernel
# ---------------------------------------------------------------------------
def _selection_matrix(w: int, w_out: int, dx: int, pair: int) -> np.ndarray:
    """0/1 matrix S such that (row @ S)[pair*k + t] == row[pair*dx*k + t]."""
    s = np.zeros((pair * w, pair * w_out), dtype=np.float32)
    for k in range(w_out):
        for t in range(pair):
            s[pair * dx * k + t, pair * k + t] = 1.0
    return s


def _downsample_kernel(x_ref, s_ref, o_ref):
    # x_ref: (TR, pair*W)       one already-row-downsampled source row per sublane
    # s_ref: (pair*W, pair*W_out) constant 0/1 column-selection matrix (VMEM resident)
    # o_ref: (TR, pair*W_out)   lane-dense output block
    # HIGHEST precision keeps the f32 selection exact (values are multiplied by 1.0).
    o_ref[...] = jnp.dot(
        x_ref[...],
        s_ref[...],
        preferred_element_type=jnp.float32,
        precision=jax.lax.Precision.HIGHEST,
    )


def _downsample_planes(xf: jax.Array, dy: int, dx: int, pair: int) -> jax.Array:
    """xf: (B, H, pair*W) float32  ->  (B, H_out, pair*W_out) float32."""
    B, H, PW = xf.shape
    W = PW // pair
    H_out = -(-H // dy)          # ceil, matches python ::dy slicing
    W_out = -(-W // dx)
    PWo = pair * W_out

    # ::dy row selection. Fast path: fold it into the BlockSpec via a free reshape
    # to (B*H_out, dy*PW) and DMA only the first PW lanes of each group (discarded
    # rows never leave HBM). Fallback (odd shapes): one cheap XLA row slice.
    if dy == 1:
        rows = xf.reshape(B * H, PW)
    elif H % dy == 0 and PW % 128 == 0:
        rows = xf.reshape(B * H_out, dy * PW)                  # free, contiguous
    else:
        rows = xf[:, ::dy, :].reshape(B * H_out, PW)

    R = B * H_out
    s = jnp.asarray(_selection_matrix(W, W_out, dx, pair))

    # Row-block size: multiple of 8 sublanes, ~2 MiB of input per grid step, and
    # >= 2 grid steps when possible so v7x's two TensorCores each take half.
    row_bytes = PW * 4
    tr = min(R, max(8, (2 * 1024 * 1024) // row_bytes))
    if R >= 8:
        tr = max(8, (tr // 8) * 8)
    if tr == R and R >= 16:
        tr = max(8, ((R // 2) // 8) * 8)
    grid = (pl.cdiv(R, tr),)

    out = pl.pallas_call(
        _downsample_kernel,
        out_shape=jax.ShapeDtypeStruct((R, PWo), jnp.float32),
        grid_spec=pltpu.PrefetchScalarGridSpec(
            num_scalar_prefetch=0,
            grid=grid,
            in_specs=[
                # Only the first PW lanes of each dy*PW group are DMA'd.
                pl.BlockSpec((tr, PW), lambda r: (r, 0)),
                pl.BlockSpec((pair * W, PWo), lambda r: (0, 0)),
            ],
            out_specs=pl.BlockSpec((tr, PWo), lambda r: (r, 0)),
        ),
        compiler_params=pltpu.CompilerParams(
            dimension_semantics=("parallel",),
        ),
    )(rows, s)
    return out.reshape(B, H_out, PWo)


# ---------------------------------------------------------------------------
# Module-equivalent wrapper
# ---------------------------------------------------------------------------
def downsample_batch(x: jax.Array, dx: int, dy: int, original_dims: bool = False):
    """Pallas TPU equivalent of DownSampleBatch.forward."""
    assert x.ndim == 5, "expected a 5-D input (N, C, D, H, W)"
    if dx == 1 and dy == 1:
        return x
    if original_dims:
        # TODO(synk): bilinear re-interpolation back to (H, W) (original_dims=True) is
        # not implemented (the reference calls 4-D bilinear interpolate on a 5-D tensor).
        raise NotImplementedError("original_dims=True path not implemented")

    N, C, D, H, W = x.shape
    H_out = -(-H // dy)
    W_out = -(-W // dx)

    if jnp.issubdtype(x.dtype, jnp.complexfloating):
        if x.dtype != jnp.complex64:
            raise TypeError("TPU kernel supports complex64 (float64 parts unsupported on TPU)")
        xf = _complex_to_pairs(x).reshape(N * C * D, H, 2 * W)
        of = _downsample_planes(xf, dy, dx, pair=2)
        return _pairs_to_complex(of).reshape(N, C, D, H_out, W_out)

    # Real-valued path (same torch slicing semantics).
    xf = x.astype(jnp.float32).reshape(N * C * D, H, W)
    of = _downsample_planes(xf, dy, dx, pair=1)
    return of.reshape(N, C, D, H_out, W_out).astype(x.dtype)


if __name__ == "__main__":
    # Small radar-like cube (N, C, D, H, W), complex64; downsample by (dy, dx) = (2, 2).
    N, C, D, H, W = 2, 4, 2, 16, 256
    DX, DY = 2, 2

    key = jax.random.PRNGKey(0)
    kr, ki = jax.random.split(key)
    xr = jax.random.normal(kr, (N, C, D, H, W), dtype=jnp.float32)
    xi = jax.random.normal(ki, (N, C, D, H, W), dtype=jnp.float32)
    x = (xr + 1j * xi).astype(jnp.complex64)

    fwd = jax.jit(functools.partial(downsample_batch, dx=DX, dy=DY))
    out = jax.block_until_ready(fwd(x))

    ref = x[:, :, :, ::DY, ::DX]
    assert out.shape == ref.shape, (out.shape, ref.shape)
    assert out.dtype == jnp.complex64, out.dtype
    # The selection matmul multiplies by exactly 1.0 at HIGHEST precision, so the result
    # should be bit-exact; the tolerance only guards against a reduced matmul-precision
    # fallback and still catches any indexing/layout bug (errors there are O(1)).
    assert jnp.allclose(out, ref, rtol=2e-2, atol=2e-2), "mismatch vs reference"

    print("KERNEL_OK")
</pallas_src>

<mosaic_0001>
module attributes {stable_mosaic.version = 11 : i64} {
  func.func @_downsample_kernel(%arg0: i32, %arg1: memref<64x512xf32, #tpu.memory_space<vmem>>, %arg2: memref<512x256xf32, #tpu.memory_space<vmem>>, %arg3: memref<64x256xf32, #tpu.memory_space<vmem>>) attributes {dimension_semantics = [#tpu.dimension_semantics<parallel>], iteration_bounds = array<i64: 2>, scalar_prefetch = 0 : i64, scratch_operands = 0 : i64, tpu.core_type = #tpu.core_type<tc>, window_params = [{transform_indices = @transform_0, window_bounds = array<i64: 64, 512>}, {pipeline_mode = #tpu.pipeline_mode<synchronous>, transform_indices = @transform_1, window_bounds = array<i64: 512, 256>}, {transform_indices = @transform_2, window_bounds = array<i64: 64, 256>}]} {
    %c0 = arith.constant 0 : index
    %c0_0 = arith.constant 0 : index
    %0 = vector.load %arg1[%c0, %c0_0] : memref<64x512xf32, #tpu.memory_space<vmem>>, vector<64x512xf32>
    %c0_1 = arith.constant 0 : index
    %c0_2 = arith.constant 0 : index
    %1 = vector.load %arg2[%c0_1, %c0_2] : memref<512x256xf32, #tpu.memory_space<vmem>>, vector<512x256xf32>
    %cst = arith.constant dense<0.000000e+00> : vector<64x256xf32>
    %2 = tpu.matmul %0, %1, %cst {dimension_numbers = #tpu.dot_dimension_numbers<[1], [0], [0], [1], [0, 0, 1, 1], [], []>, precision = #tpu.contract_precision<fp32>} : vector<64x512xf32>, vector<512x256xf32>, vector<64x256xf32> -> vector<64x256xf32>
    %c0_3 = arith.constant 0 : index
    %c0_4 = arith.constant 0 : index
    %3 = vector.load %arg3[%c0_3, %c0_4] : memref<64x256xf32, #tpu.memory_space<vmem>>, vector<64x256xf32>
    tpu.vector_store %arg3[%c0_3, %c0_4], %2 {strides = array<i32>} : memref<64x256xf32, #tpu.memory_space<vmem>>, vector<64x256xf32>,
    return
  }
  func.func @transform_0(%arg0: i32) -> (i32, i32) {
    %c0_i32 = arith.constant 0 : i32
    %c0_i32_0 = arith.constant 0 : i32
    return %arg0, %c0_i32 : i32, i32
  }
  func.func @transform_1(%arg0: i32) -> (i32, i32) {
    %c0_i32 = arith.constant 0 : i32
    %c0_i32_0 = arith.constant 0 : i32
    %c0_i32_1 = arith.constant 0 : i32
    return %c0_i32, %c0_i32_0 : i32, i32
  }
  func.func @transform_2(%arg0: i32) -> (i32, i32) {
    %c0_i32 = arith.constant 0 : i32
    %c0_i32_0 = arith.constant 0 : i32
    return %arg0, %c0_i32 : i32, i32
  }
}

</mosaic_0001>

<bundles_post_ra>
// kernel: custom-call.1
= control target key start
LH: loop header
LB: loop body
LE: loop exit
PB: predicated region body
PF: predicated region fallthrough
CT: control target
= control target key end

     0   :  { %s59_s0 = inlined_call_operand.hbm [shape: c64[2,4,2,16,256], index: 0, kind: input, shape index: {}]   ;;  %s60_s1 = inlined_call_operand.vmem [shape: f32[2,4,2,16,256], index: 1, kind: output, shape index: {}]  }
   0x1   :  { %s2_s8 = scalar_lea.hbm %s59_s0, 8192 }
   0x2   :  { %3 = vsyncpa [#allocation0], 0  ;;  %s4_s11 = sshll.u32 %s60_s1, 4  ;;  %s34_s14 = scalar_lea.hbm %s59_s0, 16384  ;;  %s5_s11 = int_to_ptr.vmem [resolvable:$true] %s4_s11 }
   0x3   :  { %p11_p0 = scmp.ne.s32.totalorder %s2_s8, %s34_s14  ;;  %p13_p1 = scmp.lt.u32.totalorder %s2_s8, %s59_s0 }
   0x4   :  { %p14_p2 = scmp.lt.u32.totalorder %s34_s14, %s34_s14  ;;  %p16_p4 = scmp.lt.u32.totalorder %s34_s14, %s2_s8 }
   0x6   :  { %p15_p3 = por %p14_p2, %p13_p1 }
   0x8   :  { %p17_p5 = por %p16_p4, %p15_p3 }
   0xa   :  { %p18_p6 = pnand %p17_p5, %p11_p0 }
   0xc   :  { %21 = shalt.err (!%p18_p6)  }
   0xd   :  { %s22_s17 = scalar_lea.vmem %s5_s11, 8192  ;;  %p27_p8 = scmp.lt.s32.totalorder %s5_s11, %s5_s11 }
   0xe   :  { %p23_p7 = scmp.ne.s32.totalorder %s5_s11, %s22_s17  ;;  %p28_p9 = scmp.lt.s32.totalorder %s22_s17, %s22_s17 }
  0x10   :  { %p29_p10 = por %p28_p9, %p27_p8 }
  0x12   :  { %p30_p11 = pnand %p29_p10, %p23_p7 }
  0x14   :  { %33 = shalt.err (!%p30_p11)  }
  0x15   :  { %7 = dma.hbm_to_vmem [thread:$0]  %s2_s8, 8192, %s5_s11, [#allocation0] }
  0x16   :  { %35 = dma.done.wait [#allocation0], 8192  }
  0x17   :  { %36 = vsyncadd [#allocation0], 4294959104 }
  0x18   :  { %9 = vsyncpa [#allocation0], 1 }

// kernel: custom-call
= control target key start
LH: loop header
LB: loop body
LE: loop exit
PB: predicated region body
PF: predicated region fallthrough
CT: control target
= control target key end

     0   :  { %2 = vsyncpa [#allocation0], 0  ;;  %s61_s0 = inlined_call_operand.hbm [shape: c64[2,4,2,16,256], index: 0, kind: input, shape index: {}]   ;;  %s62_s1 = inlined_call_operand.vmem [shape: f32[2,4,2,16,256], index: 1, kind: output, shape index: {}]  }
   0x1   :  { %s3_s8 = sshll.u32 %s62_s1, 4  ;;  %s9_s11 = scalar_lea.hbm %s61_s0, 8192  ;;  %s4_s8 = int_to_ptr.vmem [resolvable:$true] %s3_s8 }
   0x2   :  { %p10_p0 = scmp.ne.s32.totalorder %s61_s0, %s9_s11  ;;  %s11_s16 = scalar_lea.hbm %s61_s0, 16384 }
   0x3   :  { %p12_p1 = scmp.lt.u32.totalorder %s11_s16, %s9_s11  ;;  %p13_p2 = scmp.lt.u32.totalorder %s9_s11, %s61_s0 }
   0x5   :  { %p14_p3 = por %p13_p2, %p12_p1 }
   0x7   :  { %p15_p4 = pnand %p14_p3, %p10_p0 }
   0x9   :  { %18 = shalt.err (!%p15_p4)  }
   0xa   :  { %s19_s1 = scalar_lea.vmem %s4_s8, 8192  ;;  %p24_p6 = scmp.lt.s32.totalorder %s4_s8, %s4_s8 }
   0xb   :  { %p20_p5 = scmp.ne.s32.totalorder %s4_s8, %s19_s1  ;;  %p25_p7 = scmp.lt.s32.totalorder %s19_s1, %s19_s1 }
   0xd   :  { %p26_p8 = por %p25_p7, %p24_p6 }
   0xf   :  { %p27_p9 = pnand %p26_p8, %p20_p5 }
  0x11   :  { %30 = shalt.err (!%p27_p9)  }
  0x12   :  { %6 = dma.hbm_to_vmem [thread:$0]  %s61_s0, 8192, %s4_s8, [#allocation0] }
  0x13   :  { %31 = dma.done.wait [#allocation0], 8192  }
  0x14   :  { %32 = vsyncadd [#allocation0], 4294959104 }
  0x15   :  { %8 = vsyncpa [#allocation0], 1 }

// kernel: downsample_batch.1
= control target key start
LH: loop header
LB: loop body
LE: loop exit
PB: predicated region body
PF: predicated region fallthrough
CT: control target
= control target key end

     0   :  { %7 = vsyncpa [#allocation3], 0  ;;  %s7217_s0 = inlined_call_operand.hbm [shape: f32[128,1024], index: 0, kind: input, shape index: {}]   ;;  %s7218_s1 = inlined_call_operand.hbm [shape: f32[512,256], index: 1, kind: input, shape index: {}]   ;;  %s7219_s2 = inlined_call_operand.vmem [shape: f32[128,256], index: 2, kind: output, shape index: {}]  }
   0x1   :  { %9 = vsyncpa [#allocation3 + $0x1], 0 }
   0x2   :  { %10 = vsyncpa [#allocation5], 0  ;;  %s5014_s9 = smov 0   ;;  %s5016_s10 = smov 0  }
   0x3   :  { %s5018_s11 = smov 0   ;;  %s5020_s12 = smov 0  }
   0x4 LB: > { %s3875_s13 = sadd.s32 4294967295, %s4990_s12   ;;  %s5034_s14 = sadd.s32 1, %s4990_s12   ;;  %s4990_s12 = sphi %s5020_s12, %s8802_s12   ;;  %s4986_s11 = sphi %s5018_s11, %s8801_s11   ;;  %s4982_s10 = sphi %s5016_s10, %s8800_s10   ;;  %s4978_s9 = sphi %s5014_s9, %s8799_s9  }
   0x5   : > { %s20_s15 = ssub.s32 %s4990_s12, %s5034_s14  ;;  %s23_s16 = sadd.s32 1, %s4986_s11 }
   0x6   : > { %p21_p0 = scmp.eq.s32.totalorder %s20_s15, 0  ;;  %p30_p1 = scmp.ne.s32.totalorder %s4986_s11, %s4982_s10 }
   0x7   : > { %p31_p2 = scmp.eq.s32.totalorder %s4990_s12, 0  ;;  %p36_p3 = scmp.ne.s32.totalorder %s4982_s10, %s4978_s9 }
   0x8   : > { %s5044_s17 = scalar_select %p21_p0, %s4986_s11, %s23_s16  }
   0x9   : > { %p5046_p4 = por %p31_p2, %p30_p1  ;;  %p5052_p5 = scmp.eq.s32.totalorder %s3875_s13, 0 }
   0xa   : > { %p3877_p6 = scmp.ge.s32.totalorder %s4990_s12, 1  ;;  %p94_p7 = scmp.lt.s32.totalorder %s4990_s12, 3 }
   0xb   : > { %s7868_s19 = scalar_select %p5052_p5, 1, 0 }
   0xc   : > { %p5060_p8 = por %p5052_p5, %p36_p3  ;;  %p5064_p9 = pnand %p3877_p6, %p94_p7 }
   0xd   : > { %s4992_s22 = smov [#allocation4]   ;;  %p4854_p12 = scmp.lt.s32.totalorder %s4990_s12, 2 }
   0xe   : > { %s7869_s20 = scalar_select %p5060_p8, 1, 0 }
   0xf   : > { %s7870_s21 = scalar_select %p5064_p9, 1, 0 }
  0x10   : > { %s106_s23 = sshll.u32 %s4992_s22, 4  ;;  %p4845_p10 = pneg %p5064_p9  ;;  %s107_s23 = int_to_ptr.vmem [resolvable:$true] %s106_s23 }
  0x11   : > { %s120_s25 = sand.u32 1, %s4986_s11   ;;  %s3893_s26 = sshll.u32 %s4990_s12, 13 }
  0x12   : > { %p5072_p11 = pnand %p4845_p10, %p5052_p5  ;;  %p5081_p13 = pnand %p4854_p12, %p5046_p4 }
  0x13   : > { %s4894_s30 = scalar_lea.hbm %s7218_s1, 16384 }
  0x14   : > { %s7872_s27 = scalar_select %p5081_p13, 1, 0 }
  0x15   : > { %p4895_p0 = scmp.ne.s32.totalorder %s7218_s1, %s4894_s30  ;;  %p4896_p1 = pneg %p5072_p11 }
  0x16   : > { %p4901_p6 = scmp.lt.u32.totalorder %s4894_s30, %s7218_s1 }
  0x17   : > { %p4897_p2 = pnand %p4896_p1, %p4895_p0 }
  0x19   : > { %p4898_p3 = pneg %p4897_p2 }
  0x1b   : > { %p4903_p4 = pnand %p4901_p6, %p4898_p3 }
  0x1d   : > { %4906 = shalt.err (!%p4903_p4)
}
  0x1e   : > { %s4907_s7 = scalar_lea.vmem %s107_s23, 16384  ;;  %p4915_p5 = scmp.lt.s32.totalorder %s107_s23, %s107_s23 }
  0x1f   : > { %p4908_p7 = scmp.ne.s32.totalorder %s107_s23, %s4907_s7  ;;  %p4916_p8 = scmp.lt.s32.totalorder %s4907_s7, %s4907_s7 }
  0x21   : > { %p4910_p10 = pnand %p4908_p7, %p4896_p1  ;;  %p4917_p9 = por %p4916_p8, %p4915_p5 }
  0x23   : > { %p4911_p12 = pneg %p4910_p10 }
  0x25   : > { %p4918_p13 = pnand %p4917_p9, %p4911_p12 }
  0x27   : > { %4921 = shalt.err (!%p4918_p13)
}
  0x28   : > { %s4993_s8 = smov 256   ;;  %s4994_s9 = smov 16  }
  0x29   : > { %4848 = dma.hbm_to_vmem [thread:$0]  (!%p5072_p11), %s7218_s1, 16384, %s107_s23, [#allocation5], %s4993_s8, %s4993_s8, %s4994_s9  }
  0x2a   : > { %s3880_s18 = sshll.u32 %s120_s25, 8  ;;  %s5104_s29 = scalar_lea.hbm %s7217_s0, %s3893_s26 }
  0x2b   : > { %s124_s30 = scalar_lea.vmem [#allocation2], %s3880_s18  ;;  %s5108_s4 = scalar_lea.sflag [#allocation3], %s120_s25 }
  0x2c   : > { %s132_s3 = sshll.u32 %s124_s30, 4  ;;  %s4922_s24 = scalar_lea.hbm %s5104_s29, 4096  ;;  %s5106_s3 = int_to_ptr.vmem [resolvable:$true] %s132_s3 }
  0x2d   : > { %p4923_p5 = scmp.ne.s32.totalorder %s5104_s29, %s4922_s24  ;;  %p7873_p8 = scmp.ne.s32.totalorder %s7872_s27, 0 }
  0x2e   : > { %s4927_s5 = scalar_lea.hbm %s7217_s0, 16384  ;;  %p4928_p0 = scmp.lt.u32.totalorder %s5104_s29, %s7217_s0 }
  0x2f   : > { %p4924_p9 = pneg %p7873_p8  ;;  %p4929_p1 = scmp.lt.u32.totalorder %s4927_s5, %s4922_s24 }
  0x30   : > { %p4931_p3 = scmp.lt.u32.totalorder %s4922_s24, %s5104_s29 }
  0x31   : > { %p4925_p11 = pnand %p4924_p9, %p4923_p5  ;;  %p4930_p2 = por %p4929_p1, %p4928_p0 }
  0x33   : > { %p4926_p13 = pneg %p4925_p11  ;;  %p4932_p6 = por %p4931_p3, %p4930_p2 }
  0x35   : > { %p4933_p4 = pnand %p4932_p6, %p4926_p13 }
  0x37   : > { %4936 = shalt.err (!%p4933_p4)
}
  0x38   : > { %s4937_s25 = scalar_lea.vmem %s5106_s3, 4096  ;;  %s4995_s8 = smov [#allocation2]  }
  0x39   : > { %p4938_p7 = scmp.ne.s32.totalorder %s5106_s3, %s4937_s25  ;;  %s4942_s9 = sshll.u32 %s4995_s8, 4  ;;  %s4943_s9 = int_to_ptr.vmem [resolvable:$false] %s4942_s9 }
  0x3a   : > { %s4944_s15 = scalar_lea.vmem %s4943_s9, 8192  ;;  %p4945_p5 = scmp.lt.s32.totalorder %s5106_s3, %s4943_s9 }
  0x3b   : > { %p4940_p10 = pnand %p4938_p7, %p4924_p9  ;;  %p4946_p11 = scmp.lt.s32.totalorder %s4944_s15, %s4937_s25 }
  0x3d   : > { %p4941_p12 = pneg %p4940_p10  ;;  %p4947_p0 = por %p4946_p11, %p4945_p5 }
  0x3f   : > { %p4948_p1 = pnand %p4947_p0, %p4941_p12 }
  0x41   : > { %4951 = shalt.err (!%p4948_p1)
}
  0x42   : > { %s4996_s16 = smov 1024   ;;  %s4997_s18 = smov 512  }
  0x43   : > { %s4998_s22 = smov 32   ;;  %p7874_p9 = scmp.ne.s32.totalorder %s7870_s21, 0 }
  0x44   : > { %4852 = dma.hbm_to_vmem [thread:$0]  (!%p7873_p8), %s5104_s29, 4096, %s5106_s3, %s5108_s4, %s4996_s16, %s4997_s18, %s4998_s22  }
  0x45   : > { %144 = sbr.rel (%p7874_p9) target bundleno = 838 (0x346), region = 28 }
  0x4c   : > { %s146_s28 = sand.u32 1, %s4982_s10   ;;  %p7875_p13 = scmp.ne.s32.totalorder %s7869_s20, 0 }
  0x4d   : > { %s3885_s30 = sshll.u32 %s146_s28, 8  ;;  %s147_s24 = scalar_lea.sflag [#allocation3], %s146_s28 }
  0x4e   : > { %s5139_s23 = scalar_lea.vmem [#allocation2], %s3885_s30 }
  0x4f   : > { %4969 = dma.done.wait (%p7875_p13), %s147_s24, 4096  }
  0x50   : > { %4971 = vsyncadd (%p7875_p13), %s147_s24, 4294963200  ;;  %p7876_p2 = scmp.ne.s32.totalorder %s7868_s19, 0 }
  0x52   : > { %4973 = dma.done.wait (%p7876_p2), [#allocation5], 16384  }
  0x53   : > { %4975 = vsyncadd (%p7876_p2), [#allocation5], 4294950912  ;;  %v217_v0 = vld [vmem:[#allocation4 + $0x8] sm:$0xff]  ;;  %v219_v1 = vld [vmem:[#allocation4 + $0x18] sm:$0xff]  ;;  %s3887_s19 = sshll.u32 %s3875_s13, 3 }
  0x54   : > { %v281_v2 = vld [vmem:[#allocation4 + $0x208] sm:$0xff]  ;;  %v344_v3 = vand.u32 4294901760, %v217_v0  ;;  %v348_v4 = vand.u32 4294901760, %v219_v1  ;;  %v283_v5 = vld [vmem:[#allocation4 + $0x218] sm:$0xff]  ;;  %v216_v7 = vld [vmem:[#allocation4] sm:$0xff]  ;;  %p178_p8 = scmp.lt.s32.totalorder %s3887_s19, 15 }
  0x55   : > { %v2062_v6 = vand.u32 4294901760, %v281_v2  ;;  %v218_v8 = vld [vmem:[#allocation4 + $0x10] sm:$0xff]  ;;  %v2066_v9 = vand.u32 4294901760, %v283_v5  ;;  %v346_v10 = vand.u32 4294901760, %v216_v7  ;;  %v280_v12 = vld [vmem:[#allocation4 + $0x200] sm:$0xff]  ;;  %v221_v14 = vld [vmem:[#allocation4 + $0x28] sm:$0xff] }
  0x56   : > { %v350_v11 = vand.u32 4294901760, %v218_v8  ;;  %v282_v13 = vld [vmem:[#allocation4 + $0x210] sm:$0xff]  ;;  %v5149_v15 = vpack.c.bf16 %v348_v4, %v344_v3  ;;  %v5151_v16 = vsub.f32 %v217_v0, %v344_v3  ;;  %v5153_v17 = vsub.f32 %v219_v1, %v348_v4  ;;  %v223_v19 = vld [vmem:[#allocation4 + $0x38] sm:$0xff]  ;;  %v285_v20 = vld [vmem:[#allocation4 + $0x228] sm:$0xff]  ;;  %s8804_s19 = smov (!%p178_p8, %s3887_s19), 15 }
  0x57   : > { %v5155_v18 = vsub.f32 %v281_v2, %v2062_v6  ;;  %v287_v21 = vld [vmem:[#allocation4 + $0x238] sm:$0xff]  ;;  %v5157_v22 = vpack.c.bf16 %v2066_v9, %v2062_v6  ;;  %v5159_v23 = vsub.f32 %v283_v5, %v2066_v9  ;;  %v5163_v25 = vsub.f32 %v216_v7, %v346_v10  ;;  %v220_v26 = vld [vmem:[#allocation4 + $0x20] sm:$0xff]  ;;  %v222_v31 = vld [vmem:[#allocation4 + $0x30] sm:$0xff]  ;;  %s3894_s20 = sshll.u32 %s8804_s19, 4 }
  0x58   : > { %7877 = vst [vmem:[#allocation8_spill] sm:$0xff] %v5149_v15  ;;  %7878 = vst [vmem:[#allocation9_spill] sm:$0xff] %v5153_v17  ;;  %v5161_v24 = vpack.c.bf16 %v350_v11, %v346_v10  ;;  %3896 = vmatprep.subr.bf16.mxu1 %v5149_v15  ;;  %v5166_v27 = vsub.f32 %v218_v8, %v350_v11  ;;  %v2064_v28 = vand.u32 4294901760, %v280_v12  ;;  %v2068_v29 = vand.u32 4294901760, %v282_v13  ;;  %v284_v36 = vld [vmem:[#allocation4 + $0x220] sm:$0xff]  ;;  %v286_v37 = vld [vmem:[#allocation4 + $0x230] sm:$0xff]  ;;  %s7186_s29 = scalar_lea.vmem %s7219_s2, %s3894_s20 }
  0x59   : > { %7879 = vst [vmem:[#allocation10_spill] sm:$0xff] %v5155_v18  ;;  %7880 = vst [vmem:[#allocation11_spill] sm:$0xff] %v5157_v22  ;;  %v352_v30 = vand.u32 4294901760, %v221_v14  ;;  %4280 = vmatprep.subr.bf16.mxu0 %v5157_v22  ;;  %v356_v32 = vand.u32 4294901760, %v223_v19  ;;  %v2070_v33 = vand.u32 4294901760, %v285_v20  ;;  %v2074_v34 = vand.u32 4294901760, %v287_v21 }
  0x5a   : > { %7881 = vst [vmem:[#allocation12_spill] sm:$0xff] %v5159_v23  ;;  %7882 = vst [vmem:[#allocation13_spill] sm:$0xff] %v5161_v24  ;;  %3898 = vmatpush1.bf16.msra.mxu1 %v5161_v24  ;;  %v354_v35 = vand.u32 4294901760, %v220_v26  ;;  %v5170_v38 = vpack.c.bf16 %v2068_v29, %v2064_v28  ;;  %v5172_v39 = vsub.f32 %v280_v12, %v2064_v28  ;;  %v225_v42 = vld [vmem:[#allocation4 + $0x48] sm:$0xff]  ;;  %v227_v43 = vld [vmem:[#allocation4 + $0x58] sm:$0xff]  ;;  %v358_v51 = vand.u32 4294901760, %v222_v31 }
  0x5b   : > { %v5174_v40 = vsub.f32 %v282_v13, %v2068_v29  ;;  %v5176_v41 = vsub.f32 %v221_v14, %v352_v30  ;;  %v289_v44 = vld [vmem:[#allocation4 + $0x248] sm:$0xff]  ;;  %v5178_v45 = vpack.c.bf16 %v356_v32, %v352_v30  ;;  %v5180_v46 = vsub.f32 %v223_v19, %v356_v32  ;;  %v291_v49 = vld [vmem:[#allocation4 + $0x258] sm:$0xff]  ;;  %v224_v58 = vld [vmem:[#allocation4 + $0x40] sm:$0xff] }
  0x5c   : > { %7883 = vst [vmem:[#allocation14_spill] sm:$0xff] %v5170_v38  ;;  %v5182_v47 = vpack.c.bf16 %v2074_v34, %v2070_v33  ;;  %v5184_v48 = vsub.f32 %v285_v20, %v2070_v33  ;;  %4282 = vmatpush1.bf16.msra.mxu0 %v5170_v38  ;;  %v5187_v50 = vsub.f32 %v287_v21, %v2074_v34  ;;  %v2072_v53 = vand.u32 4294901760, %v284_v36  ;;  %v226_v59 = vld [vmem:[#allocation4 + $0x50] sm:$0xff]  ;;  %v288_v0 = vld [vmem:[#allocation4 + $0x240] sm:$0xff]  ;;  %v229_v2 = vld [vmem:[#allocation4 + $0x68] sm:$0xff] }
  0x5d   : > { %7884 = vst [vmem:[#allocation15_spill] sm:$0xff] %v5178_v45  ;;  %v5189_v52 = vsub.f32 %v220_v26, %v354_v35  ;;  %3900 = vmatprep.subr.bf16.mxu1 %v5178_v45  ;;  %v2076_v54 = vand.u32 4294901760, %v286_v37  ;;  %v360_v55 = vand.u32 4294901760, %v225_v42  ;;  %v364_v56 = vand.u32 4294901760, %v227_v43  ;;  %v290_v1 = vld [vmem:[#allocation4 + $0x250] sm:$0xff]  ;;  %v231_v7 = vld [vmem:[#allocation4 + $0x78] sm:$0xff] }
  0x5e   : > { %7885 = vst [vmem:[#allocation16_spill] sm:$0xff] %v5182_v47  ;;  %7886 = vst [vmem:[#allocation17_spill] sm:$0xff] %v5184_v48  ;;  %4284 = vmatprep.subr.bf16.mxu0 %v5182_v47  ;;  %v2078_v57 = vand.u32 4294901760, %v289_v44  ;;  %v5193_v60 = vpack.c.bf16 %v358_v51, %v354_v35  ;;  %v5195_v61 = vsub.f32 %v222_v31, %v358_v51  ;;  %v2082_v63 = vand.u32 4294901760, %v291_v49  ;;  %v293_v8 = vld [vmem:[#allocation4 + $0x268] sm:$0xff]  ;;  %v295_v9 = vld [vmem:[#allocation4 + $0x278] sm:$0xff] }
  0x5f   : > { %7887 = vst [vmem:[#allocation18_spill] sm:$0xff] %v5187_v50  ;;  %7888 = vst [vmem:[#allocation19_spill] sm:$0xff] %v5189_v52  ;;  %v5197_v62 = vsub.f32 %v284_v36, %v2072_v53  ;;  %v5199_v3 = vpack.c.bf16 %v2076_v54, %v2072_v53  ;;  %v5201_v4 = vsub.f32 %v286_v37, %v2076_v54  ;;  %v362_v14 = vand.u32 4294901760, %v224_v58  ;;  %v228_v31 = vld [vmem:[#allocation4 + $0x60] sm:$0xff]  ;;  %v230_v36 = vld [vmem:[#allocation4 + $0x70] sm:$0xff] }
  0x60   : > { %7889 = vst [vmem:[#allocation20_spill] sm:$0xff] %v5193_v60  ;;  %7890 = vst [vmem:[#allocation21_spill] sm:$0xff] %v5195_v61  ;;  %v5203_v5 = vpack.c.bf16 %v364_v56, %v360_v55  ;;  %v5205_v6 = vsub.f32 %v225_v42, %v360_v55  ;;  %3902 = vmatpush1.bf16.msra.mxu1 %v5193_v60  ;;  %v5208_v10 = vsub.f32 %v227_v43, %v364_v56  ;;  %v292_v37 = vld [vmem:[#allocation4 + $0x260] sm:$0xff]  ;;  %v294_v42 = vld [vmem:[#allocation4 + $0x270] sm:$0xff] }
  0x61   : > { %7891 = vst [vmem:[#allocation22_spill] sm:$0xff] %v5197_v62  ;;  %7892 = vst [vmem:[#allocation23_spill] sm:$0xff] %v5199_v3  ;;  %v5210_v11 = vpack.c.bf16 %v2082_v63, %v2078_v57  ;;  %v5212_v12 = vsub.f32 %v289_v44, %v2078_v57  ;;  %v5214_v13 = vsub.f32 %v291_v49, %v2082_v63  ;;  %4286 = vmatpush1.bf16.msra.mxu0 %v5199_v3  ;;  %v233_v53 = vld [vmem:[#allocation4 + $0x88] sm:$0xff]  ;;  %v235_v54 = vld [vmem:[#allocation4 + $0x98] sm:$0xff] }
  0x62   : > { %7893 = vst [vmem:[#allocation24_spill] sm:$0xff] %v5201_v4  ;;  %7894 = vst [vmem:[#allocation25_spill] sm:$0xff] %v5203_v5  ;;  %3904 = vmatprep.subr.bf16.mxu1 %v5203_v5  ;;  %v366_v19 = vand.u32 4294901760, %v226_v59  ;;  %v2080_v20 = vand.u32 4294901760, %v288_v0  ;;  %v2084_v21 = vand.u32 4294901760, %v290_v1  ;;  %v368_v26 = vand.u32 4294901760, %v229_v2 }
  0x63   : > { %7895 = vst [vmem:[#allocation26_spill] sm:$0xff] %v5205_v6  ;;  %7896 = vst [vmem:[#allocation27_spill] sm:$0xff] %v5208_v10  ;;  %4288 = vmatprep.subr.bf16.mxu0 %v5210_v11  ;;  %v372_v28 = vand.u32 4294901760, %v231_v7  ;;  %v2086_v29 = vand.u32 4294901760, %v293_v8  ;;  %v2090_v30 = vand.u32 4294901760, %v295_v9  ;;  %v5221_v33 = vsub.f32 %v224_v58, %v362_v14  ;;  %v297_v55 = vld [vmem:[#allocation4 + $0x288] sm:$0xff] }
  0x64   : > { %7897 = vst [vmem:[#allocation28_spill] sm:$0xff] %v5210_v11  ;;  %7898 = vst [vmem:[#allocation29_spill] sm:$0xff] %v5212_v12  ;;  %v5219_v32 = vpack.c.bf16 %v366_v19, %v362_v14  ;;  %v5223_v34 = vsub.f32 %v226_v59, %v366_v19  ;;  %v5225_v35 = vpack.c.bf16 %v2084_v21, %v2080_v20  ;;  %v370_v59 = vand.u32 4294901760, %v228_v31  ;;  %v299_v14 = vld [vmem:[#allocation4 + $0x298] sm:$0xff]  ;;  %v301_v47 = vld [vmem:[#allocation4 + $0x2a8] sm:$0xff] }
  0x65   : > { %7899 = vst [vmem:[#allocation30_spill] sm:$0xff] %v5214_v13  ;;  %7901 = vst [vmem:[#allocation32_spill] sm:$0xff] %v5221_v33  ;;  %v5227_v43 = vsub.f32 %v288_v0, %v2080_v20  ;;  %v5229_v44 = vsub.f32 %v290_v1, %v2084_v21  ;;  %v5231_v49 = vpack.c.bf16 %v372_v28, %v368_v26  ;;  %v374_v0 = vand.u32 4294901760, %v230_v36  ;;  %v239_v11 = vld [vmem:[#allocation4 + $0xb8] sm:$0xff]  ;;  %v300_v38 = vld [vmem:[#allocation4 + $0x2a0] sm:$0xff] }
  0x66   : > { %7900 = vst [vmem:[#allocation31_spill] sm:$0xff] %v5219_v32  ;;  %7902 = vst [vmem:[#allocation33_spill] sm:$0xff] %v5223_v34  ;;  %v5233_v51 = vsub.f32 %v229_v2, %v368_v26  ;;  %3906 = vmatpush1.bf16.msra.mxu1 %v5219_v32  ;;  %4290 = vmatpush1.bf16.msra.mxu0 %v5225_v35  ;;  %v5237_v56 = vsub.f32 %v231_v7, %v372_v28  ;;  %v2088_v1 = vand.u32 4294901760, %v292_v37  ;;  %v232_v26 = vld [vmem:[#allocation4 + $0x80] sm:$0xff]  ;;  %v234_v28 = vld [vmem:[#allocation4 + $0x90] sm:$0xff] }
  0x67   : > { %7903 = vst [vmem:[#allocation34_spill] sm:$0xff] %v5225_v35  ;;  %7904 = vst [vmem:[#allocation35_spill] sm:$0xff] %v5227_v43  ;;  %v5239_v57 = vpack.c.bf16 %v2090_v30, %v2086_v29  ;;  %v5241_v58 = vsub.f32 %v293_v8, %v2086_v29  ;;  %3908 = vmatprep.subr.bf16.mxu1 %v5231_v49  ;;  %v5244_v63 = vsub.f32 %v295_v9, %v2090_v30  ;;  %v296_v8 = vld [vmem:[#allocation4 + $0x280] sm:$0xff]  ;;  %v237_v32 = vld [vmem:[#allocation4 + $0xa8] sm:$0xff] }
  0x68   : > { %7905 = vst [vmem:[#allocation36_spill] sm:$0xff] %v5229_v44  ;;  %7906 = vst [vmem:[#allocation37_spill] sm:$0xff] %v5231_v49  ;;  %v2092_v2 = vand.u32 4294901760, %v294_v42  ;;  %v5247_v19 = vsub.f32 %v228_v31, %v370_v59  ;;  %v376_v20 = vand.u32 4294901760, %v233_v53  ;;  %v380_v7 = vand.u32 4294901760, %v235_v54  ;;  %v298_v49 = vld [vmem:[#allocation4 + $0x290] sm:$0xff] }
  0x69   : > { %7907 = vst [vmem:[#allocation38_spill] sm:$0xff] %v5233_v51  ;;  %7908 = vst [vmem:[#allocation39_spill] sm:$0xff] %v5237_v56  ;;  %4292 = vmatprep.subr.bf16.mxu0 %v5239_v57  ;;  %v2094_v21 = vand.u32 4294901760, %v297_v55  ;;  %v5249_v29 = vpack.c.bf16 %v374_v0, %v370_v59  ;;  %v5251_v35 = vsub.f32 %v230_v36, %v374_v0  ;;  %v2098_v36 = vand.u32 4294901760, %v299_v14  ;;  %v302_v15 = vld [vmem:[#allocation4 + $0x2b0] sm:$0xff] }
  0x6a   : > { %7909 = vst [vmem:[#allocation40_spill] sm:$0xff] %v5239_v57  ;;  %7910 = vst [vmem:[#allocation41_spill] sm:$0xff] %v5241_v58  ;;  %v5253_v9 = vpack.c.bf16 %v2092_v2, %v2088_v1  ;;  %v5255_v30 = vsub.f32 %v292_v37, %v2088_v1  ;;  %v5257_v57 = vsub.f32 %v294_v42, %v2092_v2  ;;  %v378_v37 = vand.u32 4294901760, %v232_v26 }
  0x6b   : > { %7911 = vst [vmem:[#allocation42_spill] sm:$0xff] %v5244_v63  ;;  %7912 = vst [vmem:[#allocation43_spill] sm:$0xff] %v5247_v19  ;;  %v5259_v31 = vpack.c.bf16 %v380_v7, %v376_v20  ;;  %v5261_v3 = vsub.f32 %v233_v53, %v376_v20  ;;  %v5263_v5 = vsub.f32 %v235_v54, %v380_v7  ;;  %3910 = vmatpush1.bf16.msra.mxu1 %v5249_v29  ;;  %v303_v53 = vld [vmem:[#allocation4 + $0x2b8] sm:$0xff] }
  0x6c   : > { %7913 = vst [vmem:[#allocation44_spill] sm:$0xff] %v5249_v29  ;;  %7914 = vst [vmem:[#allocation45_spill] sm:$0xff] %v5251_v35  ;;  %4294 = vmatpush1.bf16.msra.mxu0 %v5253_v9  ;;  %v5267_v59 = vsub.f32 %v297_v55, %v2094_v21  ;;  %v382_v0 = vand.u32 4294901760, %v234_v28  ;;  %v2096_v1 = vand.u32 4294901760, %v296_v8  ;;  %v2100_v42 = vand.u32 4294901760, %v298_v49  ;;  %v236_v55 = vld [vmem:[#allocation4 + $0xa0] sm:$0xff] }
  0x6d   : > { %7915 = vst [vmem:[#allocation46_spill] sm:$0xff] %v5253_v9  ;;  %7916 = vst [vmem:[#allocation47_spill] sm:$0xff] %v5255_v30  ;;  %3912 = vmatprep.subr.bf16.mxu1 %v5259_v31  ;;  %v384_v2 = vand.u32 4294901760, %v237_v32  ;;  %v388_v60 = vand.u32 4294901760, %v239_v11  ;;  %v5270_v20 = vpack.c.bf16 %v2098_v36, %v2094_v21  ;;  %v5272_v54 = vsub.f32 %v299_v14, %v2098_v36  ;;  %v238_v29 = vld [vmem:[#allocation4 + $0xb0] sm:$0xff]  ;;  %v241_v21 = vld [vmem:[#allocation4 + $0xc8] sm:$0xff] }
  0x6e   : > { %7917 = vst [vmem:[#allocation48_spill] sm:$0xff] %v5257_v57  ;;  %7918 = vst [vmem:[#allocation49_spill] sm:$0xff] %v5259_v31  ;;  %v5274_v7 = vpack.c.bf16 %v382_v0, %v378_v37  ;;  %v5276_v9 = vsub.f32 %v232_v26, %v378_v37  ;;  %v5278_v45 = vsub.f32 %v234_v28, %v382_v0  ;;  %v2102_v28 = vand.u32 4294901760, %v301_v47 }
  0x6f   : > { %7919 = vst [vmem:[#allocation50_spill] sm:$0xff] %v5261_v3  ;;  %7920 = vst [vmem:[#allocation51_spill] sm:$0xff] %v5263_v5  ;;  %v5280_v31 = vpack.c.bf16 %v2100_v42, %v2096_v1  ;;  %v5282_v24 = vsub.f32 %v296_v8, %v2096_v1  ;;  %v5284_v22 = vsub.f32 %v298_v49, %v2100_v42  ;;  %4296 = vmatprep.subr.bf16.mxu0 %v5270_v20 }
  0x70   : > { %7921 = vst [vmem:[#allocation52_spill] sm:$0xff] %v5267_v59  ;;  %7922 = vst [vmem:[#allocation53_spill] sm:$0xff] %v5270_v20  ;;  %v243_v59 = vld [vmem:[#allocation4 + $0xd8] sm:$0xff]  ;;  %3914 = vmatpush1.bf16.msra.mxu1 %v5274_v7  ;;  %v5288_v14 = vpack.c.bf16 %v388_v60, %v384_v2  ;;  %v5290_v26 = vsub.f32 %v237_v32, %v384_v2  ;;  %v5292_v36 = vsub.f32 %v239_v11, %v388_v60 }
  0x71   : > { %7923 = vst [vmem:[#allocation54_spill] sm:$0xff] %v5272_v54  ;;  %7924 = vst [vmem:[#allocation55_spill] sm:$0xff] %v5274_v7  ;;  %4298 = vmatpush1.bf16.msra.mxu0 %v5280_v31  ;;  %v2106_v8 = vand.u32 4294901760, %v303_v53  ;;  %v386_v37 = vand.u32 4294901760, %v236_v55  ;;  %v390_v49 = vand.u32 4294901760, %v238_v29  ;;  %v2104_v0 = vand.u32 4294901760, %v300_v38 }
  0x72   : > { %7925 = vst [vmem:[#allocation56_spill] sm:$0xff] %v5276_v9  ;;  %7926 = vst [vmem:[#allocation57_spill] sm:$0xff] %v5278_v45  ;;  %3916 = vmatprep.subr.bf16.mxu1 %v5288_v14  ;;  %v5296_v1 = vsub.f32 %v301_v47, %v2102_v28  ;;  %v2108_v42 = vand.u32 4294901760, %v302_v15  ;;  %v392_v20 = vand.u32 4294901760, %v241_v21  ;;  %v396_v7 = vand.u32 4294901760, %v243_v59  ;;  %v306_v9 = vld [vmem:[#allocation4 + $0x2d0] sm:$0xff] }
  0x73   : > { %7927 = vst [vmem:[#allocation58_spill] sm:$0xff] %v5280_v31  ;;  %7928 = vst [vmem:[#allocation59_spill] sm:$0xff] %v5282_v24  ;;  %v307_v24 = vld [vmem:[#allocation4 + $0x2d8] sm:$0xff]  ;;  %v5298_v32 = vpack.c.bf16 %v2106_v8, %v2102_v28  ;;  %v5300_v60 = vsub.f32 %v303_v53, %v2106_v8  ;;  %v5302_v11 = vpack.c.bf16 %v390_v49, %v386_v37  ;;  %v240_v31 = vld [vmem:[#allocation4 + $0xc0] sm:$0xff] }
  0x74   : > { %7929 = vst [vmem:[#allocation60_spill] sm:$0xff] %v5284_v22  ;;  %7930 = vst [vmem:[#allocation61_spill] sm:$0xff] %v5288_v14  ;;  %v305_v22 = vld [vmem:[#allocation4 + $0x2c8] sm:$0xff]  ;;  %v5304_v2 = vsub.f32 %v236_v55, %v386_v37  ;;  %v5306_v45 = vsub.f32 %v238_v29, %v390_v49  ;;  %v5308_v47 = vpack.c.bf16 %v2108_v42, %v2104_v0  ;;  %v247_v54 = vld [vmem:[#allocation4 + $0xf8] sm:$0xff]  ;;  %v394_v37 = vand.u32 4294901760, %v240_v31 }
  0x75   : > { %7931 = vst [vmem:[#allocation62_spill] sm:$0xff] %v5290_v26  ;;  %7932 = vst [vmem:[#allocation63_spill] sm:$0xff] %v5292_v36  ;;  %v242_v36 = vld [vmem:[#allocation4 + $0xd0] sm:$0xff]  ;;  %v304_v26 = vld [vmem:[#allocation4 + $0x2c0] sm:$0xff]  ;;  %v5310_v14 = vsub.f32 %v300_v38, %v2104_v0  ;;  %4300 = vmatprep.subr.bf16.mxu0 %v5298_v32  ;;  %3918 = vmatpush1.bf16.msra.mxu1 %v5302_v11  ;;  %v5316_v53 = vpack.c.bf16 %v396_v7, %v392_v20  ;;  %v2110_v29 = vand.u32 4294901760, %v305_v22 }
  0x76   : > { %7933 = vst [vmem:[#allocation64_spill] sm:$0xff] %v5296_v1  ;;  %7934 = vst [vmem:[#allocation65_spill] sm:$0xff] %v5298_v32  ;;  %v5312_v1 = vsub.f32 %v302_v15, %v2108_v42  ;;  %v245_v28 = vld [vmem:[#allocation4 + $0xe8] sm:$0xff]  ;;  %v5318_v55 = vsub.f32 %v241_v21, %v392_v20  ;;  %v5320_v8 = vsub.f32 %v243_v59, %v396_v7  ;;  %4302 = vmatpush1.bf16.msra.mxu0 %v5308_v47 }
  0x77   : > { %7935 = vst [vmem:[#allocation66_spill] sm:$0xff] %v5300_v60  ;;  %7936 = vst [vmem:[#allocation67_spill] sm:$0xff] %v5302_v11  ;;  %v2114_v38 = vand.u32 4294901760, %v307_v24  ;;  %v398_v15 = vand.u32 4294901760, %v242_v36  ;;  %v2112_v49 = vand.u32 4294901760, %v304_v26  ;;  %3920 = vmatprep.subr.bf16.mxu1 %v5316_v53  ;;  %v5324_v0 = vsub.f32 %v305_v22, %v2110_v29  ;;  %v251_v60 = vld [vmem:[#allocation4 + $0x118] sm:$0xff] }
  0x78   : > { %7937 = vst [vmem:[#allocation68_spill] sm:$0xff] %v5304_v2  ;;  %7938 = vst [vmem:[#allocation69_spill] sm:$0xff] %v5306_v45  ;;  %v2116_v42 = vand.u32 4294901760, %v306_v9  ;;  %v400_v32 = vand.u32 4294901760, %v245_v28  ;;  %v404_v11 = vand.u32 4294901760, %v247_v54  ;;  %v5332_v21 = vsub.f32 %v240_v31, %v394_v37  ;;  %v310_v2 = vld [vmem:[#allocation4 + $0x2f0] sm:$0xff] }
  0x79   : > { %7939 = vst [vmem:[#allocation70_spill] sm:$0xff] %v5308_v47  ;;  %7940 = vst [vmem:[#allocation71_spill] sm:$0xff] %v5310_v14  ;;  %v311_v14 = vld [vmem:[#allocation4 + $0x2f8] sm:$0xff]  ;;  %v5326_v20 = vpack.c.bf16 %v2114_v38, %v2110_v29  ;;  %v5328_v59 = vsub.f32 %v307_v24, %v2114_v38  ;;  %v5330_v7 = vpack.c.bf16 %v398_v15, %v394_v37  ;;  %v244_v47 = vld [vmem:[#allocation4 + $0xe0] sm:$0xff] }
  0x7a   : > { %7941 = vst [vmem:[#allocation72_spill] sm:$0xff] %v5312_v1  ;;  %7942 = vst [vmem:[#allocation73_spill] sm:$0xff] %v5316_v53  ;;  %v309_v1 = vld [vmem:[#allocation4 + $0x2e8] sm:$0xff]  ;;  %v5334_v45 = vsub.f32 %v242_v36, %v398_v15  ;;  %v5336_v22 = vpack.c.bf16 %v2116_v42, %v2112_v49  ;;  %v5338_v53 = vsub.f32 %v304_v26, %v2112_v49  ;;  %v2122_v26 = vand.u32 4294901760, %v311_v14 }
  0x7b   : > { %7943 = vst [vmem:[#allocation74_spill] sm:$0xff] %v5318_v55  ;;  %7944 = vst [vmem:[#allocation75_spill] sm:$0xff] %v5320_v8  ;;  %v246_v8 = vld [vmem:[#allocation4 + $0xf0] sm:$0xff]  ;;  %v308_v55 = vld [vmem:[#allocation4 + $0x2e0] sm:$0xff]  ;;  %4304 = vmatprep.subr.bf16.mxu0 %v5326_v20  ;;  %3922 = vmatpush1.bf16.msra.mxu1 %v5330_v7  ;;  %v5344_v24 = vpack.c.bf16 %v404_v11, %v400_v32  ;;  %v5346_v31 = vsub.f32 %v245_v28, %v400_v32  ;;  %v2118_v36 = vand.u32 4294901760, %v309_v1 }
  0x7c   : > { %7945 = vst [vmem:[#allocation76_spill] sm:$0xff] %v5324_v0  ;;  %7946 = vst [vmem:[#allocation77_spill] sm:$0xff] %v5326_v20  ;;  %v5340_v0 = vsub.f32 %v306_v9, %v2116_v42  ;;  %v249_v29 = vld [vmem:[#allocation4 + $0x108] sm:$0xff]  ;;  %v5348_v38 = vsub.f32 %v247_v54, %v404_v11  ;;  %4306 = vmatpush1.bf16.msra.mxu0 %v5336_v22  ;;  %v402_v37 = vand.u32 4294901760, %v244_v47  ;;  %v406_v9 = vand.u32 4294901760, %v246_v8 }
  0x7d   : > { %7947 = vst [vmem:[#allocation78_spill] sm:$0xff] %v5328_v59  ;;  %7948 = vst [vmem:[#allocation79_spill] sm:$0xff] %v5330_v7  ;;  %v2120_v15 = vand.u32 4294901760, %v308_v55  ;;  %3924 = vmatprep.subr.bf16.mxu1 %v5344_v24  ;;  %v5352_v49 = vsub.f32 %v309_v1, %v2118_v36  ;;  %v2124_v42 = vand.u32 4294901760, %v310_v2  ;;  %v408_v20 = vand.u32 4294901760, %v249_v29  ;;  %v255_v59 = vld [vmem:[#allocation4 + $0x138] sm:$0xff] }
  0x7e   : > { %7949 = vst [vmem:[#allocation80_spill] sm:$0xff] %v5332_v21  ;;  %7950 = vst [vmem:[#allocation81_spill] sm:$0xff] %v5334_v45  ;;  %v412_v7 = vand.u32 4294901760, %v251_v60  ;;  %v5354_v32 = vpack.c.bf16 %v2122_v26, %v2118_v36  ;;  %v5356_v54 = vsub.f32 %v311_v14, %v2122_v26  ;;  %v5358_v11 = vpack.c.bf16 %v406_v9, %v402_v37  ;;  %v314_v21 = vld [vmem:[#allocation4 + $0x310] sm:$0xff]  ;;  %v253_v36 = vld [vmem:[#allocation4 + $0x128] sm:$0xff] }
  0x7f   : > { %7951 = vst [vmem:[#allocation82_spill] sm:$0xff] %v5336_v22  ;;  %7952 = vst [vmem:[#allocation83_spill] sm:$0xff] %v5338_v53  ;;  %v315_v53 = vld [vmem:[#allocation4 + $0x318] sm:$0xff]  ;;  %v5360_v28 = vsub.f32 %v244_v47, %v402_v37  ;;  %v248_v22 = vld [vmem:[#allocation4 + $0x100] sm:$0xff]  ;;  %v5362_v45 = vsub.f32 %v246_v8, %v406_v9  ;;  %v5364_v1 = vpack.c.bf16 %v2124_v42, %v2120_v15 }
  0x80   : > { %7953 = vst [vmem:[#allocation84_spill] sm:$0xff] %v5340_v0  ;;  %7954 = vst [vmem:[#allocation85_spill] sm:$0xff] %v5344_v24  ;;  %v313_v0 = vld [vmem:[#allocation4 + $0x308] sm:$0xff]  ;;  %v5366_v24 = vsub.f32 %v308_v55, %v2120_v15  ;;  %4308 = vmatprep.subr.bf16.mxu0 %v5354_v32  ;;  %3926 = vmatpush1.bf16.msra.mxu1 %v5358_v11  ;;  %v5372_v14 = vpack.c.bf16 %v412_v7, %v408_v20  ;;  %v2130_v55 = vand.u32 4294901760, %v315_v53 }
  0x81   : > { %7955 = vst [vmem:[#allocation86_spill] sm:$0xff] %v5346_v31  ;;  %7956 = vst [vmem:[#allocation87_spill] sm:$0xff] %v5348_v38  ;;  %v250_v38 = vld [vmem:[#allocation4 + $0x110] sm:$0xff]  ;;  %v312_v31 = vld [vmem:[#allocation4 + $0x300] sm:$0xff]  ;;  %v5374_v47 = vsub.f32 %v249_v29, %v408_v20  ;;  %v5376_v26 = vsub.f32 %v251_v60, %v412_v7  ;;  %v2126_v8 = vand.u32 4294901760, %v313_v0  ;;  %4310 = vmatpush1.bf16.msra.mxu0 %v5364_v1  ;;  %v410_v37 = vand.u32 4294901760, %v248_v22 }
  0x82   : > { %7957 = vst [vmem:[#allocation88_spill] sm:$0xff] %v5352_v49  ;;  %7958 = vst [vmem:[#allocation89_spill] sm:$0xff] %v5354_v32  ;;  %v5368_v49 = vsub.f32 %v310_v2, %v2124_v42  ;;  %v414_v2 = vand.u32 4294901760, %v250_v38  ;;  %v2128_v9 = vand.u32 4294901760, %v312_v31  ;;  %3928 = vmatprep.subr.bf16.mxu1 %v5372_v14  ;;  %v2132_v42 = vand.u32 4294901760, %v314_v21 }
  0x83   : > { %7959 = vst [vmem:[#allocation90_spill] sm:$0xff] %v5356_v54  ;;  %7960 = vst [vmem:[#allocation91_spill] sm:$0xff] %v5358_v11  ;;  %v5380_v15 = vsub.f32 %v313_v0, %v2126_v8  ;;  %v416_v32 = vand.u32 4294901760, %v253_v36  ;;  %v420_v11 = vand.u32 4294901760, %v255_v59  ;;  %v5382_v20 = vpack.c.bf16 %v2130_v55, %v2126_v8  ;;  %v257_v8 = vld [vmem:[#allocation4 + $0x148] sm:$0xff]  ;;  %v259_v54 = vld [vmem:[#allocation4 + $0x158] sm:$0xff] }
  0x84   : > { %7961 = vst [vmem:[#allocation92_spill] sm:$0xff] %v5360_v28  ;;  %7962 = vst [vmem:[#allocation93_spill] sm:$0xff] %v5362_v45  ;;  %v5384_v60 = vsub.f32 %v315_v53, %v2130_v55  ;;  %v5386_v7 = vpack.c.bf16 %v414_v2, %v410_v37  ;;  %v5388_v29 = vsub.f32 %v248_v22, %v410_v37  ;;  %v318_v28 = vld [vmem:[#allocation4 + $0x330] sm:$0xff] }
  0x85   : > { %7963 = vst [vmem:[#allocation94_spill] sm:$0xff] %v5364_v1  ;;  %7964 = vst [vmem:[#allocation95_spill] sm:$0xff] %v5366_v24  ;;  %v319_v24 = vld [vmem:[#allocation4 + $0x338] sm:$0xff]  ;;  %v252_v1 = vld [vmem:[#allocation4 + $0x120] sm:$0xff]  ;;  %v5390_v45 = vsub.f32 %v250_v38, %v414_v2  ;;  %v5392_v0 = vpack.c.bf16 %v2132_v42, %v2128_v9  ;;  %4312 = vmatprep.subr.bf16.mxu0 %v5382_v20  ;;  %v5400_v53 = vpack.c.bf16 %v420_v11, %v416_v32 }
  0x86   : > { %7965 = vst [vmem:[#allocation96_spill] sm:$0xff] %v5368_v49  ;;  %7966 = vst [vmem:[#allocation97_spill] sm:$0xff] %v5372_v14  ;;  %v317_v49 = vld [vmem:[#allocation4 + $0x328] sm:$0xff]  ;;  %v5394_v14 = vsub.f32 %v312_v31, %v2128_v9  ;;  %3930 = vmatpush1.bf16.msra.mxu1 %v5386_v7  ;;  %v5402_v22 = vsub.f32 %v253_v36, %v416_v32  ;;  %v5404_v55 = vsub.f32 %v255_v59, %v420_v11 }
  0x87   : > { %7967 = vst [vmem:[#allocation98_spill] sm:$0xff] %v5374_v47  ;;  %7968 = vst [vmem:[#allocation99_spill] sm:$0xff] %v5376_v26  ;;  %v254_v26 = vld [vmem:[#allocation4 + $0x130] sm:$0xff]  ;;  %v316_v47 = vld [vmem:[#allocation4 + $0x320] sm:$0xff]  ;;  %v2134_v38 = vand.u32 4294901760, %v317_v49  ;;  %4314 = vmatpush1.bf16.msra.mxu0 %v5392_v0  ;;  %v2138_v31 = vand.u32 4294901760, %v319_v24  ;;  %3932 = vmatprep.subr.bf16.mxu1 %v5400_v53 }
  0x88   : > { %7969 = vst [vmem:[#allocation100_spill] sm:$0xff] %v5380_v15  ;;  %7970 = vst [vmem:[#allocation101_spill] sm:$0xff] %v5382_v20  ;;  %v5396_v15 = vsub.f32 %v314_v21, %v2132_v42  ;;  %v418_v37 = vand.u32 4294901760, %v252_v1  ;;  %v422_v21 = vand.u32 4294901760, %v254_v26  ;;  %v2136_v2 = vand.u32 4294901760, %v316_v47 }
  0x89   : > { %7971 = vst [vmem:[#allocation102_spill] sm:$0xff] %v5384_v60  ;;  %7972 = vst [vmem:[#allocation103_spill] sm:$0xff] %v5386_v7  ;;  %v5408_v9 = vsub.f32 %v317_v49, %v2134_v38  ;;  %v2140_v42 = vand.u32 4294901760, %v318_v28  ;;  %v424_v20 = vand.u32 4294901760, %v257_v8  ;;  %v428_v7 = vand.u32 4294901760, %v259_v54  ;;  %v263_v60 = vld [vmem:[#allocation4 + $0x178] sm:$0xff] }
  0x8a   : > { %7973 = vst [vmem:[#allocation104_spill] sm:$0xff] %v5388_v29  ;;  %7974 = vst [vmem:[#allocation105_spill] sm:$0xff] %v5390_v45  ;;  %v5410_v32 = vpack.c.bf16 %v2138_v31, %v2134_v38  ;;  %v5412_v59 = vsub.f32 %v319_v24, %v2138_v31  ;;  %v5414_v11 = vpack.c.bf16 %v422_v21, %v418_v37  ;;  %v322_v29 = vld [vmem:[#allocation4 + $0x350] sm:$0xff]  ;;  %v261_v38 = vld [vmem:[#allocation4 + $0x168] sm:$0xff] }
  0x8b   : > { %7975 = vst [vmem:[#allocation106_spill] sm:$0xff] %v5392_v0  ;;  %7976 = vst [vmem:[#allocation107_spill] sm:$0xff] %v5394_v14  ;;  %v323_v14 = vld [vmem:[#allocation4 + $0x358] sm:$0xff]  ;;  %v5416_v36 = vsub.f32 %v252_v1, %v418_v37  ;;  %v256_v0 = vld [vmem:[#allocation4 + $0x140] sm:$0xff]  ;;  %v5418_v45 = vsub.f32 %v254_v26, %v422_v21  ;;  %v5420_v49 = vpack.c.bf16 %v2140_v42, %v2136_v2 }
  0x8c   : > { %7977 = vst [vmem:[#allocation108_spill] sm:$0xff] %v5396_v15  ;;  %7978 = vst [vmem:[#allocation109_spill] sm:$0xff] %v5400_v53  ;;  %v321_v15 = vld [vmem:[#allocation4 + $0x348] sm:$0xff]  ;;  %v5422_v53 = vsub.f32 %v316_v47, %v2136_v2  ;;  %4316 = vmatprep.subr.bf16.mxu0 %v5410_v32  ;;  %3934 = vmatpush1.bf16.msra.mxu1 %v5414_v11  ;;  %v5428_v24 = vpack.c.bf16 %v428_v7, %v424_v20  ;;  %v2146_v47 = vand.u32 4294901760, %v323_v14 }
  0x8d   : > { %7979 = vst [vmem:[#allocation110_spill] sm:$0xff] %v5402_v22  ;;  %7980 = vst [vmem:[#allocation111_spill] sm:$0xff] %v5404_v55  ;;  %v258_v55 = vld [vmem:[#allocation4 + $0x150] sm:$0xff]  ;;  %v320_v22 = vld [vmem:[#allocation4 + $0x340] sm:$0xff]  ;;  %v5430_v1 = vsub.f32 %v257_v8, %v424_v20  ;;  %v5432_v31 = vsub.f32 %v259_v54, %v428_v7  ;;  %v2142_v26 = vand.u32 4294901760, %v321_v15  ;;  %4318 = vmatpush1.bf16.msra.mxu0 %v5420_v49  ;;  %v426_v37 = vand.u32 4294901760, %v256_v0 }
  0x8e   : > { %7981 = vst [vmem:[#allocation112_spill] sm:$0xff] %v5408_v9  ;;  %7982 = vst [vmem:[#allocation113_spill] sm:$0xff] %v5410_v32  ;;  %v5424_v9 = vsub.f32 %v318_v28, %v2140_v42  ;;  %v430_v28 = vand.u32 4294901760, %v258_v55  ;;  %v2144_v21 = vand.u32 4294901760, %v320_v22  ;;  %3936 = vmatprep.subr.bf16.mxu1 %v5428_v24  ;;  %v2148_v42 = vand.u32 4294901760, %v322_v29 }
  0x8f   : > { %7983 = vst [vmem:[#allocation114_spill] sm:$0xff] %v5412_v59  ;;  %7984 = vst [vmem:[#allocation115_spill] sm:$0xff] %v5414_v11  ;;  %v5436_v2 = vsub.f32 %v321_v15, %v2142_v26  ;;  %v432_v32 = vand.u32 4294901760, %v261_v38  ;;  %v436_v11 = vand.u32 4294901760, %v263_v60  ;;  %v5438_v20 = vpack.c.bf16 %v2146_v47, %v2142_v26  ;;  %v265_v26 = vld [vmem:[#allocation4 + $0x188] sm:$0xff]  ;;  %v267_v59 = vld [vmem:[#allocation4 + $0x198] sm:$0xff] }
  0x90   : > { %7985 = vst [vmem:[#allocation116_spill] sm:$0xff] %v5416_v36  ;;  %7986 = vst [vmem:[#allocation117_spill] sm:$0xff] %v5418_v45  ;;  %v5440_v54 = vsub.f32 %v323_v14, %v2146_v47  ;;  %v5442_v7 = vpack.c.bf16 %v430_v28, %v426_v37  ;;  %v5444_v8 = vsub.f32 %v256_v0, %v426_v37  ;;  %v326_v36 = vld [vmem:[#allocation4 + $0x370] sm:$0xff] }
  0x91   : > { %7987 = vst [vmem:[#allocation118_spill] sm:$0xff] %v5420_v49  ;;  %7988 = vst [vmem:[#allocation119_spill] sm:$0xff] %v5422_v53  ;;  %v327_v53 = vld [vmem:[#allocation4 + $0x378] sm:$0xff]  ;;  %v260_v49 = vld [vmem:[#allocation4 + $0x160] sm:$0xff]  ;;  %v5446_v45 = vsub.f32 %v258_v55, %v430_v28  ;;  %v5448_v15 = vpack.c.bf16 %v2148_v42, %v2144_v21  ;;  %4320 = vmatprep.subr.bf16.mxu0 %v5438_v20  ;;  %v5456_v14 = vpack.c.bf16 %v436_v11, %v432_v32 }
  0x92   : > { %7989 = vst [vmem:[#allocation120_spill] sm:$0xff] %v5424_v9  ;;  %7990 = vst [vmem:[#allocation121_spill] sm:$0xff] %v5428_v24  ;;  %v325_v9 = vld [vmem:[#allocation4 + $0x368] sm:$0xff]  ;;  %v5450_v24 = vsub.f32 %v320_v22, %v2144_v21  ;;  %3938 = vmatpush1.bf16.msra.mxu1 %v5442_v7  ;;  %v5458_v0 = vsub.f32 %v261_v38, %v432_v32  ;;  %v5460_v47 = vsub.f32 %v263_v60, %v436_v11 }
  0x93   : > { %7991 = vst [vmem:[#allocation122_spill] sm:$0xff] %v5430_v1  ;;  %7992 = vst [vmem:[#allocation123_spill] sm:$0xff] %v5432_v31  ;;  %v262_v31 = vld [vmem:[#allocation4 + $0x170] sm:$0xff]  ;;  %v324_v1 = vld [vmem:[#allocation4 + $0x360] sm:$0xff]  ;;  %v2150_v55 = vand.u32 4294901760, %v325_v9  ;;  %4322 = vmatpush1.bf16.msra.mxu0 %v5448_v15  ;;  %v2154_v22 = vand.u32 4294901760, %v327_v53  ;;  %3940 = vmatprep.subr.bf16.mxu1 %v5456_v14 }
  0x94   : > { %7993 = vst [vmem:[#allocation124_spill] sm:$0xff] %v5436_v2  ;;  %7994 = vst [vmem:[#allocation125_spill] sm:$0xff] %v5438_v20  ;;  %v5452_v2 = vsub.f32 %v322_v29, %v2148_v42  ;;  %v434_v37 = vand.u32 4294901760, %v260_v49  ;;  %v438_v29 = vand.u32 4294901760, %v262_v31  ;;  %v2152_v28 = vand.u32 4294901760, %v324_v1 }
  0x95   : > { %7995 = vst [vmem:[#allocation126_spill] sm:$0xff] %v5440_v54  ;;  %7996 = vst [vmem:[#allocation127_spill] sm:$0xff] %v5442_v7  ;;  %v5464_v21 = vsub.f32 %v325_v9, %v2150_v55  ;;  %v2156_v42 = vand.u32 4294901760, %v326_v36  ;;  %v440_v20 = vand.u32 4294901760, %v265_v26  ;;  %v444_v7 = vand.u32 4294901760, %v267_v59  ;;  %v271_v54 = vld [vmem:[#allocation4 + $0x1b8] sm:$0xff] }
  0x96   : > { %7997 = vst [vmem:[#allocation128_spill] sm:$0xff] %v5444_v8  ;;  %7998 = vst [vmem:[#allocation129_spill] sm:$0xff] %v5446_v45  ;;  %v5466_v32 = vpack.c.bf16 %v2154_v22, %v2150_v55  ;;  %v5468_v60 = vsub.f32 %v327_v53, %v2154_v22  ;;  %v5470_v11 = vpack.c.bf16 %v438_v29, %v434_v37  ;;  %v330_v8 = vld [vmem:[#allocation4 + $0x390] sm:$0xff]  ;;  %v269_v55 = vld [vmem:[#allocation4 + $0x1a8] sm:$0xff] }
  0x97   : > { %7999 = vst [vmem:[#allocation130_spill] sm:$0xff] %v5448_v15  ;;  %8000 = vst [vmem:[#allocation131_spill] sm:$0xff] %v5450_v24  ;;  %v331_v24 = vld [vmem:[#allocation4 + $0x398] sm:$0xff]  ;;  %v5472_v38 = vsub.f32 %v260_v49, %v434_v37  ;;  %v264_v15 = vld [vmem:[#allocation4 + $0x180] sm:$0xff]  ;;  %v5474_v45 = vsub.f32 %v262_v31, %v438_v29  ;;  %v5476_v9 = vpack.c.bf16 %v2156_v42, %v2152_v28 }
  0x98   : > { %8001 = vst [vmem:[#allocation132_spill] sm:$0xff] %v5452_v2  ;;  %8002 = vst [vmem:[#allocation133_spill] sm:$0xff] %v5456_v14  ;;  %v329_v2 = vld [vmem:[#allocation4 + $0x388] sm:$0xff]  ;;  %v5478_v14 = vsub.f32 %v324_v1, %v2152_v28  ;;  %4324 = vmatprep.subr.bf16.mxu0 %v5466_v32  ;;  %3942 = vmatpush1.bf16.msra.mxu1 %v5470_v11  ;;  %v5484_v53 = vpack.c.bf16 %v444_v7, %v440_v20  ;;  %v2162_v1 = vand.u32 4294901760, %v331_v24 }
  0x99   : > { %8003 = vst [vmem:[#allocation134_spill] sm:$0xff] %v5458_v0  ;;  %8004 = vst [vmem:[#allocation135_spill] sm:$0xff] %v5460_v47  ;;  %v266_v47 = vld [vmem:[#allocation4 + $0x190] sm:$0xff]  ;;  %v328_v0 = vld [vmem:[#allocation4 + $0x380] sm:$0xff]  ;;  %v5486_v49 = vsub.f32 %v265_v26, %v440_v20  ;;  %v5488_v22 = vsub.f32 %v267_v59, %v444_v7  ;;  %v2158_v31 = vand.u32 4294901760, %v329_v2  ;;  %4326 = vmatpush1.bf16.msra.mxu0 %v5476_v9  ;;  %v442_v37 = vand.u32 4294901760, %v264_v15 }
  0x9a   : > { %8005 = vst [vmem:[#allocation136_spill] sm:$0xff] %v5464_v21  ;;  %8006 = vst [vmem:[#allocation137_spill] sm:$0xff] %v5466_v32  ;;  %v5480_v21 = vsub.f32 %v326_v36, %v2156_v42  ;;  %v446_v36 = vand.u32 4294901760, %v266_v47  ;;  %v2160_v29 = vand.u32 4294901760, %v328_v0  ;;  %3944 = vmatprep.subr.bf16.mxu1 %v5484_v53  ;;  %v2164_v42 = vand.u32 4294901760, %v330_v8 }
  0x9b   : > { %8007 = vst [vmem:[#allocation138_spill] sm:$0xff] %v5468_v60  ;;  %8008 = vst [vmem:[#allocation139_spill] sm:$0xff] %v5470_v11  ;;  %v5492_v28 = vsub.f32 %v329_v2, %v2158_v31  ;;  %v448_v32 = vand.u32 4294901760, %v269_v55  ;;  %v452_v11 = vand.u32 4294901760, %v271_v54  ;;  %v5494_v20 = vpack.c.bf16 %v2162_v1, %v2158_v31  ;;  %v273_v31 = vld [vmem:[#allocation4 + $0x1c8] sm:$0xff]  ;;  %v275_v60 = vld [vmem:[#allocation4 + $0x1d8] sm:$0xff] }
  0x9c   : > { %8009 = vst [vmem:[#allocation140_spill] sm:$0xff] %v5472_v38  ;;  %8010 = vst [vmem:[#allocation141_spill] sm:$0xff] %v5474_v45  ;;  %v5496_v59 = vsub.f32 %v331_v24, %v2162_v1  ;;  %v5498_v7 = vpack.c.bf16 %v446_v36, %v442_v37  ;;  %v5500_v26 = vsub.f32 %v264_v15, %v442_v37  ;;  %v334_v38 = vld [vmem:[#allocation4 + $0x3b0] sm:$0xff] }
  0x9d   : > { %8011 = vst [vmem:[#allocation142_spill] sm:$0xff] %v5476_v9  ;;  %8012 = vst [vmem:[#allocation143_spill] sm:$0xff] %v5478_v14  ;;  %v335_v14 = vld [vmem:[#allocation4 + $0x3b8] sm:$0xff]  ;;  %v268_v9 = vld [vmem:[#allocation4 + $0x1a0] sm:$0xff]  ;;  %v5502_v45 = vsub.f32 %v266_v47, %v446_v36  ;;  %v5504_v2 = vpack.c.bf16 %v2164_v42, %v2160_v29  ;;  %4328 = vmatprep.subr.bf16.mxu0 %v5494_v20  ;;  %v5512_v24 = vpack.c.bf16 %v452_v11, %v448_v32 }
  0x9e   : > { %8013 = vst [vmem:[#allocation144_spill] sm:$0xff] %v5480_v21  ;;  %8014 = vst [vmem:[#allocation145_spill] sm:$0xff] %v5484_v53  ;;  %v333_v21 = vld [vmem:[#allocation4 + $0x3a8] sm:$0xff]  ;;  %v5506_v53 = vsub.f32 %v328_v0, %v2160_v29  ;;  %3946 = vmatpush1.bf16.msra.mxu1 %v5498_v7  ;;  %v5514_v15 = vsub.f32 %v269_v55, %v448_v32  ;;  %v5516_v1 = vsub.f32 %v271_v54, %v452_v11 }
  0x9f   : > { %8015 = vst [vmem:[#allocation146_spill] sm:$0xff] %v5486_v49  ;;  %8016 = vst [vmem:[#allocation147_spill] sm:$0xff] %v5488_v22  ;;  %v270_v22 = vld [vmem:[#allocation4 + $0x1b0] sm:$0xff]  ;;  %v332_v49 = vld [vmem:[#allocation4 + $0x3a0] sm:$0xff]  ;;  %v2166_v47 = vand.u32 4294901760, %v333_v21  ;;  %4330 = vmatpush1.bf16.msra.mxu0 %v5504_v2  ;;  %v2170_v0 = vand.u32 4294901760, %v335_v14  ;;  %3948 = vmatprep.subr.bf16.mxu1 %v5512_v24 }
  0xa0   : > { %8017 = vst [vmem:[#allocation148_spill] sm:$0xff] %v5492_v28  ;;  %8018 = vst [vmem:[#allocation149_spill] sm:$0xff] %v5494_v20  ;;  %v5508_v28 = vsub.f32 %v330_v8, %v2164_v42  ;;  %v450_v37 = vand.u32 4294901760, %v268_v9  ;;  %v454_v8 = vand.u32 4294901760, %v270_v22  ;;  %v2168_v36 = vand.u32 4294901760, %v332_v49 }
  0xa1   : > { %8019 = vst [vmem:[#allocation150_spill] sm:$0xff] %v5496_v59  ;;  %8020 = vst [vmem:[#allocation151_spill] sm:$0xff] %v5498_v7  ;;  %v5520_v29 = vsub.f32 %v333_v21, %v2166_v47  ;;  %v2172_v42 = vand.u32 4294901760, %v334_v38  ;;  %v456_v20 = vand.u32 4294901760, %v273_v31  ;;  %v460_v7 = vand.u32 4294901760, %v275_v60  ;;  %v279_v59 = vld [vmem:[#allocation4 + $0x1f8] sm:$0xff] }
  0xa2   : > { %8021 = vst [vmem:[#allocation152_spill] sm:$0xff] %v5500_v26  ;;  %8022 = vst [vmem:[#allocation153_spill] sm:$0xff] %v5502_v45  ;;  %v5522_v32 = vpack.c.bf16 %v2170_v0, %v2166_v47  ;;  %v5524_v54 = vsub.f32 %v335_v14, %v2170_v0  ;;  %v5526_v11 = vpack.c.bf16 %v454_v8, %v450_v37  ;;  %v338_v26 = vld [vmem:[#allocation4 + $0x3d0] sm:$0xff]  ;;  %v277_v47 = vld [vmem:[#allocation4 + $0x1e8] sm:$0xff] }
  0xa3   : > { %8023 = vst [vmem:[#allocation154_spill] sm:$0xff] %v5504_v2  ;;  %8024 = vst [vmem:[#allocation155_spill] sm:$0xff] %v5506_v53  ;;  %v339_v53 = vld [vmem:[#allocation4 + $0x3d8] sm:$0xff]  ;;  %v5528_v55 = vsub.f32 %v268_v9, %v450_v37  ;;  %v272_v2 = vld [vmem:[#allocation4 + $0x1c0] sm:$0xff]  ;;  %v5530_v45 = vsub.f32 %v270_v22, %v454_v8  ;;  %v5532_v21 = vpack.c.bf16 %v2172_v42, %v2168_v36 }
  0xa4   : > { %8025 = vst [vmem:[#allocation156_spill] sm:$0xff] %v5508_v28  ;;  %8026 = vst [vmem:[#allocation157_spill] sm:$0xff] %v5512_v24  ;;  %v337_v28 = vld [vmem:[#allocation4 + $0x3c8] sm:$0xff]  ;;  %v5534_v24 = vsub.f32 %v332_v49, %v2168_v36  ;;  %4332 = vmatprep.subr.bf16.mxu0 %v5522_v32  ;;  %3950 = vmatpush1.bf16.msra.mxu1 %v5526_v11  ;;  %v5540_v14 = vpack.c.bf16 %v460_v7, %v456_v20  ;;  %v2178_v49 = vand.u32 4294901760, %v339_v53 }
  0xa5   : > { %8027 = vst [vmem:[#allocation158_spill] sm:$0xff] %v5514_v15  ;;  %8028 = vst [vmem:[#allocation159_spill] sm:$0xff] %v5516_v1  ;;  %v274_v1 = vld [vmem:[#allocation4 + $0x1d0] sm:$0xff]  ;;  %v336_v15 = vld [vmem:[#allocation4 + $0x3c0] sm:$0xff]  ;;  %v5542_v9 = vsub.f32 %v273_v31, %v456_v20  ;;  %v5544_v0 = vsub.f32 %v275_v60, %v460_v7  ;;  %v2174_v22 = vand.u32 4294901760, %v337_v28  ;;  %4334 = vmatpush1.bf16.msra.mxu0 %v5532_v21  ;;  %v458_v37 = vand.u32 4294901760, %v272_v2 }
  0xa6   : > { %8029 = vst [vmem:[#allocation160_spill] sm:$0xff] %v5520_v29  ;;  %8030 = vst [vmem:[#allocation161_spill] sm:$0xff] %v5522_v32  ;;  %v5536_v29 = vsub.f32 %v334_v38, %v2172_v42  ;;  %v462_v38 = vand.u32 4294901760, %v274_v1  ;;  %v2176_v8 = vand.u32 4294901760, %v336_v15  ;;  %3952 = vmatprep.subr.bf16.mxu1 %v5540_v14  ;;  %v2180_v42 = vand.u32 4294901760, %v338_v26  ;;  %v343_v20 = vld [vmem:[#allocation4 + $0x3f8] sm:$0xff] }
  0xa7   : > { %8031 = vst [vmem:[#allocation162_spill] sm:$0xff] %v5524_v54  ;;  %8032 = vst [vmem:[#allocation163_spill] sm:$0xff] %v5526_v11  ;;  %v5548_v36 = vsub.f32 %v337_v28, %v2174_v22  ;;  %v464_v32 = vand.u32 4294901760, %v277_v47  ;;  %v468_v11 = vand.u32 4294901760, %v279_v59  ;;  %v5550_v31 = vpack.c.bf16 %v2178_v49, %v2174_v22  ;;  %v185_v22 = vld [vmem:[%s5139_s23 + $0x8] sm:$0xff] }
  0xa8   : > { %8033 = vst [vmem:[#allocation164_spill] sm:$0xff] %v5528_v55  ;;  %8034 = vst [vmem:[#allocation165_spill] sm:$0xff] %v5530_v45  ;;  %v5552_v60 = vsub.f32 %v339_v53, %v2178_v49  ;;  %v5554_v7 = vpack.c.bf16 %v462_v38, %v458_v37  ;;  %v5560_v28 = vpack.c.bf16 %v2180_v42, %v2176_v8  ;;  %v342_v55 = vld [vmem:[#allocation4 + $0x3f0] sm:$0xff] }
  0xa9   : > { %8035 = vst [vmem:[#allocation166_spill] sm:$0xff] %v5532_v21  ;;  %8036 = vst [vmem:[#allocation167_spill] sm:$0xff] %v5534_v24  ;;  %v5556_v21 = vsub.f32 %v272_v2, %v458_v37  ;;  %v340_v24 = vld [vmem:[#allocation4 + $0x3e0] sm:$0xff]  ;;  %v5564_v45 = vsub.f32 %v338_v26, %v2180_v42  ;;  %4336 = vmatprep.subr.bf16.mxu0 %v5550_v31  ;;  %v5569_v53 = vpack.c.bf16 %v468_v11, %v464_v32 }
  0xaa   : > { %8037 = vst [vmem:[#allocation168_spill] sm:$0xff] %v5536_v29  ;;  %8038 = vst [vmem:[#allocation169_spill] sm:$0xff] %v5540_v14  ;;  %v341_v29 = vld [vmem:[#allocation4 + $0x3e8] sm:$0xff]  ;;  %v5558_v14 = vsub.f32 %v274_v1, %v462_v38  ;;  %3954 = vmatpush1.bf16.msra.mxu1 %v5554_v7  ;;  %v5571_v2 = vsub.f32 %v277_v47, %v464_v32  ;;  %v5573_v49 = vsub.f32 %v279_v59, %v468_v11  ;;  %v187_v47 = vld [vmem:[%s5139_s23 + $0x18] sm:$0xff] }
  0xab   : > { %8039 = vst [vmem:[#allocation170_spill] sm:$0xff] %v5542_v9  ;;  %8040 = vst [vmem:[#allocation171_spill] sm:$0xff] %v5544_v0  ;;  %v276_v0 = vld [vmem:[#allocation4 + $0x1e0] sm:$0xff]  ;;  %v278_v9 = vld [vmem:[#allocation4 + $0x1f0] sm:$0xff]  ;;  %v2182_v1 = vand.u32 4294901760, %v341_v29  ;;  %4338 = vmatpush1.bf16.msra.mxu0 %v5560_v28  ;;  %v2184_v38 = vand.u32 4294901760, %v340_v24  ;;  %3956 = vmatprep.subr.bf16.mxu1 %v5569_v53 }
  0xac   : > { %8041 = vst [vmem:[#allocation172_spill] sm:$0xff] %v5548_v36  ;;  %8042 = vst [vmem:[#allocation173_spill] sm:$0xff] %v5550_v31  ;;  %v5562_v36 = vsub.f32 %v336_v15, %v2176_v8  ;;  %v2186_v15 = vand.u32 4294901760, %v343_v20  ;;  %v466_v26 = vand.u32 4294901760, %v276_v0  ;;  %v470_v37 = vand.u32 4294901760, %v278_v9 }
  0xad   : > { %8043 = vst [vmem:[#allocation174_spill] sm:$0xff] %v5552_v60  ;;  %8044 = vst [vmem:[#allocation175_spill] sm:$0xff] %v5554_v7  ;;  %v5577_v8 = vsub.f32 %v341_v29, %v2182_v1  ;;  %v2188_v42 = vand.u32 4294901760, %v342_v55  ;;  %v5579_v7 = vand.u32 4294901760, %v185_v22  ;;  %v7430_v32 = vand.u32 4294901760, %v5151_v16 }
  0xae   : > { %8045 = vst [vmem:[#allocation176_spill] sm:$0xff] %v5556_v21  ;;  %8046 = vst [vmem:[#allocation177_spill] sm:$0xff] %v5558_v14  ;;  %v5583_v59 = vpack.c.bf16 %v2186_v15, %v2182_v1  ;;  %v5585_v11 = vsub.f32 %v343_v20, %v2186_v15  ;;  %v5587_v31 = vpack.c.bf16 %v470_v37, %v466_v26  ;;  %v5609_v1 = vand.u32 4294901760, %v187_v47 }
  0xaf   : > { %8047 = vst [vmem:[#allocation178_spill] sm:$0xff] %v5560_v28  ;;  %8048 = vst [vmem:[#allocation179_spill] sm:$0xff] %v5562_v36  ;;  %v5589_v28 = vsub.f32 %v276_v0, %v466_v26  ;;  %v5596_v29 = vsub.f32 %v340_v24, %v2184_v38  ;;  %v5603_v20 = vsub.f32 %v185_v22, %v5579_v7  ;;  %v7438_v24 = vand.u32 4294901760, %v5155_v18 }
  0xb0   : > { %8049 = vst [vmem:[#allocation180_spill] sm:$0xff] %v5564_v45  ;;  %8050 = vst [vmem:[#allocation181_spill] sm:$0xff] %v5569_v53  ;;  %v5594_v53 = vpack.c.bf16 %v2188_v42, %v2184_v38  ;;  %4340 = vmatprep.subr.bf16.mxu0 %v5583_v59  ;;  %3958 = vmatpush1.bf16.msra.mxu1 %v5587_v31  ;;  %v604_v0 = vsub.f32 %v5151_v16, %v7430_v32 }
  0xb1   : > { %8051 = vst [vmem:[#allocation182_spill] sm:$0xff] %v5571_v2  ;;  %8052 = vst [vmem:[#allocation183_spill] sm:$0xff] %v5573_v49  ;;  %v184_v49 = vld [vmem:[%s5139_s23] sm:$0xff]  ;;  %v5592_v2 = vsub.f32 %v278_v9, %v470_v37  ;;  %v7433_v9 = vand.u32 4294901760, %v5153_v17  ;;  %v2322_v32 = vsub.f32 %v5155_v18, %v7438_v24  ;;  %v7459_v24 = vand.u32 4294901760, %v5166_v27 }
  0xb2   : > { %8053 = vst [vmem:[#allocation184_spill] sm:$0xff] %v5577_v8  ;;  %8054 = vst [vmem:[#allocation185_spill] sm:$0xff] %v5579_v7  ;;  %v5598_v8 = vsub.f32 %v342_v55, %v2188_v42  ;;  %4342 = vmatpush1.bf16.msra.mxu0 %v5594_v53  ;;  %v7445_v55 = vand.u32 4294901760, %v5159_v23  ;;  %v5614_v15 = vand.u32 4294901760, %v184_v49  ;;  %v605_v37 = vand.u32 4294901760, %v604_v0 }
  0xb3   : > { %8055 = vst [vmem:[#allocation186_spill] sm:$0xff] %v5583_v59  ;;  %8056 = vst [vmem:[#allocation187_spill] sm:$0xff] %v5585_v11  ;;  %v616_v38 = vsub.f32 %v5153_v17, %v7433_v9  ;;  %v5622_v42 = vsub.f32 %v187_v47, %v5609_v1  ;;  %v8068_v0 = vand.u32 4294901760, %v5163_v25  ;;  %v8069_v9 = vand.u32 4294901760, %v5603_v20 }
  0xb4   : > { %8057 = vst [vmem:[#allocation188_spill] sm:$0xff] %v5587_v31  ;;  %8058 = vst [vmem:[#allocation189_spill] sm:$0xff] %v5589_v28  ;;  %v5631_v22 = vsub.f32 %v184_v49, %v5614_v15  ;;  %v2323_v7 = vand.u32 4294901760, %v2322_v32 }
  0xb5   : > { %8059 = vst [vmem:[#allocation190_spill] sm:$0xff] %v5592_v2  ;;  %8060 = vst [vmem:[#allocation191_spill] sm:$0xff] %v5594_v53  ;;  %v2334_v53 = vsub.f32 %v5159_v23, %v7445_v55  ;;  %v610_v26 = vsub.f32 %v5163_v25, %v8068_v0  ;;  %v475_v47 = vsub.f32 %v5603_v20, %v8069_v9  ;;  %v617_v31 = vand.u32 4294901760, %v616_v38 }
  0xb6   : > { %8061 = vst [vmem:[#allocation192_spill] sm:$0xff] %v5596_v29  ;;  %8062 = vst [vmem:[#allocation193_spill] sm:$0xff] %v5598_v8  ;;  %v7452_v59 = vand.u32 4294901760, %v5622_v42  ;;  %v7453_v55 = vand.u32 4294901760, %v5631_v22  ;;  %v622_v9 = vsub.f32 %v5166_v27, %v7459_v24 }
  0xb7   : > { %8063 = vst [vmem:[#allocation194_spill] sm:$0xff] %v5603_v20  ;;  %8064 = vst [vmem:[#allocation195_spill] sm:$0xff] %v5609_v1  ;;  %v186_v1 = vld [vmem:[%s5139_s23 + $0x10] sm:$0xff]  ;;  %v2335_v18 = vand.u32 4294901760, %v2334_v53  ;;  %v611_v49 = vand.u32 4294901760, %v610_v26  ;;  %v3959_v23 = vpack.c.bf16 %v617_v31, %v605_v37  ;;  %v7455_v53 = vand.u32 4294901760, %v5172_v39 }
  0xb8   : > { %8065 = vst [vmem:[#allocation196_spill] sm:$0xff] %v5614_v15  ;;  %8066 = vst [vmem:[#allocation197_spill] sm:$0xff] %v5622_v42  ;;  %v476_v15 = vand.u32 4294901760, %v475_v47  ;;  %v2193_v0 = vsub.f32 %v5622_v42, %v7452_v59  ;;  %v481_v20 = vsub.f32 %v5631_v22, %v7453_v55  ;;  %v5652_v32 = vand.u32 4294901760, %v186_v1 }
  0xb9   : > { %8067 = vst [vmem:[#allocation198_spill] sm:$0xff] %v5631_v22  ;;  %v4343_v38 = vpack.c.bf16 %v2335_v18, %v2323_v7  ;;  %3960 = vmatprep.subr.bf16.mxu1 %v3959_v23  ;;  %v623_v26 = vand.u32 4294901760, %v622_v9  ;;  %v7454_v37 = vand.u32 4294901760, %v5174_v40  ;;  %v7457_v47 = vand.u32 4294901760, %v5176_v41 }
  0xba   : > { %8070 = vst [vmem:[#allocation199_spill] sm:$0xff] %v5652_v32  ;;  %477 = vmatprep.mubr.f32.mxu1 %v476_v15  ;;  %v2194_v31 = vand.u32 4294901760, %v2193_v0  ;;  %v482_v59 = vand.u32 4294901760, %v481_v20  ;;  %v5658_v18 = vsub.f32 %v186_v1, %v5652_v32  ;;  %v2328_v7 = vsub.f32 %v5172_v39, %v7455_v53 }
  0xbb   : > { %4344 = vmatprep.subr.bf16.mxu0 %v4343_v38  ;;  %v7456_v55 = vand.u32 4294901760, %v5180_v46  ;;  %v3961_v15 = vpack.c.bf16 %v623_v26, %v611_v49  ;;  %v2340_v23 = vsub.f32 %v5174_v40, %v7454_v37  ;;  %v628_v0 = vsub.f32 %v5176_v41, %v7457_v47 }
  0xbc   : > { %8071 = vst [vmem:[#allocation200_spill] sm:$0xff] %v5658_v18  ;;  %2195 = vmatprep.mubr.f32.mxu0 %v2194_v31  ;;  %v7458_v20 = vand.u32 4294901760, %v5184_v48  ;;  %483 = vmatmul.mubr.f32.vlgmr.msra.gmra.mrb[0].mxu1 %v482_v59  ;;  %v7464_v1 = vand.u32 4294901760, %v5658_v18  ;;  %v2329_v9 = vand.u32 4294901760, %v2328_v7  ;;  %v7465_v49 = vand.u32 4294901760, %v5187_v50 }
  0xbd   : > { %v640_v38 = vsub.f32 %v5180_v46, %v7456_v55  ;;  %3962 = vmatpush1.bf16.msra.mxu1 %v3961_v15  ;;  %v2341_v31 = vand.u32 4294901760, %v2340_v23  ;;  %v629_v26 = vand.u32 4294901760, %v628_v0  ;;  %v7466_v53 = vand.u32 4294901760, %v5189_v52 }
  0xbe   : > { %v2346_v37 = vsub.f32 %v5184_v48, %v7458_v20  ;;  %v2199_v59 = vsub.f32 %v5658_v18, %v7464_v1  ;;  %v2358_v55 = vsub.f32 %v5187_v50, %v7465_v49  ;;  %v7473_v47 = vand.u32 4294901760, %v5195_v61 }
  0xbf   : > { %v641_v7 = vand.u32 4294901760, %v640_v38  ;;  %v4345_v15 = vpack.c.bf16 %v2341_v31, %v2329_v9  ;;  %v634_v0 = vsub.f32 %v5189_v52, %v7466_v53  ;;  %v7467_v20 = vand.u32 4294901760, %v5197_v62 }
  0xc0   : > { %v2347_v23 = vand.u32 4294901760, %v2346_v37  ;;  %v2200_v24 = vand.u32 4294901760, %v2199_v59  ;;  %v2359_v42 = vand.u32 4294901760, %v2358_v55  ;;  %v646_v38 = vsub.f32 %v5195_v61, %v7473_v47 }
  0xc1   : > { %v3963_v22 = vpack.c.bf16 %v641_v7, %v629_v26  ;;  %v635_v1 = vand.u32 4294901760, %v634_v0  ;;  %v2352_v49 = vsub.f32 %v5197_v62, %v7467_v20  ;;  %v7468_v37 = vand.u32 4294901760, %v5201_v4 }
  0xc2   : > { %v7471_v9 = vand.u32 4294901760, %v5205_v6  ;;  %2201 = vmatmul.mubr.f32.vlgmr.msra.gmra.mrb[0].mxu0 %v2200_v24  ;;  %v4347_v31 = vpack.c.bf16 %v2359_v42, %v2347_v23  ;;  %v647_v53 = vand.u32 4294901760, %v646_v38  ;;  %v7469_v26 = vand.u32 4294901760, %v5208_v10 }
  0xc3   : > { %3964 = vmatprep.subr.bf16.mxu1 %v3963_v22  ;;  %v7470_v55 = vand.u32 4294901760, %v5212_v12  ;;  %4346 = vmatpush1.bf16.msra.mxu0 %v4345_v15  ;;  %v2353_v59 = vand.u32 4294901760, %v2352_v49  ;;  %v2364_v7 = vsub.f32 %v5201_v4, %v7468_v37  ;;  %v7472_v20 = vand.u32 4294901760, %v5214_v13 }
  0xc4   : > { %v652_v0 = vsub.f32 %v5205_v6, %v7471_v9  ;;  %4348 = vmatprep.subr.bf16.mxu0 %v4347_v31  ;;  %v3965_v24 = vpack.c.bf16 %v647_v53, %v635_v1  ;;  %v664_v22 = vsub.f32 %v5208_v10, %v7469_v26  ;;  %v7474_v49 = vand.u32 4294901760, %v5221_v33 }
  0xc5   : > { %v2370_v42 = vsub.f32 %v5212_v12, %v7470_v55  ;;  %v2365_v15 = vand.u32 4294901760, %v2364_v7  ;;  %v2382_v38 = vsub.f32 %v5214_v13, %v7472_v20  ;;  %v7481_v37 = vand.u32 4294901760, %v5223_v34 }
  0xc6   : > { %v653_v23 = vand.u32 4294901760, %v652_v0  ;;  %3966 = vmatpush1.bf16.msra.mxu1 %v3965_v24  ;;  %v665_v53 = vand.u32 4294901760, %v664_v22  ;;  %v658_v31 = vsub.f32 %v5221_v33, %v7474_v49  ;;  %v7476_v26 = vand.u32 4294901760, %v5227_v43 }
  0xc7   : > { %v2371_v1 = vand.u32 4294901760, %v2370_v42  ;;  %v4349_v55 = vpack.c.bf16 %v2365_v15, %v2353_v59  ;;  %v2383_v9 = vand.u32 4294901760, %v2382_v38  ;;  %v670_v7 = vsub.f32 %v5223_v34, %v7481_v37 }
  0xc8   : > { %v7475_v0 = vand.u32 4294901760, %v5229_v44  ;;  %v3967_v20 = vpack.c.bf16 %v665_v53, %v653_v23  ;;  %v659_v47 = vand.u32 4294901760, %v658_v31  ;;  %v2376_v24 = vsub.f32 %v5227_v43, %v7476_v26 }
  0xc9   : > { %v7479_v22 = vand.u32 4294901760, %v5233_v51  ;;  %4350 = vmatpush1.bf16.msra.mxu0 %v4349_v55  ;;  %v4351_v42 = vpack.c.bf16 %v2383_v9, %v2371_v1  ;;  %v671_v49 = vand.u32 4294901760, %v670_v7  ;;  %v7477_v15 = vand.u32 4294901760, %v5237_v56 }
  0xca   : > { %v2388_v59 = vsub.f32 %v5229_v44, %v7475_v0  ;;  %3968 = vmatprep.subr.bf16.mxu1 %v3967_v20  ;;  %v2377_v38 = vand.u32 4294901760, %v2376_v24  ;;  %v7478_v53 = vand.u32 4294901760, %v5241_v58  ;;  %v7480_v31 = vand.u32 4294901760, %v5244_v63 }
  0xcb   : > { %v676_v23 = vsub.f32 %v5233_v51, %v7479_v22  ;;  %4352 = vmatprep.subr.bf16.mxu0 %v4351_v42  ;;  %v3969_v55 = vpack.c.bf16 %v671_v49, %v659_v47  ;;  %v688_v1 = vsub.f32 %v5237_v56, %v7477_v15  ;;  %v7484_v7 = vand.u32 4294901760, %v5247_v19 }
  0xcc   : > { %v2389_v9 = vand.u32 4294901760, %v2388_v59  ;;  %v2394_v20 = vsub.f32 %v5241_v58, %v7478_v53  ;;  %v2406_v24 = vsub.f32 %v5244_v63, %v7480_v31  ;;  %v7482_v26 = vand.u32 4294901760, %v5251_v35 }
  0xcd   : > { %v677_v0 = vand.u32 4294901760, %v676_v23  ;;  %3970 = vmatpush1.bf16.msra.mxu1 %v3969_v55  ;;  %v689_v49 = vand.u32 4294901760, %v688_v1  ;;  %v682_v42 = vsub.f32 %v5247_v19, %v7484_v7  ;;  %v7483_v59 = vand.u32 4294901760, %v5255_v30 }
  0xce   : > { %v4353_v47 = vpack.c.bf16 %v2389_v9, %v2377_v38  ;;  %v2395_v23 = vand.u32 4294901760, %v2394_v20  ;;  %v2407_v15 = vand.u32 4294901760, %v2406_v24  ;;  %v694_v53 = vsub.f32 %v5251_v35, %v7482_v26 }
  0xcf   : > { %v7485_v22 = vand.u32 4294901760, %v5257_v57  ;;  %v3971_v31 = vpack.c.bf16 %v689_v49, %v677_v0  ;;  %v683_v37 = vand.u32 4294901760, %v682_v42  ;;  %v2400_v38 = vsub.f32 %v5255_v30, %v7483_v59  ;;  %v8073_v42 = vld [vmem:[#allocation54_spill] sm:$0xff] }
  0xd0   : > { %4354 = vmatpush1.bf16.msra.mxu0 %v4353_v47  ;;  %v7488_v55 = vand.u32 4294901760, %v5261_v3  ;;  %v4355_v9 = vpack.c.bf16 %v2407_v15, %v2395_v23  ;;  %v695_v1 = vand.u32 4294901760, %v694_v53  ;;  %v7491_v24 = vand.u32 4294901760, %v5263_v5  ;;  %v8072_v47 = vld [vmem:[#allocation52_spill] sm:$0xff] }
  0xd1   : > { %v2412_v20 = vsub.f32 %v5257_v57, %v7485_v22  ;;  %3972 = vmatprep.subr.bf16.mxu1 %v3971_v31  ;;  %v2401_v26 = vand.u32 4294901760, %v2400_v38  ;;  %v7494_v49 = vand.u32 4294901760, %v8072_v47  ;;  %v7498_v59 = vand.u32 4294901760, %v8073_v42  ;;  %v8074_v23 = vld [vmem:[#allocation56_spill] sm:$0xff] }
  0xd2   : > { %v700_v0 = vsub.f32 %v5261_v3, %v7488_v55  ;;  %4356 = vmatprep.subr.bf16.mxu0 %v4355_v9  ;;  %v3973_v7 = vpack.c.bf16 %v695_v1, %v683_v37  ;;  %v712_v53 = vsub.f32 %v5263_v5, %v7491_v24  ;;  %v7500_v22 = vand.u32 4294901760, %v8074_v23  ;;  %v8075_v55 = vld [vmem:[#allocation57_spill] sm:$0xff] }
  0xd3   : > { %v2413_v15 = vand.u32 4294901760, %v2412_v20  ;;  %v2418_v31 = vsub.f32 %v8072_v47, %v7494_v49  ;;  %v2430_v38 = vsub.f32 %v8073_v42, %v7498_v59  ;;  %v7502_v3 = vand.u32 4294901760, %v8075_v55  ;;  %v8076_v20 = vld [vmem:[#allocation59_spill] sm:$0xff]  ;;  %v8077_v47 = vld [vmem:[#allocation60_spill] sm:$0xff] }
  0xd4   : > { %v701_v18 = vand.u32 4294901760, %v700_v0  ;;  %3974 = vmatpush1.bf16.msra.mxu1 %v3973_v7  ;;  %v713_v9 = vand.u32 4294901760, %v712_v53  ;;  %v706_v1 = vsub.f32 %v8074_v23, %v7500_v22  ;;  %v7503_v24 = vand.u32 4294901760, %v8076_v20  ;;  %v8078_v7 = vld [vmem:[#allocation62_spill] sm:$0xff] }
  0xd5   : > { %v4357_v37 = vpack.c.bf16 %v2413_v15, %v2401_v26  ;;  %v2419_v0 = vand.u32 4294901760, %v2418_v31  ;;  %v2431_v5 = vand.u32 4294901760, %v2430_v38  ;;  %v718_v49 = vsub.f32 %v8075_v55, %v7502_v3  ;;  %v8079_v38 = vld [vmem:[#allocation63_spill] sm:$0xff] }
  0xd6   : > { %v7505_v57 = vand.u32 4294901760, %v8077_v47  ;;  %v3975_v59 = vpack.c.bf16 %v713_v9, %v701_v18  ;;  %v707_v42 = vand.u32 4294901760, %v706_v1  ;;  %v2424_v26 = vsub.f32 %v8076_v20, %v7503_v24  ;;  %v8081_v1 = vld [vmem:[#allocation66_spill] sm:$0xff] }
  0xd7   : > { %4358 = vmatpush1.bf16.msra.mxu0 %v4357_v37  ;;  %v7507_v15 = vand.u32 4294901760, %v8078_v7  ;;  %v4359_v53 = vpack.c.bf16 %v2431_v5, %v2419_v0  ;;  %v719_v22 = vand.u32 4294901760, %v718_v49  ;;  %v7509_v23 = vand.u32 4294901760, %v8079_v38  ;;  %v8080_v37 = vld [vmem:[#allocation64_spill] sm:$0xff] }
  0xd8   : > { %v2436_v31 = vsub.f32 %v8077_v47, %v7505_v57  ;;  %3976 = vmatprep.subr.bf16.mxu1 %v3975_v59  ;;  %v2425_v3 = vand.u32 4294901760, %v2424_v26  ;;  %v7511_v9 = vand.u32 4294901760, %v8080_v37  ;;  %v7514_v24 = vand.u32 4294901760, %v8081_v1  ;;  %v8082_v0 = vld [vmem:[#allocation68_spill] sm:$0xff] }
  0xd9   : > { %v724_v18 = vsub.f32 %v8078_v7, %v7507_v15  ;;  %4360 = vmatprep.subr.bf16.mxu0 %v4359_v53  ;;  %v3977_v20 = vpack.c.bf16 %v719_v22, %v707_v42  ;;  %v736_v49 = vsub.f32 %v8079_v38, %v7509_v23  ;;  %v7516_v57 = vand.u32 4294901760, %v8082_v0  ;;  %v8083_v15 = vld [vmem:[#allocation69_spill] sm:$0xff] }
  0xda   : > { %v2437_v5 = vand.u32 4294901760, %v2436_v31  ;;  %v2442_v59 = vsub.f32 %v8080_v37, %v7511_v9  ;;  %v2454_v26 = vsub.f32 %v8081_v1, %v7514_v24  ;;  %v7518_v7 = vand.u32 4294901760, %v8083_v15  ;;  %v8084_v31 = vld [vmem:[#allocation71_spill] sm:$0xff]  ;;  %v8085_v37 = vld [vmem:[#allocation72_spill] sm:$0xff] }
  0xdb   : > { %v725_v47 = vand.u32 4294901760, %v724_v18  ;;  %3978 = vmatpush1.bf16.msra.mxu1 %v3977_v20  ;;  %v737_v42 = vand.u32 4294901760, %v736_v49  ;;  %v730_v53 = vsub.f32 %v8082_v0, %v7516_v57  ;;  %v7519_v23 = vand.u32 4294901760, %v8084_v31  ;;  %v8086_v20 = vld [vmem:[#allocation74_spill] sm:$0xff] }
  0xdc   : > { %v4361_v22 = vpack.c.bf16 %v2437_v5, %v2425_v3  ;;  %v2443_v18 = vand.u32 4294901760, %v2442_v59  ;;  %v2455_v38 = vand.u32 4294901760, %v2454_v26  ;;  %v742_v9 = vsub.f32 %v8083_v15, %v7518_v7  ;;  %v8087_v26 = vld [vmem:[#allocation75_spill] sm:$0xff] }
  0xdd   : > { %v7521_v55 = vand.u32 4294901760, %v8085_v37  ;;  %v3979_v24 = vpack.c.bf16 %v737_v42, %v725_v47  ;;  %v731_v1 = vand.u32 4294901760, %v730_v53  ;;  %v2448_v3 = vsub.f32 %v8084_v31, %v7519_v23  ;;  %v8089_v53 = vld [vmem:[#allocation78_spill] sm:$0xff] }
  0xde   : > { %4362 = vmatpush1.bf16.msra.mxu0 %v4361_v22  ;;  %v7523_v5 = vand.u32 4294901760, %v8086_v20  ;;  %v4363_v49 = vpack.c.bf16 %v2455_v38, %v2443_v18  ;;  %v743_v57 = vand.u32 4294901760, %v742_v9  ;;  %v7525_v0 = vand.u32 4294901760, %v8087_v26  ;;  %v8088_v22 = vld [vmem:[#allocation76_spill] sm:$0xff] }
  0xdf   : > { %v2460_v59 = vsub.f32 %v8085_v37, %v7521_v55  ;;  %3980 = vmatprep.subr.bf16.mxu1 %v3979_v24  ;;  %v2449_v7 = vand.u32 4294901760, %v2448_v3  ;;  %v7527_v42 = vand.u32 4294901760, %v8088_v22  ;;  %v7530_v23 = vand.u32 4294901760, %v8089_v53  ;;  %v8090_v18 = vld [vmem:[#allocation80_spill] sm:$0xff] }
  0xe0   : > { %v748_v47 = vsub.f32 %v8086_v20, %v7523_v5  ;;  %4364 = vmatprep.subr.bf16.mxu0 %v4363_v49  ;;  %v3981_v31 = vpack.c.bf16 %v743_v57, %v731_v1  ;;  %v760_v9 = vsub.f32 %v8087_v26, %v7525_v0  ;;  %v7532_v55 = vand.u32 4294901760, %v8090_v18  ;;  %v8091_v5 = vld [vmem:[#allocation81_spill] sm:$0xff] }
  0xe1   : > { %v2461_v38 = vand.u32 4294901760, %v2460_v59  ;;  %v2466_v24 = vsub.f32 %v8088_v22, %v7527_v42  ;;  %v2478_v3 = vsub.f32 %v8089_v53, %v7530_v23  ;;  %v7534_v20 = vand.u32 4294901760, %v8091_v5  ;;  %v8092_v59 = vld [vmem:[#allocation83_spill] sm:$0xff]  ;;  %v8093_v22 = vld [vmem:[#allocation84_spill] sm:$0xff] }
  0xe2   : > { %v749_v37 = vand.u32 4294901760, %v748_v47  ;;  %3982 = vmatpush1.bf16.msra.mxu1 %v3981_v31  ;;  %v761_v1 = vand.u32 4294901760, %v760_v9  ;;  %v754_v49 = vsub.f32 %v8090_v18, %v7532_v55  ;;  %v7535_v0 = vand.u32 4294901760, %v8092_v59  ;;  %v8094_v31 = vld [vmem:[#allocation86_spill] sm:$0xff] }
  0xe3   : > { %v4365_v57 = vpack.c.bf16 %v2461_v38, %v2449_v7  ;;  %v2467_v47 = vand.u32 4294901760, %v2466_v24  ;;  %v2479_v26 = vand.u32 4294901760, %v2478_v3  ;;  %v766_v42 = vsub.f32 %v8091_v5, %v7534_v20  ;;  %v8095_v3 = vld [vmem:[#allocation87_spill] sm:$0xff] }
  0xe4   : > { %v7537_v15 = vand.u32 4294901760, %v8093_v22  ;;  %v3983_v23 = vpack.c.bf16 %v761_v1, %v749_v37  ;;  %v755_v53 = vand.u32 4294901760, %v754_v49  ;;  %v2472_v7 = vsub.f32 %v8092_v59, %v7535_v0  ;;  %v8097_v49 = vld [vmem:[#allocation90_spill] sm:$0xff] }
  0xe5   : > { %4366 = vmatpush1.bf16.msra.mxu0 %v4365_v57  ;;  %v7539_v38 = vand.u32 4294901760, %v8094_v31  ;;  %v4367_v9 = vpack.c.bf16 %v2479_v26, %v2467_v47  ;;  %v767_v55 = vand.u32 4294901760, %v766_v42  ;;  %v7541_v18 = vand.u32 4294901760, %v8095_v3  ;;  %v8096_v57 = vld [vmem:[#allocation88_spill] sm:$0xff] }
  0xe6   : > { %v2484_v24 = vsub.f32 %v8093_v22, %v7537_v15  ;;  %3984 = vmatprep.subr.bf16.mxu1 %v3983_v23  ;;  %v2473_v20 = vand.u32 4294901760, %v2472_v7  ;;  %v7543_v1 = vand.u32 4294901760, %v8096_v57  ;;  %v7546_v0 = vand.u32 4294901760, %v8097_v49  ;;  %v8098_v47 = vld [vmem:[#allocation92_spill] sm:$0xff] }
  0xe7   : > { %v772_v37 = vsub.f32 %v8094_v31, %v7539_v38  ;;  %4368 = vmatprep.subr.bf16.mxu0 %v4367_v9  ;;  %v3985_v59 = vpack.c.bf16 %v767_v55, %v755_v53  ;;  %v784_v42 = vsub.f32 %v8095_v3, %v7541_v18  ;;  %v7548_v15 = vand.u32 4294901760, %v8098_v47  ;;  %v8099_v38 = vld [vmem:[#allocation93_spill] sm:$0xff] }
  0xe8   : > { %v2485_v26 = vand.u32 4294901760, %v2484_v24  ;;  %v2490_v23 = vsub.f32 %v8096_v57, %v7543_v1  ;;  %v2502_v7 = vsub.f32 %v8097_v49, %v7546_v0  ;;  %v7549_v31 = vand.u32 4294901760, %v8099_v38  ;;  %v8100_v24 = vld [vmem:[#allocation95_spill] sm:$0xff]  ;;  %v8101_v57 = vld [vmem:[#allocation96_spill] sm:$0xff] }
  0xe9   : > { %v773_v22 = vand.u32 4294901760, %v772_v37  ;;  %3986 = vmatpush1.bf16.msra.mxu1 %v3985_v59  ;;  %v785_v53 = vand.u32 4294901760, %v784_v42  ;;  %v778_v9 = vsub.f32 %v8098_v47, %v7548_v15  ;;  %v7551_v18 = vand.u32 4294901760, %v8100_v24  ;;  %v8102_v59 = vld [vmem:[#allocation98_spill] sm:$0xff] }
  0xea   : > { %v4369_v55 = vpack.c.bf16 %v2485_v26, %v2473_v20  ;;  %v2491_v37 = vand.u32 4294901760, %v2490_v23  ;;  %v2503_v3 = vand.u32 4294901760, %v2502_v7  ;;  %v790_v1 = vsub.f32 %v8099_v38, %v7549_v31  ;;  %v8103_v7 = vld [vmem:[#allocation99_spill] sm:$0xff] }
  0xeb   : > { %v7552_v5 = vand.u32 4294901760, %v8101_v57  ;;  %v3987_v0 = vpack.c.bf16 %v785_v53, %v773_v22  ;;  %v779_v49 = vand.u32 4294901760, %v778_v9  ;;  %v2496_v20 = vsub.f32 %v8100_v24, %v7551_v18  ;;  %v8105_v9 = vld [vmem:[#allocation102_spill] sm:$0xff]  ;;  %v8107_v24 = vld [vmem:[#allocation105_spill] sm:$0xff] }
  0xec   : > { %4370 = vmatpush1.bf16.msra.mxu0 %v4369_v55  ;;  %v7554_v26 = vand.u32 4294901760, %v8102_v59  ;;  %v4371_v42 = vpack.c.bf16 %v2503_v3, %v2491_v37  ;;  %v791_v15 = vand.u32 4294901760, %v790_v1  ;;  %v7556_v31 = vand.u32 4294901760, %v8103_v7  ;;  %v8104_v55 = vld [vmem:[#allocation100_spill] sm:$0xff] }
  0xed   : > { %v2508_v23 = vsub.f32 %v8101_v57, %v7552_v5  ;;  %3988 = vmatprep.subr.bf16.mxu1 %v3987_v0  ;;  %v2497_v38 = vand.u32 4294901760, %v2496_v20  ;;  %v7560_v53 = vand.u32 4294901760, %v8104_v55  ;;  %v7562_v18 = vand.u32 4294901760, %v8105_v9  ;;  %v8106_v5 = vld [vmem:[#allocation104_spill] sm:$0xff] }
  0xee   : > { %v796_v22 = vsub.f32 %v8102_v59, %v7554_v26  ;;  %4372 = vmatprep.subr.bf16.mxu0 %v4371_v42  ;;  %v3989_v3 = vpack.c.bf16 %v791_v15, %v779_v49  ;;  %v808_v37 = vsub.f32 %v8103_v7, %v7556_v31  ;;  %v7564_v57 = vand.u32 4294901760, %v8106_v5  ;;  %v189_v15 = vld [vmem:[%s5139_s23 + $0x28] sm:$0xff]  ;;  %v8108_v7 = vld [vmem:[#allocation107_spill] sm:$0xff] }
  0xef   : > { %v2509_v1 = vand.u32 4294901760, %v2508_v23  ;;  %v2514_v20 = vsub.f32 %v8104_v55, %v7560_v53  ;;  %v2526_v26 = vsub.f32 %v8105_v9, %v7562_v18  ;;  %v7565_v42 = vand.u32 4294901760, %v8107_v24  ;;  %v8109_v55 = vld [vmem:[#allocation108_spill] sm:$0xff]  ;;  %v191_v9 = vld [vmem:[%s5139_s23 + $0x38] sm:$0xff] }
  0xf0   : > { %v797_v0 = vand.u32 4294901760, %v796_v22  ;;  %3990 = vmatpush1.bf16.msra.mxu1 %v3989_v3  ;;  %v809_v23 = vand.u32 4294901760, %v808_v37  ;;  %v802_v31 = vsub.f32 %v8106_v5, %v7564_v57  ;;  %v7568_v22 = vand.u32 4294901760, %v8108_v7 }
  0xf1   : > { %v4373_v49 = vpack.c.bf16 %v2509_v1, %v2497_v38  ;;  %v2515_v59 = vand.u32 4294901760, %v2514_v20  ;;  %v2527_v47 = vand.u32 4294901760, %v2526_v26  ;;  %v814_v53 = vsub.f32 %v8107_v24, %v7565_v42  ;;  %v8111_v42 = vld [vmem:[#allocation110_spill] sm:$0xff] }
  0xf2   : > { %v7570_v18 = vand.u32 4294901760, %v8109_v55  ;;  %v3991_v3 = vpack.c.bf16 %v809_v23, %v797_v0  ;;  %v803_v38 = vand.u32 4294901760, %v802_v31  ;;  %v2520_v1 = vsub.f32 %v8108_v7, %v7568_v22  ;;  %v8113_v31 = vld [vmem:[#allocation111_spill] sm:$0xff]  ;;  %v188_v22 = vld [vmem:[%s5139_s23 + $0x20] sm:$0xff] }
  0xf3   : > { %4374 = vmatpush1.bf16.msra.mxu0 %v4373_v49  ;;  %v5924_v37 = vand.u32 4294901760, %v189_v15  ;;  %v4375_v57 = vpack.c.bf16 %v2527_v47, %v2515_v59  ;;  %v815_v20 = vand.u32 4294901760, %v814_v53  ;;  %v7572_v24 = vand.u32 4294901760, %v8111_v42  ;;  %v8115_v53 = vld [vmem:[#allocation112_spill] sm:$0xff] }
  0xf4   : > { %v2532_v26 = vsub.f32 %v8109_v55, %v7570_v18  ;;  %3992 = vmatprep.subr.bf16.mxu1 %v3991_v3  ;;  %v2521_v5 = vand.u32 4294901760, %v2520_v1  ;;  %v7576_v0 = vand.u32 4294901760, %v8113_v31  ;;  %v5934_v23 = vand.u32 4294901760, %v191_v9  ;;  %v8117_v55 = vld [vmem:[#allocation114_spill] sm:$0xff] }
  0xf5   : > { %8110 = vst [vmem:[#allocation201_spill] sm:$0xff] %v5924_v37  ;;  %v5931_v49 = vsub.f32 %v189_v15, %v5924_v37  ;;  %4376 = vmatprep.subr.bf16.mxu0 %v4375_v57  ;;  %v3993_v7 = vpack.c.bf16 %v815_v20, %v803_v38  ;;  %v820_v59 = vsub.f32 %v8111_v42, %v7572_v24  ;;  %v7577_v18 = vand.u32 4294901760, %v8115_v53 }
  0xf6   : > { %8114 = vst [vmem:[#allocation203_spill] sm:$0xff] %v5934_v23  ;;  %v2533_v47 = vand.u32 4294901760, %v2532_v26  ;;  %v832_v15 = vsub.f32 %v8113_v31, %v7576_v0  ;;  %v5946_v1 = vsub.f32 %v191_v9, %v5934_v23  ;;  %v7587_v57 = vand.u32 4294901760, %v8117_v55 }
  0xf7   : > { %8112 = vst [vmem:[#allocation202_spill] sm:$0xff] %v5931_v49  ;;  %v7582_v3 = vand.u32 4294901760, %v5931_v49  ;;  %3994 = vmatpush1.bf16.msra.mxu1 %v3993_v7  ;;  %v821_v20 = vand.u32 4294901760, %v820_v59  ;;  %v2538_v26 = vsub.f32 %v8115_v53, %v7577_v18  ;;  %v5952_v24 = vand.u32 4294901760, %v188_v22  ;;  %v8120_v59 = vld [vmem:[#allocation116_spill] sm:$0xff]  ;;  %v8121_v53 = vld [vmem:[#allocation117_spill] sm:$0xff] }
  0xf8   : > { %8116 = vst [vmem:[#allocation204_spill] sm:$0xff] %v5946_v1  ;;  %v4377_v38 = vpack.c.bf16 %v2533_v47, %v2521_v5  ;;  %v833_v30 = vand.u32 4294901760, %v832_v15  ;;  %v7588_v0 = vand.u32 4294901760, %v5946_v1  ;;  %v2550_v7 = vsub.f32 %v8117_v55, %v7587_v57  ;;  %v190_v5 = vld [vmem:[%s5139_s23 + $0x30] sm:$0xff]  ;;  %v193_v57 = vld [vmem:[%s5139_s23 + $0x48] sm:$0xff] }
  0xf9   : > { %8118 = vst [vmem:[#allocation205_spill] sm:$0xff] %v5952_v24  ;;  %v491_v42 = vsub.f32 %v5931_v49, %v7582_v3  ;;  %v2539_v9 = vand.u32 4294901760, %v2538_v26  ;;  %v5963_v47 = vsub.f32 %v188_v22, %v5952_v24  ;;  %v7591_v18 = vand.u32 4294901760, %v8120_v59 }
  0xfa   : > { %4378 = vmatpush1.bf16.msra.mxu0 %v4377_v38  ;;  %v7594_v31 = vand.u32 4294901760, %v8121_v53  ;;  %v3995_v3 = vpack.c.bf16 %v833_v30, %v821_v20  ;;  %v2209_v15 = vsub.f32 %v5946_v1, %v7588_v0  ;;  %v2551_v49 = vand.u32 4294901760, %v2550_v7  ;;  %v8123_v20 = vld [vmem:[#allocation119_spill] sm:$0xff]  ;;  %v8124_v0 = vld [vmem:[#allocation120_spill] sm:$0xff] }
  0xfb   : > { %8119 = vst [vmem:[#allocation206_spill] sm:$0xff] %v5963_v47  ;;  %v492_v35 = vand.u32 4294901760, %v491_v42  ;;  %v826_v38 = vsub.f32 %v8120_v59, %v7591_v18  ;;  %v5977_v26 = vand.u32 4294901760, %v190_v5  ;;  %v7598_v7 = vand.u32 4294901760, %v8123_v20 }
  0xfc   : > { %v838_v22 = vsub.f32 %v8121_v53, %v7594_v31  ;;  %3996 = vmatprep.subr.bf16.mxu1 %v3995_v3  ;;  %v2210_v30 = vand.u32 4294901760, %v2209_v15  ;;  %v4379_v42 = vpack.c.bf16 %v2551_v49, %v2539_v9  ;;  %v7599_v19 = vand.u32 4294901760, %v8124_v0  ;;  %v8128_v9 = vld [vmem:[#allocation122_spill] sm:$0xff]  ;;  %v195_v15 = vld [vmem:[%s5139_s23 + $0x58] sm:$0xff] }
  0xfd   : > { %8122 = vst [vmem:[#allocation207_spill] sm:$0xff] %v5977_v26  ;;  %493 = vmatprep.mubr.f32.mxu1 %v492_v35  ;;  %v8125_v1 = vand.u32 4294901760, %v5963_v47  ;;  %v827_v59 = vand.u32 4294901760, %v826_v38  ;;  %v5986_v31 = vsub.f32 %v190_v5, %v5977_v26  ;;  %v2544_v35 = vsub.f32 %v8123_v20, %v7598_v7 }
  0xfe   : > { %v839_v55 = vand.u32 4294901760, %v838_v22  ;;  %2211 = vmatprep.mubr.f32.mxu0 %v2210_v30  ;;  %4380 = vmatprep.subr.bf16.mxu0 %v4379_v42  ;;  %v2556_v49 = vsub.f32 %v8124_v0, %v7599_v19  ;;  %v5994_v3 = vand.u32 4294901760, %v193_v57  ;;  %v8129_v30 = vld [vmem:[#allocation123_spill] sm:$0xff] }
  0xff   : > { %v497_v18 = vsub.f32 %v5963_v47, %v8125_v1  ;;  %8126 = vst [vmem:[#allocation208_spill] sm:$0xff] %v5986_v31  ;;  %v7602_v1 = vand.u32 4294901760, %v8128_v9  ;;  %v7608_v5 = vand.u32 4294901760, %v5986_v31  ;;  %v7609_v42 = vand.u32 4294901760, %v8129_v30 }
 0x100   : > { %8127 = vst [vmem:[#allocation209_spill] sm:$0xff] %v5994_v3  ;;  %v3997_v22 = vpack.c.bf16 %v839_v55, %v827_v59  ;;  %v2545_v47 = vand.u32 4294901760, %v2544_v35  ;;  %v2557_v53 = vand.u32 4294901760, %v2556_v49  ;;  %v6001_v7 = vsub.f32 %v193_v57, %v5994_v3  ;;  %v8132_v59 = vld [vmem:[#allocation124_spill] sm:$0xff] }
 0x101   : > { %v498_v38 = vand.u32 4294901760, %v497_v18  ;;  %v844_v19 = vsub.f32 %v8128_v9, %v7602_v1  ;;  %v2215_v0 = vsub.f32 %v5986_v31, %v7608_v5  ;;  %v856_v18 = vsub.f32 %v8129_v30, %v7609_v42  ;;  %v192_v57 = vld [vmem:[%s5139_s23 + $0x40] sm:$0xff] }
 0x102   : > { %8130 = vst [vmem:[#allocation210_spill] sm:$0xff] %v6001_v7  ;;  %v6012_v55 = vand.u32 4294901760, %v195_v15  ;;  %v7612_v35 = vand.u32 4294901760, %v8132_v59  ;;  %3998 = vmatpush1.bf16.msra.mxu1 %v3997_v22  ;;  %v4381_v49 = vpack.c.bf16 %v2557_v53, %v2545_v47  ;;  %v7617_v20 = vand.u32 4294901760, %v6001_v7 }
 0x103   : > { %499 = vmatmul.mubr.f32.gmra.mrb[2].mxu1 %v498_v38  ;;  %v845_v1 = vand.u32 4294901760, %v844_v19  ;;  %v8133_v38 = vld [vmem:[#allocation126_spill] sm:$0xff]  ;;  %v2216_v3 = vand.u32 4294901760, %v2215_v0  ;;  %v857_v26 = vand.u32 4294901760, %v856_v18  ;;  %v6030_v53 = vand.u32 4294901760, %v192_v57  ;;  %v8136_v0 = vld [vmem:[#allocation128_spill] sm:$0xff] }
 0x104   : > { %8131 = vst [vmem:[#allocation211_spill] sm:$0xff] %v6012_v55  ;;  %v7618_v9 = vand.u32 4294901760, %v8133_v38  ;;  %v6019_v5 = vsub.f32 %v195_v15, %v6012_v55  ;;  %v2562_v42 = vsub.f32 %v8132_v59, %v7612_v35  ;;  %4382 = vmatpush1.bf16.msra.mxu0 %v4381_v49  ;;  %v507_v22 = vsub.f32 %v6001_v7, %v7617_v20  ;;  %v194_v15 = vld [vmem:[%s5139_s23 + $0x50] sm:$0xff]  ;;  %v8137_v49 = vld [vmem:[#allocation129_spill] sm:$0xff] }
 0x105   : > { %8135 = vst [vmem:[#allocation213_spill] sm:$0xff] %v6030_v53  ;;  %v7621_v47 = vand.u32 4294901760, %v8136_v0  ;;  %2217 = vmatmul.mubr.f32.gmra.mrb[2].mxu0 %v2216_v3  ;;  %v3999_v18 = vpack.c.bf16 %v857_v26, %v845_v1  ;;  %v7627_v59 = vand.u32 4294901760, %v8137_v49  ;;  %v6037_v20 = vsub.f32 %v192_v57, %v6030_v53  ;;  %v197_v57 = vld [vmem:[%s5139_s23 + $0x68] sm:$0xff] }
 0x106   : > { %8134 = vst [vmem:[#allocation212_spill] sm:$0xff] %v6019_v5  ;;  %v2574_v19 = vsub.f32 %v8133_v38, %v7618_v9  ;;  %v7626_v31 = vand.u32 4294901760, %v6019_v5  ;;  %v2563_v35 = vand.u32 4294901760, %v2562_v42  ;;  %v508_v30 = vand.u32 4294901760, %v507_v22  ;;  %v8140_v42 = vld [vmem:[#allocation131_spill] sm:$0xff] }
 0x107   : > { %8138 = vst [vmem:[#allocation214_spill] sm:$0xff] %v6037_v20  ;;  %v850_v9 = vsub.f32 %v8136_v0, %v7621_v47  ;;  %4000 = vmatprep.subr.bf16.mxu1 %v3999_v18  ;;  %v862_v26 = vsub.f32 %v8137_v49, %v7627_v59  ;;  %v6048_v1 = vand.u32 4294901760, %v194_v15  ;;  %v7630_v22 = vand.u32 4294901760, %v8140_v42  ;;  %v8141_v18 = vld [vmem:[#allocation132_spill] sm:$0xff] }
 0x108   : > { %v2575_v55 = vand.u32 4294901760, %v2574_v19  ;;  %v2225_v3 = vsub.f32 %v6019_v5, %v7626_v31  ;;  %509 = vmatprep.mubr.f32.mxu1 %v508_v30  ;;  %v7635_v7 = vand.u32 4294901760, %v6037_v20  ;;  %v7636_v0 = vand.u32 4294901760, %v8141_v18 }
 0x109   : > { %8139 = vst [vmem:[#allocation215_spill] sm:$0xff] %v6048_v1  ;;  %v851_v47 = vand.u32 4294901760, %v850_v9  ;;  %v863_v53 = vand.u32 4294901760, %v862_v26  ;;  %v6055_v31 = vsub.f32 %v194_v15, %v6048_v1  ;;  %v2568_v59 = vsub.f32 %v8140_v42, %v7630_v22  ;;  %v199_v15 = vld [vmem:[%s5139_s23 + $0x78] sm:$0xff] }
 0x10a   : > { %v4383_v19 = vpack.c.bf16 %v2575_v55, %v2563_v35  ;;  %v2226_v38 = vand.u32 4294901760, %v2225_v3  ;;  %v513_v30 = vsub.f32 %v6037_v20, %v7635_v7  ;;  %v2580_v9 = vsub.f32 %v8141_v18, %v7636_v0  ;;  %v8144_v35 = vld [vmem:[#allocation134_spill] sm:$0xff] }
 0x10b   : > { %8142 = vst [vmem:[#allocation216_spill] sm:$0xff] %v6055_v31  ;;  %v6066_v55 = vand.u32 4294901760, %v197_v57  ;;  %v7639_v3 = vand.u32 4294901760, %v8144_v35  ;;  %v4001_v26 = vpack.c.bf16 %v863_v53, %v851_v47  ;;  %v7644_v5 = vand.u32 4294901760, %v6055_v31  ;;  %v8148_v47 = vld [vmem:[#allocation136_spill] sm:$0xff] }
 0x10c   : > { %4384 = vmatprep.subr.bf16.mxu0 %v4383_v19  ;;  %2227 = vmatprep.mubr.f32.mxu0 %v2226_v38  ;;  %v2569_v22 = vand.u32 4294901760, %v2568_v59  ;;  %v8145_v19 = vld [vmem:[#allocation135_spill] sm:$0xff]  ;;  %v514_v49 = vand.u32 4294901760, %v513_v30  ;;  %v2581_v1 = vand.u32 4294901760, %v2580_v9  ;;  %v6084_v53 = vand.u32 4294901760, %v199_v15 }
 0x10d   : > { %8143 = vst [vmem:[#allocation217_spill] sm:$0xff] %v6066_v55  ;;  %v7645_v42 = vand.u32 4294901760, %v8145_v19  ;;  %v6073_v7 = vsub.f32 %v197_v57, %v6066_v55  ;;  %v868_v0 = vsub.f32 %v8144_v35, %v7639_v3  ;;  %4002 = vmatpush1.bf16.msra.mxu1 %v4001_v26  ;;  %v2231_v38 = vsub.f32 %v6055_v31, %v7644_v5  ;;  %v196_v57 = vld [vmem:[%s5139_s23 + $0x60] sm:$0xff]  ;;  %v8149_v26 = vld [vmem:[#allocation138_spill] sm:$0xff] }
 0x10e   : > { %8147 = vst [vmem:[#allocation219_spill] sm:$0xff] %v6084_v53  ;;  %v7648_v30 = vand.u32 4294901760, %v8148_v47  ;;  %515 = vmatmul.mubr.f32.gmra.mrb[4].mxu1 %v514_v49  ;;  %v4385_v9 = vpack.c.bf16 %v2581_v1, %v2569_v22  ;;  %v7654_v18 = vand.u32 4294901760, %v8149_v26  ;;  %v6091_v5 = vsub.f32 %v199_v15, %v6084_v53  ;;  %v8152_v22 = vld [vmem:[#allocation140_spill] sm:$0xff]  ;;  %v198_v15 = vld [vmem:[%s5139_s23 + $0x70] sm:$0xff] }
 0x10f   : > { %8146 = vst [vmem:[#allocation218_spill] sm:$0xff] %v6073_v7  ;;  %v880_v59 = vsub.f32 %v8145_v19, %v7645_v42  ;;  %v7653_v20 = vand.u32 4294901760, %v6073_v7  ;;  %v869_v3 = vand.u32 4294901760, %v868_v0  ;;  %v2232_v35 = vand.u32 4294901760, %v2231_v38 }
 0x110   : > { %8150 = vst [vmem:[#allocation220_spill] sm:$0xff] %v6091_v5  ;;  %v2586_v42 = vsub.f32 %v8148_v47, %v7648_v30  ;;  %4386 = vmatpush1.bf16.msra.mxu0 %v4385_v9  ;;  %v2598_v0 = vsub.f32 %v8149_v26, %v7654_v18  ;;  %v6102_v1 = vand.u32 4294901760, %v196_v57  ;;  %v7657_v38 = vand.u32 4294901760, %v8152_v22  ;;  %v8153_v9 = vld [vmem:[#allocation141_spill] sm:$0xff] }
 0x111   : > { %v881_v55 = vand.u32 4294901760, %v880_v59  ;;  %v523_v49 = vsub.f32 %v6073_v7, %v7653_v20  ;;  %2233 = vmatmul.mubr.f32.gmra.mrb[4].mxu0 %v2232_v35  ;;  %v7662_v31 = vand.u32 4294901760, %v6091_v5  ;;  %v7663_v47 = vand.u32 4294901760, %v8153_v9 }
 0x112   : > { %8151 = vst [vmem:[#allocation221_spill] sm:$0xff] %v6102_v1  ;;  %v2587_v30 = vand.u32 4294901760, %v2586_v42  ;;  %v2599_v53 = vand.u32 4294901760, %v2598_v0  ;;  %v6109_v20 = vsub.f32 %v196_v57, %v6102_v1  ;;  %v874_v18 = vsub.f32 %v8152_v22, %v7657_v38  ;;  %v201_v57 = vld [vmem:[%s5139_s23 + $0x88] sm:$0xff] }
 0x113   : > { %v4003_v59 = vpack.c.bf16 %v881_v55, %v869_v3  ;;  %v524_v19 = vand.u32 4294901760, %v523_v49  ;;  %v2241_v35 = vsub.f32 %v6091_v5, %v7662_v31  ;;  %v886_v42 = vsub.f32 %v8153_v9, %v7663_v47  ;;  %v8156_v3 = vld [vmem:[#allocation143_spill] sm:$0xff] }
 0x114   : > { %8154 = vst [vmem:[#allocation222_spill] sm:$0xff] %v6109_v20  ;;  %v6120_v55 = vand.u32 4294901760, %v198_v15  ;;  %v7666_v49 = vand.u32 4294901760, %v8156_v3  ;;  %v4387_v0 = vpack.c.bf16 %v2599_v53, %v2587_v30  ;;  %v7671_v7 = vand.u32 4294901760, %v6109_v20  ;;  %v8160_v30 = vld [vmem:[#allocation146_spill] sm:$0xff] }
 0x115   : > { %4004 = vmatprep.subr.bf16.mxu1 %v4003_v59  ;;  %525 = vmatprep.mubr.f32.mxu1 %v524_v19  ;;  %v875_v38 = vand.u32 4294901760, %v874_v18  ;;  %v8157_v59 = vld [vmem:[#allocation144_spill] sm:$0xff]  ;;  %v2242_v26 = vand.u32 4294901760, %v2241_v35  ;;  %v887_v1 = vand.u32 4294901760, %v886_v42  ;;  %v6138_v53 = vand.u32 4294901760, %v201_v57 }
 0x116   : > { %8155 = vst [vmem:[#allocation223_spill] sm:$0xff] %v6120_v55  ;;  %v7672_v22 = vand.u32 4294901760, %v8157_v59  ;;  %v6127_v31 = vsub.f32 %v198_v15, %v6120_v55  ;;  %v2592_v47 = vsub.f32 %v8156_v3, %v7666_v49  ;;  %4388 = vmatprep.subr.bf16.mxu0 %v4387_v0  ;;  %v529_v19 = vsub.f32 %v6109_v20, %v7671_v7  ;;  %v203_v15 = vld [vmem:[%s5139_s23 + $0x98] sm:$0xff] }
 0x117   : > { %8159 = vst [vmem:[#allocation225_spill] sm:$0xff] %v6138_v53  ;;  %v7675_v35 = vand.u32 4294901760, %v8160_v30  ;;  %2243 = vmatprep.mubr.f32.mxu0 %v2242_v26  ;;  %v4005_v42 = vpack.c.bf16 %v887_v1, %v875_v38  ;;  %v8161_v0 = vld [vmem:[#allocation147_spill] sm:$0xff]  ;;  %v6145_v7 = vsub.f32 %v201_v57, %v6138_v53  ;;  %v6156_v1 = vand.u32 4294901760, %v203_v15  ;;  %v8164_v38 = vld [vmem:[#allocation148_spill] sm:$0xff] }
 0x118   : > { %8158 = vst [vmem:[#allocation224_spill] sm:$0xff] %v6127_v31  ;;  %v2604_v18 = vsub.f32 %v8157_v59, %v7672_v22  ;;  %v7680_v5 = vand.u32 4294901760, %v6127_v31  ;;  %v2593_v49 = vand.u32 4294901760, %v2592_v47  ;;  %v7681_v3 = vand.u32 4294901760, %v8161_v0  ;;  %v200_v57 = vld [vmem:[%s5139_s23 + $0x80] sm:$0xff] }
 0x119   : > { %v530_v9 = vand.u32 4294901760, %v529_v19  ;;  %8162 = vst [vmem:[#allocation226_spill] sm:$0xff] %v6145_v7  ;;  %v892_v22 = vsub.f32 %v8160_v30, %v7675_v35  ;;  %4006 = vmatpush1.bf16.msra.mxu1 %v4005_v42  ;;  %8163 = vst [vmem:[#allocation227_spill] sm:$0xff] %v6156_v1  ;;  %v7684_v19 = vand.u32 4294901760, %v8164_v38  ;;  %v7689_v20 = vand.u32 4294901760, %v6145_v7  ;;  %v8165_v42 = vld [vmem:[#allocation150_spill] sm:$0xff] }
 0x11a   : > { %v2605_v55 = vand.u32 4294901760, %v2604_v18  ;;  %v2247_v26 = vsub.f32 %v6127_v31, %v7680_v5  ;;  %v904_v47 = vsub.f32 %v8161_v0, %v7681_v3  ;;  %v7690_v59 = vand.u32 4294901760, %v8165_v42 }
 0x11b   : > { %531 = vmatmul.mubr.f32.gmra.mrb[6].mxu1 %v530_v9  ;;  %v893_v35 = vand.u32 4294901760, %v892_v22  ;;  %v6163_v5 = vsub.f32 %v203_v15, %v6156_v1  ;;  %v2610_v3 = vsub.f32 %v8164_v38, %v7684_v19  ;;  %v539_v9 = vsub.f32 %v6145_v7, %v7689_v20  ;;  %v202_v15 = vld [vmem:[%s5139_s23 + $0x90] sm:$0xff] }
 0x11c   : > { %v4389_v18 = vpack.c.bf16 %v2605_v55, %v2593_v49  ;;  %v2248_v53 = vand.u32 4294901760, %v2247_v26  ;;  %v905_v30 = vand.u32 4294901760, %v904_v47  ;;  %v2622_v22 = vsub.f32 %v8165_v42, %v7690_v59  ;;  %v8168_v49 = vld [vmem:[#allocation152_spill] sm:$0xff] }
 0x11d   : > { %8166 = vst [vmem:[#allocation228_spill] sm:$0xff] %v6163_v5  ;;  %v6174_v55 = vand.u32 4294901760, %v200_v57  ;;  %v7693_v26 = vand.u32 4294901760, %v8168_v49  ;;  %v7698_v31 = vand.u32 4294901760, %v6163_v5  ;;  %v2611_v19 = vand.u32 4294901760, %v2610_v3 }
 0x11e   : > { %4390 = vmatpush1.bf16.msra.mxu0 %v4389_v18  ;;  %v4007_v47 = vpack.c.bf16 %v905_v30, %v893_v35  ;;  %v8169_v18 = vld [vmem:[#allocation153_spill] sm:$0xff]  ;;  %v540_v38 = vand.u32 4294901760, %v539_v9  ;;  %v2623_v0 = vand.u32 4294901760, %v2622_v22  ;;  %v6192_v30 = vand.u32 4294901760, %v202_v15  ;;  %v8172_v35 = vld [vmem:[#allocation155_spill] sm:$0xff] }
 0x11f   : > { %8167 = vst [vmem:[#allocation229_spill] sm:$0xff] %v6174_v55  ;;  %2249 = vmatmul.mubr.f32.gmra.mrb[6].mxu0 %v2248_v53  ;;  %v7699_v1 = vand.u32 4294901760, %v8169_v18  ;;  %v6181_v20 = vsub.f32 %v200_v57, %v6174_v55  ;;  %v898_v59 = vsub.f32 %v8168_v49, %v7693_v26  ;;  %v2257_v53 = vsub.f32 %v6163_v5, %v7698_v31  ;;  %v205_v57 = vld [vmem:[%s5139_s23 + $0xa8] sm:$0xff] }
 0x120   : > { %4008 = vmatprep.subr.bf16.mxu1 %v4007_v47  ;;  %8171 = vst [vmem:[#allocation231_spill] sm:$0xff] %v6192_v30  ;;  %v7702_v9 = vand.u32 4294901760, %v8172_v35  ;;  %541 = vmatprep.mubr.f32.mxu1 %v540_v38  ;;  %v4391_v22 = vpack.c.bf16 %v2623_v0, %v2611_v19  ;;  %v8173_v47 = vld [vmem:[#allocation156_spill] sm:$0xff]  ;;  %v6199_v31 = vsub.f32 %v202_v15, %v6192_v30  ;;  %v6210_v0 = vand.u32 4294901760, %v205_v57  ;;  %v8176_v19 = vld [vmem:[#allocation158_spill] sm:$0xff]  ;;  %v207_v15 = vld [vmem:[%s5139_s23 + $0xb8] sm:$0xff] }
 0x121   : > { %8170 = vst [vmem:[#allocation230_spill] sm:$0xff] %v6181_v20  ;;  %v910_v3 = vsub.f32 %v8169_v18, %v7699_v1  ;;  %v7707_v7 = vand.u32 4294901760, %v6181_v20  ;;  %v899_v26 = vand.u32 4294901760, %v898_v59  ;;  %v7708_v55 = vand.u32 4294901760, %v8173_v47 }
 0x122   : > { %v2258_v49 = vand.u32 4294901760, %v2257_v53  ;;  %8174 = vst [vmem:[#allocation232_spill] sm:$0xff] %v6199_v31  ;;  %v2616_v1 = vsub.f32 %v8172_v35, %v7702_v9  ;;  %4392 = vmatprep.subr.bf16.mxu0 %v4391_v22  ;;  %8175 = vst [vmem:[#allocation233_spill] sm:$0xff] %v6210_v0  ;;  %v7711_v53 = vand.u32 4294901760, %v8176_v19  ;;  %v7715_v5 = vand.u32 4294901760, %v6199_v31  ;;  %v8177_v22 = vld [vmem:[#allocation159_spill] sm:$0xff] }
 0x123   : > { %v911_v42 = vand.u32 4294901760, %v910_v3  ;;  %v545_v38 = vsub.f32 %v6181_v20, %v7707_v7  ;;  %v2628_v59 = vsub.f32 %v8173_v47, %v7708_v55  ;;  %v7716_v30 = vand.u32 4294901760, %v8177_v22 }
 0x124   : > { %2259 = vmatprep.mubr.f32.mxu0 %v2258_v49  ;;  %v2617_v9 = vand.u32 4294901760, %v2616_v1  ;;  %v6217_v7 = vsub.f32 %v205_v57, %v6210_v0  ;;  %v916_v55 = vsub.f32 %v8176_v19, %v7711_v53  ;;  %v2263_v49 = vsub.f32 %v6199_v31, %v7715_v5  ;;  %v204_v57 = vld [vmem:[%s5139_s23 + $0xa0] sm:$0xff] }
 0x125   : > { %v4009_v3 = vpack.c.bf16 %v911_v42, %v899_v26  ;;  %v546_v35 = vand.u32 4294901760, %v545_v38  ;;  %v2629_v18 = vand.u32 4294901760, %v2628_v59  ;;  %v928_v1 = vsub.f32 %v8177_v22, %v7716_v30  ;;  %v8180_v26 = vld [vmem:[#allocation160_spill] sm:$0xff] }
 0x126   : > { %8178 = vst [vmem:[#allocation234_spill] sm:$0xff] %v6217_v7  ;;  %v6228_v42 = vand.u32 4294901760, %v207_v15  ;;  %v7719_v38 = vand.u32 4294901760, %v8180_v26  ;;  %v7724_v20 = vand.u32 4294901760, %v6217_v7  ;;  %v917_v53 = vand.u32 4294901760, %v916_v55 }
 0x127   : > { %4010 = vmatpush1.bf16.msra.mxu1 %v4009_v3  ;;  %v4393_v59 = vpack.c.bf16 %v2629_v18, %v2617_v9  ;;  %v7725_v3 = vand.u32 4294901760, %v5524_v54  ;;  %v2264_v0 = vand.u32 4294901760, %v2263_v49  ;;  %v929_v19 = vand.u32 4294901760, %v928_v1  ;;  %v8183_v9 = vld [vmem:[#allocation164_spill] sm:$0xff] }
 0x128   : > { %8179 = vst [vmem:[#allocation235_spill] sm:$0xff] %v6228_v42  ;;  %547 = vmatmul.mubr.f32.gmra.mrb[8].mxu1 %v546_v35  ;;  %v6235_v5 = vsub.f32 %v207_v15, %v6228_v42  ;;  %v2634_v30 = vsub.f32 %v8180_v26, %v7719_v38  ;;  %v555_v35 = vsub.f32 %v6217_v7, %v7724_v20  ;;  %v6246_v18 = vand.u32 4294901760, %v204_v57  ;;  %v206_v15 = vld [vmem:[%s5139_s23 + $0xb0] sm:$0xff] }
 0x129   : > { %4394 = vmatpush1.bf16.msra.mxu0 %v4393_v59  ;;  %v2646_v55 = vsub.f32 %v5524_v54, %v7725_v3  ;;  %v7728_v49 = vand.u32 4294901760, %v8183_v9  ;;  %v4011_v1 = vpack.c.bf16 %v929_v19, %v917_v53  ;;  %v8184_v59 = vld [vmem:[#allocation165_spill] sm:$0xff]  ;;  %v6264_v19 = vand.u32 4294901760, %v206_v15  ;;  %v8187_v53 = vld [vmem:[#allocation167_spill] sm:$0xff] }
 0x12a   : > { %8181 = vst [vmem:[#allocation236_spill] sm:$0xff] %v6235_v5  ;;  %8182 = vst [vmem:[#allocation237_spill] sm:$0xff] %v6246_v18  ;;  %2265 = vmatmul.mubr.f32.gmra.mrb[8].mxu0 %v2264_v0  ;;  %v7734_v31 = vand.u32 4294901760, %v6235_v5  ;;  %v2635_v38 = vand.u32 4294901760, %v2634_v30  ;;  %v7735_v42 = vand.u32 4294901760, %v8184_v59  ;;  %v556_v26 = vand.u32 4294901760, %v555_v35 }
 0x12b   : > { %v2647_v22 = vand.u32 4294901760, %v2646_v55  ;;  %v6253_v20 = vsub.f32 %v204_v57, %v6246_v18  ;;  %v922_v3 = vsub.f32 %v8183_v9, %v7728_v49  ;;  %4012 = vmatprep.subr.bf16.mxu1 %v4011_v1  ;;  %8186 = vst [vmem:[#allocation239_spill] sm:$0xff] %v6264_v19  ;;  %v7738_v35 = vand.u32 4294901760, %v8187_v53  ;;  %v209_v57 = vld [vmem:[%s5139_s23 + $0xc8] sm:$0xff]  ;;  %v8188_v1 = vld [vmem:[#allocation168_spill] sm:$0xff] }
 0x12c   : > { %v2273_v0 = vsub.f32 %v6235_v5, %v7734_v31  ;;  %v934_v30 = vsub.f32 %v8184_v59, %v7735_v42  ;;  %557 = vmatprep.mubr.f32.mxu1 %v556_v26  ;;  %v7744_v18 = vand.u32 4294901760, %v8188_v1  ;;  %v6271_v31 = vsub.f32 %v206_v15, %v6264_v19  ;;  %v211_v15 = vld [vmem:[%s5139_s23 + $0xd8] sm:$0xff] }
 0x12d   : > { %8185 = vst [vmem:[#allocation238_spill] sm:$0xff] %v6253_v20  ;;  %v4395_v55 = vpack.c.bf16 %v2647_v22, %v2635_v38  ;;  %v7743_v7 = vand.u32 4294901760, %v6253_v20  ;;  %v923_v49 = vand.u32 4294901760, %v922_v3  ;;  %v2640_v42 = vsub.f32 %v8187_v53, %v7738_v35  ;;  %v8191_v3 = vld [vmem:[#allocation170_spill] sm:$0xff] }
 0x12e   : > { %v2274_v9 = vand.u32 4294901760, %v2273_v0  ;;  %v935_v54 = vand.u32 4294901760, %v934_v30  ;;  %8189 = vst [vmem:[#allocation240_spill] sm:$0xff] %v6271_v31  ;;  %v2652_v22 = vsub.f32 %v8188_v1, %v7744_v18  ;;  %v6282_v38 = vand.u32 4294901760, %v209_v57 }
 0x12f   : > { %4396 = vmatprep.subr.bf16.mxu0 %v4395_v55  ;;  %v561_v26 = vsub.f32 %v6253_v20, %v7743_v7  ;;  %v7747_v0 = vand.u32 4294901760, %v8191_v3  ;;  %v7751_v5 = vand.u32 4294901760, %v6271_v31  ;;  %v2641_v35 = vand.u32 4294901760, %v2640_v42  ;;  %v8192_v55 = vld [vmem:[#allocation171_spill] sm:$0xff] }
 0x130   : > { %8190 = vst [vmem:[#allocation241_spill] sm:$0xff] %v6282_v38  ;;  %2275 = vmatprep.mubr.f32.mxu0 %v2274_v9  ;;  %v4013_v30 = vpack.c.bf16 %v935_v54, %v923_v49  ;;  %v7752_v19 = vand.u32 4294901760, %v8192_v55  ;;  %v2653_v59 = vand.u32 4294901760, %v2652_v22  ;;  %v6289_v7 = vsub.f32 %v209_v57, %v6282_v38  ;;  %v8195_v49 = vld [vmem:[#allocation172_spill] sm:$0xff] }
 0x131   : > { %v562_v53 = vand.u32 4294901760, %v561_v26  ;;  %v940_v18 = vsub.f32 %v8191_v3, %v7747_v0  ;;  %v2279_v9 = vsub.f32 %v6271_v31, %v7751_v5  ;;  %v6300_v42 = vand.u32 4294901760, %v211_v15  ;;  %v208_v57 = vld [vmem:[%s5139_s23 + $0xc0] sm:$0xff] }
 0x132   : > { %8193 = vst [vmem:[#allocation242_spill] sm:$0xff] %v6289_v7  ;;  %4014 = vmatpush1.bf16.msra.mxu1 %v4013_v30  ;;  %v952_v54 = vsub.f32 %v8192_v55, %v7752_v19  ;;  %v7753_v26 = vand.u32 4294901760, %v8195_v49  ;;  %v4397_v22 = vpack.c.bf16 %v2653_v59, %v2641_v35  ;;  %v7758_v20 = vand.u32 4294901760, %v6289_v7 }
 0x133   : > { %8194 = vst [vmem:[#allocation243_spill] sm:$0xff] %v6300_v42  ;;  %563 = vmatmul.mubr.f32.gmra.mrb[10].mxu1 %v562_v53  ;;  %v941_v0 = vand.u32 4294901760, %v940_v18  ;;  %v7759_v30 = vand.u32 4294901760, %v5552_v60  ;;  %v2280_v38 = vand.u32 4294901760, %v2279_v9  ;;  %v6307_v5 = vsub.f32 %v211_v15, %v6300_v42  ;;  %v210_v15 = vld [vmem:[%s5139_s23 + $0xd0] sm:$0xff] }
 0x134   : > { %v953_v3 = vand.u32 4294901760, %v952_v54  ;;  %v2658_v19 = vsub.f32 %v8195_v49, %v7753_v26  ;;  %4398 = vmatpush1.bf16.msra.mxu0 %v4397_v22  ;;  %v571_v53 = vsub.f32 %v6289_v7, %v7758_v20  ;;  %v6318_v59 = vand.u32 4294901760, %v208_v57 }
 0x135   : > { %8196 = vst [vmem:[#allocation244_spill] sm:$0xff] %v6307_v5  ;;  %v2670_v18 = vsub.f32 %v5552_v60, %v7759_v30  ;;  %v7760_v35 = vand.u32 4294901760, %v5556_v21  ;;  %2281 = vmatmul.mubr.f32.gmra.mrb[10].mxu0 %v2280_v38  ;;  %v7765_v54 = vand.u32 4294901760, %v6307_v5  ;;  %v7766_v22 = vand.u32 4294901760, %v5558_v14 }
 0x136   : > { %8197 = vst [vmem:[#allocation245_spill] sm:$0xff] %v6318_v59  ;;  %v4015_v9 = vpack.c.bf16 %v953_v3, %v941_v0  ;;  %v2659_v26 = vand.u32 4294901760, %v2658_v19  ;;  %v572_v31 = vand.u32 4294901760, %v571_v53  ;;  %v6325_v20 = vsub.f32 %v208_v57, %v6318_v59  ;;  %v213_v57 = vld [vmem:[%s5139_s23 + $0xe8] sm:$0xff] }
 0x137   : > { %v2671_v42 = vand.u32 4294901760, %v2670_v18  ;;  %v946_v30 = vsub.f32 %v5556_v21, %v7760_v35  ;;  %v2289_v38 = vsub.f32 %v6307_v5, %v7765_v54  ;;  %v958_v19 = vsub.f32 %v5558_v14, %v7766_v22 }
 0x138   : > { %8198 = vst [vmem:[#allocation246_spill] sm:$0xff] %v6325_v20  ;;  %4016 = vmatprep.subr.bf16.mxu1 %v4015_v9  ;;  %v6336_v3 = vand.u32 4294901760, %v210_v15  ;;  %v7769_v0 = vand.u32 4294901760, %v5562_v36  ;;  %573 = vmatprep.mubr.f32.mxu1 %v572_v31  ;;  %v7776_v18 = vand.u32 4294901760, %v6325_v20  ;;  %v7777_v9 = vand.u32 4294901760, %v5564_v45 }
 0x139   : > { %v4399_v53 = vpack.c.bf16 %v2671_v42, %v2659_v26  ;;  %v947_v35 = vand.u32 4294901760, %v946_v30  ;;  %v2290_v7 = vand.u32 4294901760, %v2289_v38  ;;  %v959_v59 = vand.u32 4294901760, %v958_v19  ;;  %v8202_v30 = vld [vmem:[#allocation182_spill] sm:$0xff] }
 0x13a   : > { %8199 = vst [vmem:[#allocation247_spill] sm:$0xff] %v6336_v3  ;;  %v6343_v54 = vsub.f32 %v210_v15, %v6336_v3  ;;  %v2664_v22 = vsub.f32 %v5562_v36, %v7769_v0  ;;  %v577_v31 = vsub.f32 %v6325_v20, %v7776_v18  ;;  %v2676_v42 = vsub.f32 %v5564_v45, %v7777_v9  ;;  %v215_v15 = vld [vmem:[%s5139_s23 + $0xf8] sm:$0xff] }
 0x13b   : > { %4400 = vmatprep.subr.bf16.mxu0 %v4399_v53  ;;  %v6354_v26 = vand.u32 4294901760, %v213_v57  ;;  %v7780_v38 = vand.u32 4294901760, %v8202_v30  ;;  %2291 = vmatprep.mubr.f32.mxu0 %v2290_v7  ;;  %v4017_v19 = vpack.c.bf16 %v959_v59, %v947_v35  ;;  %v8203_v53 = vld [vmem:[#allocation183_spill] sm:$0xff]  ;;  %v6372_v35 = vand.u32 4294901760, %v215_v15 }
 0x13c   : > { %8200 = vst [vmem:[#allocation248_spill] sm:$0xff] %v6343_v54  ;;  %v7784_v5 = vand.u32 4294901760, %v6343_v54  ;;  %v2665_v0 = vand.u32 4294901760, %v2664_v22  ;;  %v7785_v3 = vand.u32 4294901760, %v8203_v53  ;;  %v578_v36 = vand.u32 4294901760, %v577_v31  ;;  %v8206_v22 = vld [vmem:[#allocation184_spill] sm:$0xff] }
 0x13d   : > { %8201 = vst [vmem:[#allocation249_spill] sm:$0xff] %v6354_v26  ;;  %v2677_v14 = vand.u32 4294901760, %v2676_v42  ;;  %v6361_v18 = vsub.f32 %v213_v57, %v6354_v26  ;;  %v964_v9 = vsub.f32 %v8202_v30, %v7780_v38  ;;  %4018 = vmatpush1.bf16.msra.mxu1 %v4017_v19  ;;  %8205 = vst [vmem:[#allocation251_spill] sm:$0xff] %v6372_v35  ;;  %v7788_v31 = vand.u32 4294901760, %v8206_v22  ;;  %v212_v57 = vld [vmem:[%s5139_s23 + $0xe0] sm:$0xff] }
 0x13e   : > { %v2295_v7 = vsub.f32 %v6343_v54, %v7784_v5  ;;  %v976_v59 = vsub.f32 %v8203_v53, %v7785_v3  ;;  %579 = vmatmul.mubr.f32.gmra.mrb[12].mxu1 %v578_v36  ;;  %v7792_v19 = vand.u32 4294901760, %v5585_v11  ;;  %v6379_v5 = vsub.f32 %v215_v15, %v6372_v35 }
 0x13f   : > { %8204 = vst [vmem:[#allocation250_spill] sm:$0xff] %v6361_v18  ;;  %v4401_v42 = vpack.c.bf16 %v2677_v14, %v2665_v0  ;;  %v7791_v20 = vand.u32 4294901760, %v6361_v18  ;;  %v965_v38 = vand.u32 4294901760, %v964_v9  ;;  %v2682_v3 = vsub.f32 %v8206_v22, %v7788_v31 }
 0x140   : > { %v2296_v26 = vand.u32 4294901760, %v2295_v7  ;;  %v977_v30 = vand.u32 4294901760, %v976_v59  ;;  %8207 = vst [vmem:[#allocation252_spill] sm:$0xff] %v6379_v5  ;;  %v2694_v14 = vsub.f32 %v5585_v11, %v7792_v19  ;;  %v6390_v0 = vand.u32 4294901760, %v212_v57  ;;  %v214_v7 = vld [vmem:[%s5139_s23 + $0xf0] sm:$0xff] }
 0x141   : > { %4402 = vmatpush1.bf16.msra.mxu0 %v4401_v42  ;;  %v587_v36 = vsub.f32 %v6361_v18, %v7791_v20  ;;  %v7793_v9 = vand.u32 4294901760, %v5589_v28  ;;  %v7799_v59 = vand.u32 4294901760, %v6379_v5  ;;  %v2683_v54 = vand.u32 4294901760, %v2682_v3 }
 0x142   : > { %8208 = vst [vmem:[#allocation253_spill] sm:$0xff] %v6390_v0  ;;  %2297 = vmatmul.mubr.f32.gmra.mrb[12].mxu0 %v2296_v26  ;;  %v4019_v15 = vpack.c.bf16 %v977_v30, %v965_v38  ;;  %v7798_v42 = vand.u32 4294901760, %v5592_v2  ;;  %v2695_v35 = vand.u32 4294901760, %v2694_v14  ;;  %v6397_v20 = vsub.f32 %v212_v57, %v6390_v0 }
 0x143   : > { %v588_v31 = vand.u32 4294901760, %v587_v36  ;;  %v970_v19 = vsub.f32 %v5589_v28, %v7793_v9  ;;  %v2305_v26 = vsub.f32 %v6379_v5, %v7799_v59  ;;  %v6408_v30 = vand.u32 4294901760, %v214_v7 }
 0x144   : > { %8209 = vst [vmem:[#allocation254_spill] sm:$0xff] %v6397_v20  ;;  %4020 = vmatprep.subr.bf16.mxu1 %v4019_v15  ;;  %v982_v3 = vsub.f32 %v5592_v2, %v7798_v42  ;;  %v7800_v38 = vand.u32 4294901760, %v5596_v29  ;;  %v4403_v57 = vpack.c.bf16 %v2695_v35, %v2683_v54  ;;  %v7801_v36 = vand.u32 4294901760, %v6397_v20 }
 0x145   : > { %8210 = vst [vmem:[#allocation255_spill] sm:$0xff] %v6408_v30  ;;  %589 = vmatprep.mubr.f32.mxu1 %v588_v31  ;;  %v971_v14 = vand.u32 4294901760, %v970_v19  ;;  %v7804_v9 = vand.u32 4294901760, %v5598_v8  ;;  %v2306_v15 = vand.u32 4294901760, %v2305_v26  ;;  %v6414_v0 = vsub.f32 %v214_v7, %v6408_v30 }
 0x146   : > { %v983_v18 = vand.u32 4294901760, %v982_v3  ;;  %v2688_v42 = vsub.f32 %v5596_v29, %v7800_v38  ;;  %4404 = vmatprep.subr.bf16.mxu0 %v4403_v57  ;;  %v593_v31 = vsub.f32 %v6397_v20, %v7801_v36  ;;  %v4023_v35 = vpack.c.bf16 %v5153_v17, %v5151_v16  ;;  %v8211_v38 = vld [vmem:[#allocation10_spill] sm:$0xff]  ;;  %v8212_v36 = vld [vmem:[#allocation12_spill] sm:$0xff]  ;;  %v8213_v17 = vld [vmem:[#allocation185_spill] sm:$0xff] }
 0x147   : > { %v2700_v54 = vsub.f32 %v5598_v8, %v7804_v9  ;;  %2307 = vmatprep.mubr.f32.mxu0 %v2306_v15  ;;  %v7808_v7 = vand.u32 4294901760, %v6414_v0  ;;  %v4407_v20 = vpack.c.bf16 %v8212_v36, %v8211_v38  ;;  %v8215_v15 = vld [vmem:[#allocation196_spill] sm:$0xff] }
 0x148   : > { %v4021_v19 = vpack.c.bf16 %v983_v18, %v971_v14  ;;  %v2689_v26 = vand.u32 4294901760, %v2688_v42  ;;  %v594_v3 = vand.u32 4294901760, %v593_v31  ;;  %v4025_v18 = vpack.c.bf16 %v5166_v27, %v5163_v25  ;;  %v8214_v14 = vld [vmem:[#allocation195_spill] sm:$0xff] }
 0x149   : > { %v2701_v59 = vand.u32 4294901760, %v2700_v54  ;;  %v2311_v57 = vsub.f32 %v6414_v0, %v7808_v7  ;;  %v4027_v42 = vpack.c.bf16 %v5180_v46, %v5176_v41  ;;  %v4411_v31 = vpack.c.bf16 %v5187_v50, %v5184_v48  ;;  %v8220_v7 = vld [vmem:[#allocation50_spill] sm:$0xff] }
 0x14a   : > { %4022 = vmatpush1.bf16.msra.mxu1 %v4021_v19  ;;  %v4029_v54 = vpack.c.bf16 %v5195_v61, %v5189_v52  ;;  %v4417_v19 = vpack.c.bf16 %v5229_v44, %v5227_v43  ;;  %v8245_v44 = vld [vmem:[#allocation217_spill] sm:$0xff]  ;;  %v8246_v43 = vld [vmem:[#allocation179_spill] sm:$0xff] }
 0x14b   : > { %595 = vmatmul.mubr.f32.gmra.mrb[14].mxu1 %v594_v3  ;;  %v4405_v9 = vpack.c.bf16 %v2701_v59, %v2689_v26  ;;  %4024 = vmatprep.subr.bf16.mxu1 %v4023_v35  ;;  %v2312_v5 = vand.u32 4294901760, %v2311_v57  ;;  %v4409_v59 = vpack.c.bf16 %v5174_v40, %v5172_v39  ;;  %v4033_v35 = vpack.c.bf16 %v5223_v34, %v5221_v33  ;;  %v8216_v57 = vld [vmem:[#allocation43_spill] sm:$0xff]  ;;  %v8239_v34 = vld [vmem:[#allocation165_spill] sm:$0xff] }
 0x14c   : > { %986 = vmatprep.mubr.f32.mxu1 %v8213_v17  ;;  %v4035_v26 = vpack.c.bf16 %v5237_v56, %v5233_v51  ;;  %v4419_v3 = vpack.c.bf16 %v5244_v63, %v5241_v58  ;;  %v8225_v63 = vld [vmem:[#allocation209_spill] sm:$0xff]  ;;  %v8227_v58 = vld [vmem:[#allocation147_spill] sm:$0xff]  ;;  %v8238_v51 = vld [vmem:[#allocation164_spill] sm:$0xff] }
 0x14d   : > { %4406 = vmatpush1.bf16.msra.mxu0 %v4405_v9  ;;  %v4031_v9 = vpack.c.bf16 %v5208_v10, %v5205_v6  ;;  %v8241_v33 = vld [vmem:[#allocation213_spill] sm:$0xff]  ;;  %v8252_v10 = vld [vmem:[#allocation219_spill] sm:$0xff]  ;;  %v8260_v6 = vld [vmem:[#allocation68_spill] sm:$0xff] }
 0x14e   : > { %2313 = vmatmul.mubr.f32.gmra.mrb[14].mxu0 %v2312_v5  ;;  %4408 = vmatprep.subr.bf16.mxu0 %v4407_v20  ;;  %v4413_v20 = vpack.c.bf16 %v5201_v4, %v5197_v62  ;;  %v4415_v5 = vpack.c.bf16 %v5214_v13, %v5212_v12  ;;  %v8244_v56 = vld [vmem:[#allocation177_spill] sm:$0xff]  ;;  %v8248_v13 = vld [vmem:[#allocation56_spill] sm:$0xff]  ;;  %v8251_v12 = vld [vmem:[#allocation63_spill] sm:$0xff] }
 0x14f   : > { %2704 = vmatprep.mubr.f32.mxu0 %v8214_v14  ;;  %988 = vmatmul.mubr.f32.vlgmr.msra.gmra.mrb[0].mxu1 %v8215_v15  ;;  %v8223_v15 = vld [vmem:[#allocation52_spill] sm:$0xff]  ;;  %v8224_v14 = vld [vmem:[#allocation54_spill] sm:$0xff]  ;;  %v8249_v4 = vld [vmem:[#allocation57_spill] sm:$0xff] }
 0x150   : > { %4026 = vmatpush1.bf16.msra.mxu1 %v4025_v18  ;;  %994 = vmatprep.mubr.f32.mxu1 %v5924_v37  ;;  %v8217_v18 = vld [vmem:[#allocation45_spill] sm:$0xff]  ;;  %v8222_v37 = vld [vmem:[#allocation207_spill] sm:$0xff]  ;;  %v4423_v17 = vpack.c.bf16 %v8224_v14, %v8223_v15  ;;  %v8237_v15 = vld [vmem:[#allocation162_spill] sm:$0xff] }
 0x151   : > { %4028 = vmatprep.subr.bf16.mxu1 %v4027_v42  ;;  %v4037_v42 = vpack.c.bf16 %v8217_v18, %v8216_v57  ;;  %v8228_v18 = vld [vmem:[#allocation148_spill] sm:$0xff]  ;;  %v8229_v57 = vld [vmem:[#allocation150_spill] sm:$0xff]  ;;  %v8235_v14 = vld [vmem:[#allocation211_spill] sm:$0xff] }
 0x152   : > { %2706 = vmatmul.mubr.f32.vlgmr.msra.gmra.mrb[0].mxu0 %v5652_v32  ;;  %v8221_v32 = vld [vmem:[#allocation51_spill] sm:$0xff]  ;;  %v8261_v61 = vld [vmem:[#allocation69_spill] sm:$0xff] }
 0x153   : > { %4410 = vmatpush1.bf16.msra.mxu0 %v4409_v59  ;;  %2712 = vmatprep.mubr.f32.mxu0 %v5934_v23  ;;  %v8218_v59 = vld [vmem:[#allocation47_spill] sm:$0xff]  ;;  %v8226_v23 = vld [vmem:[#allocation146_spill] sm:$0xff] }
 0x154   : > { %4412 = vmatprep.subr.bf16.mxu0 %v4411_v31  ;;  %4030 = vmatpush1.bf16.msra.mxu1 %v4029_v54  ;;  %v8219_v31 = vld [vmem:[#allocation48_spill] sm:$0xff]  ;;  %v8264_v52 = vld [vmem:[#allocation227_spill] sm:$0xff] }
 0x155   : > { %4032 = vmatprep.subr.bf16.mxu1 %v4031_v9  ;;  %v4421_v54 = vpack.c.bf16 %v8219_v31, %v8218_v59  ;;  %v4039_v9 = vpack.c.bf16 %v8221_v32, %v8220_v7  ;;  %996 = vmatmul.mubr.f32.gmra.mrb[2].mxu1 %v5952_v24  ;;  %v8230_v31 = vld [vmem:[#allocation152_spill] sm:$0xff]  ;;  %v8231_v59 = vld [vmem:[#allocation153_spill] sm:$0xff]  ;;  %v8232_v24 = vld [vmem:[#allocation155_spill] sm:$0xff] }
 0x156   : > { %2714 = vmatmul.mubr.f32.gmra.mrb[2].mxu0 %v8222_v37  ;;  %1002 = vmatprep.mubr.f32.mxu1 %v8225_v63  ;;  %v8234_v7 = vld [vmem:[#allocation159_spill] sm:$0xff]  ;;  %v8236_v63 = vld [vmem:[#allocation160_spill] sm:$0xff]  ;;  %v8243_v37 = vld [vmem:[#allocation170_spill] sm:$0xff] }
 0x157   : > { %4414 = vmatpush1.bf16.msra.mxu0 %v4413_v20  ;;  %v8233_v20 = vld [vmem:[#allocation158_spill] sm:$0xff]  ;;  %2720 = vmatprep.mubr.f32.mxu0 %v8235_v14  ;;  %v8242_v32 = vld [vmem:[#allocation215_spill] sm:$0xff]  ;;  %v8258_v14 = vld [vmem:[#allocation64_spill] sm:$0xff] }
 0x158   : > { %4416 = vmatprep.subr.bf16.mxu0 %v4415_v5  ;;  %4034 = vmatpush1.bf16.msra.mxu1 %v4033_v35  ;;  %v8240_v5 = vld [vmem:[#allocation167_spill] sm:$0xff]  ;;  %v8247_v35 = vld [vmem:[#allocation182_spill] sm:$0xff] }
 0x159   : > { %4036 = vmatprep.subr.bf16.mxu1 %v4035_v26  ;;  %1004 = vmatmul.mubr.f32.gmra.mrb[4].mxu1 %v8241_v33  ;;  %v4041_v26 = vpack.c.bf16 %v8249_v4, %v8248_v13  ;;  %v8253_v33 = vld [vmem:[#allocation221_spill] sm:$0xff] }
 0x15a   : > { %2722 = vmatmul.mubr.f32.gmra.mrb[4].mxu0 %v8242_v32  ;;  %1010 = vmatprep.mubr.f32.mxu1 %v8245_v44  ;;  %v8250_v44 = vld [vmem:[#allocation62_spill] sm:$0xff]  ;;  %v8254_v32 = vld [vmem:[#allocation223_spill] sm:$0xff]  ;;  %v8257_v13 = vld [vmem:[#allocation225_spill] sm:$0xff] }
 0x15b   : > { %4418 = vmatpush1.bf16.msra.mxu0 %v4417_v19  ;;  %v4043_v62 = vpack.c.bf16 %v8251_v12, %v8250_v44  ;;  %2728 = vmatprep.mubr.f32.mxu0 %v8252_v10  ;;  %v8259_v19 = vld [vmem:[#allocation66_spill] sm:$0xff]  ;;  %v4045_v12 = vpack.c.bf16 %v8261_v61, %v8260_v6  ;;  %v8263_v44 = vld [vmem:[#allocation75_spill] sm:$0xff]  ;;  %v8272_v6 = vld [vmem:[#allocation80_spill] sm:$0xff] }
 0x15c   : > { %4420 = vmatprep.subr.bf16.mxu0 %v4419_v3  ;;  %4038 = vmatpush1.bf16.msra.mxu1 %v4037_v42  ;;  %v8255_v3 = vld [vmem:[#allocation59_spill] sm:$0xff]  ;;  %v8256_v42 = vld [vmem:[#allocation60_spill] sm:$0xff]  ;;  %v8262_v10 = vld [vmem:[#allocation74_spill] sm:$0xff] }
 0x15d   : > { %4040 = vmatprep.subr.bf16.mxu1 %v4039_v9  ;;  %1012 = vmatmul.mubr.f32.gmra.mrb[6].mxu1 %v8253_v33  ;;  %v4425_v4 = vpack.c.bf16 %v8256_v42, %v8255_v3  ;;  %v4427_v9 = vpack.c.bf16 %v8259_v19, %v8258_v14  ;;  %v4047_v33 = vpack.c.bf16 %v8263_v44, %v8262_v10  ;;  %v8269_v42 = vld [vmem:[#allocation233_spill] sm:$0xff]  ;;  %v8270_v19 = vld [vmem:[#allocation76_spill] sm:$0xff]  ;;  %v8271_v61 = vld [vmem:[#allocation78_spill] sm:$0xff] }
 0x15e   : > { %2730 = vmatmul.mubr.f32.gmra.mrb[6].mxu0 %v8254_v32  ;;  %1018 = vmatprep.mubr.f32.mxu1 %v8257_v13  ;;  %v8266_v32 = vld [vmem:[#allocation231_spill] sm:$0xff]  ;;  %v8273_v14 = vld [vmem:[#allocation81_spill] sm:$0xff] }
 0x15f   : > { %4422 = vmatpush1.bf16.msra.mxu0 %v4421_v54  ;;  %2736 = vmatprep.mubr.f32.mxu0 %v8264_v52  ;;  %v8265_v54 = vld [vmem:[#allocation229_spill] sm:$0xff]  ;;  %v8267_v13 = vld [vmem:[#allocation71_spill] sm:$0xff]  ;;  %v4049_v44 = vpack.c.bf16 %v8273_v14, %v8272_v6  ;;  %v8274_v52 = vld [vmem:[#allocation86_spill] sm:$0xff] }
 0x160   : > { %4424 = vmatprep.subr.bf16.mxu0 %v4423_v17  ;;  %4042 = vmatpush1.bf16.msra.mxu1 %v4041_v26  ;;  %v8268_v17 = vld [vmem:[#allocation72_spill] sm:$0xff]  ;;  %v8275_v10 = vld [vmem:[#allocation87_spill] sm:$0xff]  ;;  %v8283_v14 = vld [vmem:[#allocation90_spill] sm:$0xff] }
 0x161   : > { %4044 = vmatprep.subr.bf16.mxu1 %v4043_v62  ;;  %1020 = vmatmul.mubr.f32.gmra.mrb[8].mxu1 %v8265_v54  ;;  %v4429_v26 = vpack.c.bf16 %v8268_v17, %v8267_v13  ;;  %v4431_v62 = vpack.c.bf16 %v8271_v61, %v8270_v19  ;;  %v4051_v54 = vpack.c.bf16 %v8275_v10, %v8274_v52  ;;  %v8276_v3 = vld [vmem:[#allocation235_spill] sm:$0xff]  ;;  %v8281_v17 = vld [vmem:[#allocation241_spill] sm:$0xff]  ;;  %v8282_v61 = vld [vmem:[#allocation88_spill] sm:$0xff] }
 0x162   : > { %2738 = vmatmul.mubr.f32.gmra.mrb[8].mxu0 %v8266_v32  ;;  %1026 = vmatprep.mubr.f32.mxu1 %v8269_v42  ;;  %v8278_v32 = vld [vmem:[#allocation239_spill] sm:$0xff]  ;;  %v8284_v6 = vld [vmem:[#allocation92_spill] sm:$0xff]  ;;  %v8285_v19 = vld [vmem:[#allocation93_spill] sm:$0xff] }
 0x163   : > { %4426 = vmatpush1.bf16.msra.mxu0 %v4425_v4  ;;  %2744 = vmatprep.mubr.f32.mxu0 %v8276_v3  ;;  %v8277_v4 = vld [vmem:[#allocation237_spill] sm:$0xff]  ;;  %v8279_v42 = vld [vmem:[#allocation83_spill] sm:$0xff]  ;;  %v4053_v10 = vpack.c.bf16 %v8285_v19, %v8284_v6  ;;  %v8286_v3 = vld [vmem:[#allocation98_spill] sm:$0xff] }
 0x164   : > { %4428 = vmatprep.subr.bf16.mxu0 %v4427_v9  ;;  %4046 = vmatpush1.bf16.msra.mxu1 %v4045_v12  ;;  %v8280_v9 = vld [vmem:[#allocation84_spill] sm:$0xff]  ;;  %v8287_v52 = vld [vmem:[#allocation99_spill] sm:$0xff]  ;;  %v8295_v19 = vld [vmem:[#allocation102_spill] sm:$0xff] }
 0x165   : > { %4048 = vmatprep.subr.bf16.mxu1 %v4047_v33  ;;  %1028 = vmatmul.mubr.f32.gmra.mrb[10].mxu1 %v8277_v4  ;;  %v4433_v12 = vpack.c.bf16 %v8280_v9, %v8279_v42  ;;  %v4435_v33 = vpack.c.bf16 %v8283_v14, %v8282_v61  ;;  %v4055_v4 = vpack.c.bf16 %v8287_v52, %v8286_v3  ;;  %v8288_v13 = vld [vmem:[#allocation243_spill] sm:$0xff]  ;;  %v8293_v9 = vld [vmem:[#allocation249_spill] sm:$0xff]  ;;  %v8294_v14 = vld [vmem:[#allocation100_spill] sm:$0xff] }
 0x166   : > { %2746 = vmatmul.mubr.f32.gmra.mrb[10].mxu0 %v8278_v32  ;;  %1034 = vmatprep.mubr.f32.mxu1 %v8281_v17  ;;  %v8290_v32 = vld [vmem:[#allocation247_spill] sm:$0xff]  ;;  %v8296_v6 = vld [vmem:[#allocation104_spill] sm:$0xff]  ;;  %v8297_v61 = vld [vmem:[#allocation105_spill] sm:$0xff] }
 0x167   : > { %4430 = vmatpush1.bf16.msra.mxu0 %v4429_v26  ;;  %2752 = vmatprep.mubr.f32.mxu0 %v8288_v13  ;;  %v8289_v26 = vld [vmem:[#allocation245_spill] sm:$0xff]  ;;  %v8291_v17 = vld [vmem:[#allocation95_spill] sm:$0xff]  ;;  %v4057_v52 = vpack.c.bf16 %v8297_v61, %v8296_v6  ;;  %v8298_v13 = vld [vmem:[#allocation110_spill] sm:$0xff] }
 0x168   : > { %4432 = vmatprep.subr.bf16.mxu0 %v4431_v62  ;;  %4050 = vmatpush1.bf16.msra.mxu1 %v4049_v44  ;;  %v8292_v62 = vld [vmem:[#allocation96_spill] sm:$0xff]  ;;  %v8299_v3 = vld [vmem:[#allocation111_spill] sm:$0xff]  ;;  %v8306_v61 = vld [vmem:[#allocation114_spill] sm:$0xff] }
 0x169   : > { %4052 = vmatprep.subr.bf16.mxu1 %v4051_v54  ;;  %1036 = vmatmul.mubr.f32.gmra.mrb[12].mxu1 %v8289_v26  ;;  %v4437_v44 = vpack.c.bf16 %v8292_v62, %v8291_v17  ;;  %v4439_v54 = vpack.c.bf16 %v8295_v19, %v8294_v14  ;;  %v4059_v26 = vpack.c.bf16 %v8299_v3, %v8298_v13  ;;  %v8300_v42 = vld [vmem:[#allocation251_spill] sm:$0xff]  ;;  %v8305_v19 = vld [vmem:[#allocation112_spill] sm:$0xff]  ;;  %v8308_v14 = vld [vmem:[#allocation117_spill] sm:$0xff] }
 0x16a   : > { %2754 = vmatmul.mubr.f32.gmra.mrb[12].mxu0 %v8290_v32  ;;  %1042 = vmatprep.mubr.f32.mxu1 %v8293_v9  ;;  %v8302_v9 = vld [vmem:[#allocation107_spill] sm:$0xff]  ;;  %v8304_v32 = vld [vmem:[#allocation194_spill] sm:$0xff]  ;;  %v8307_v6 = vld [vmem:[#allocation116_spill] sm:$0xff] }
 0x16b   : > { %4434 = vmatpush1.bf16.msra.mxu0 %v4433_v12  ;;  %2760 = vmatprep.mubr.f32.mxu0 %v8300_v42  ;;  %v8301_v12 = vld [vmem:[#allocation253_spill] sm:$0xff]  ;;  %v4061_v3 = vpack.c.bf16 %v8308_v14, %v8307_v6  ;;  %v8309_v42 = vld [vmem:[#allocation122_spill] sm:$0xff]  ;;  %v8310_v13 = vld [vmem:[#allocation123_spill] sm:$0xff] }
 0x16c   : > { %4436 = vmatprep.subr.bf16.mxu0 %v4435_v33  ;;  %4054 = vmatpush1.bf16.msra.mxu1 %v4053_v10  ;;  %v8303_v33 = vld [vmem:[#allocation108_spill] sm:$0xff]  ;;  %v8311_v62 = vld [vmem:[#allocation197_spill] sm:$0xff]  ;;  %v8318_v14 = vld [vmem:[#allocation134_spill] sm:$0xff] }
 0x16d   : > { %4056 = vmatprep.subr.bf16.mxu1 %v4055_v4  ;;  %1044 = vmatmul.mubr.f32.gmra.mrb[14].mxu1 %v8301_v12  ;;  %v4441_v10 = vpack.c.bf16 %v8303_v33, %v8302_v9  ;;  %v4443_v4 = vpack.c.bf16 %v8306_v61, %v8305_v19  ;;  %v4063_v12 = vpack.c.bf16 %v8310_v13, %v8309_v42  ;;  %v8316_v17 = vld [vmem:[#allocation128_spill] sm:$0xff]  ;;  %v8317_v61 = vld [vmem:[#allocation129_spill] sm:$0xff]  ;;  %v8320_v13 = vld [vmem:[#allocation131_spill] sm:$0xff] }
 0x16e   : > { %2762 = vmatmul.mubr.f32.gmra.mrb[14].mxu0 %v6408_v30  ;;  %1244 = vmatprep.mubr.f32.mxu1 %v8304_v32  ;;  %v8313_v30 = vld [vmem:[#allocation120_spill] sm:$0xff]  ;;  %v4065_v19 = vpack.c.bf16 %v8317_v61, %v8316_v17 }
 0x16f   : > { %4438 = vmatpush1.bf16.msra.mxu0 %v4437_v44  ;;  %2962 = vmatprep.mubr.f32.mxu0 %v8311_v62  ;;  %v8312_v44 = vld [vmem:[#allocation119_spill] sm:$0xff]  ;;  %v8321_v42 = vld [vmem:[#allocation132_spill] sm:$0xff] }
 0x170   : > { %4440 = vmatprep.subr.bf16.mxu0 %v4439_v54  ;;  %4058 = vmatpush1.bf16.msra.mxu1 %v4057_v52  ;;  %v4445_v33 = vpack.c.bf16 %v8313_v30, %v8312_v44  ;;  %v8314_v54 = vld [vmem:[#allocation124_spill] sm:$0xff]  ;;  %v8315_v52 = vld [vmem:[#allocation126_spill] sm:$0xff]  ;;  %v4449_v50 = vpack.c.bf16 %v8321_v42, %v8320_v13  ;;  %v8325_v44 = vld [vmem:[#allocation141_spill] sm:$0xff] }
 0x171   : > { %4060 = vmatprep.subr.bf16.mxu1 %v4059_v26  ;;  %v4447_v9 = vpack.c.bf16 %v8315_v52, %v8314_v54  ;;  %v8319_v26 = vld [vmem:[#allocation135_spill] sm:$0xff]  ;;  %v8323_v30 = vld [vmem:[#allocation138_spill] sm:$0xff]  ;;  %v8327_v61 = vld [vmem:[#allocation144_spill] sm:$0xff] }
 0x172   : > { %v4067_v6 = vpack.c.bf16 %v8319_v26, %v8318_v14  ;;  %v8326_v52 = vld [vmem:[#allocation143_spill] sm:$0xff] }
 0x173   : > { %4442 = vmatpush1.bf16.msra.mxu0 %v4441_v10  ;;  %v8322_v10 = vld [vmem:[#allocation136_spill] sm:$0xff] }
 0x174   : > { %4444 = vmatprep.subr.bf16.mxu0 %v4443_v4  ;;  %4062 = vmatpush1.bf16.msra.mxu1 %v4061_v3  ;;  %v4451_v4 = vpack.c.bf16 %v8323_v30, %v8322_v10  ;;  %v8324_v3 = vld [vmem:[#allocation140_spill] sm:$0xff] }
 0x175   : > { %4064 = vmatprep.subr.bf16.mxu1 %v4063_v12  ;;  %v4069_v48 = vpack.c.bf16 %v8325_v44, %v8324_v3  ;;  %v4453_v12 = vpack.c.bf16 %v8327_v61, %v8326_v52  ;;  %v8414_v61 = vld [vmem:[#allocation121_spill] sm:$0xff] }
 0x177   : > { %4446 = vmatpush1.bf16.msra.mxu0 %v4445_v33  ;;  %v8328_v33 = vpack.c.bf16 %v8227_v58, %v8226_v23 }
 0x178   : > { %4448 = vmatprep.subr.bf16.mxu0 %v4447_v9  ;;  %4066 = vmatpush1.bf16.msra.mxu1 %v4065_v19  ;;  %v8329_v19 = vpack.c.bf16 %v8229_v57, %v8228_v18  ;;  %v8330_v9 = vpack.c.bf16 %v8231_v59, %v8230_v31  ;;  %v8403_v59 = vld [vmem:[#allocation97_spill] sm:$0xff]  ;;  %v8407_v31 = vand.u32 4294901760, %v8311_v62  ;;  %v8409_v57 = vld [vmem:[#allocation103_spill] sm:$0xff] }
 0x179   : > { %4068 = vmatprep.subr.bf16.mxu1 %v4067_v6  ;;  %v8333_v6 = vpack.c.bf16 %v8237_v15, %v8236_v63  ;;  %v8392_v15 = vld [vmem:[#allocation244_spill] sm:$0xff]  ;;  %v8393_v63 = vld [vmem:[#allocation77_spill] sm:$0xff]  ;;  %v8413_v18 = vld [vmem:[#allocation115_spill] sm:$0xff] }
 0x17a   : > { %v8417_v62 = vld [vmem:[#allocation127_spill] sm:$0xff] }
 0x17b   : > { %4450 = vmatpush1.bf16.msra.mxu0 %v4449_v50  ;;  %v8331_v50 = vpack.c.bf16 %v8234_v7, %v8233_v20  ;;  %v8400_v7 = vld [vmem:[#allocation252_spill] sm:$0xff]  ;;  %v8401_v20 = vld [vmem:[#allocation89_spill] sm:$0xff] }
 0x17c   : > { %4452 = vmatprep.subr.bf16.mxu0 %v4451_v4  ;;  %4070 = vmatpush1.bf16.msra.mxu1 %v4069_v48  ;;  %v8332_v48 = vpack.c.bf16 %v8173_v47, %v8232_v24  ;;  %v8334_v4 = vpack.c.bf16 %v8239_v34, %v8238_v51  ;;  %v8387_v34 = vld [vmem:[#allocation73_spill] sm:$0xff]  ;;  %v8391_v51 = vld [vmem:[#allocation70_spill] sm:$0xff] }
 0x17d   : > { %4072 = vmatprep.subr.bf16.mxu1 %v8328_v33  ;;  %v8336_v33 = vpack.c.bf16 %v8188_v1, %v8240_v5  ;;  %v8379_v1 = vld [vmem:[#allocation61_spill] sm:$0xff]  ;;  %v8383_v5 = vld [vmem:[#allocation58_spill] sm:$0xff] }
 0x17e   : > { %v8395_v47 = vld [vmem:[#allocation85_spill] sm:$0xff]  ;;  %v8399_v24 = vld [vmem:[#allocation82_spill] sm:$0xff] }
 0x17f   : > { %4454 = vmatpush1.bf16.msra.mxu0 %v4453_v12  ;;  %v8335_v12 = vpack.c.bf16 %v8192_v55, %v8243_v37  ;;  %v8384_v55 = vld [vmem:[#allocation236_spill] sm:$0xff]  ;;  %v8385_v37 = vld [vmem:[#allocation65_spill] sm:$0xff] }
 0x180   : > { %4456 = vmatprep.subr.bf16.mxu0 %v8329_v19  ;;  %4074 = vmatpush1.bf16.msra.mxu1 %v8330_v9  ;;  %v8337_v19 = vpack.c.bf16 %v5552_v60, %v8195_v49  ;;  %v8338_v9 = vpack.c.bf16 %v8244_v56, %v5556_v21  ;;  %v8371_v56 = vld [vmem:[#allocation49_spill] sm:$0xff]  ;;  %v8375_v21 = vld [vmem:[#allocation46_spill] sm:$0xff]  ;;  %v8376_v60 = vld [vmem:[#allocation228_spill] sm:$0xff] }
 0x181   : > { %4076 = vmatprep.subr.bf16.mxu1 %v8331_v50  ;;  %v8339_v50 = vpack.c.bf16 %v8203_v53, %v8247_v35  ;;  %v8368_v53 = vld [vmem:[#allocation220_spill] sm:$0xff]  ;;  %v8377_v49 = vld [vmem:[#allocation53_spill] sm:$0xff] }
 0x182   : > { %v8369_v35 = vld [vmem:[#allocation40_spill] sm:$0xff] }
 0x183   : > { %4458 = vmatpush1.bf16.msra.mxu0 %v8332_v48  ;;  %v8340_v48 = vpack.c.bf16 %v5564_v45, %v8246_v43  ;;  %v8363_v45 = vld [vmem:[#allocation37_spill] sm:$0xff]  ;;  %v8367_v43 = vld [vmem:[#allocation34_spill] sm:$0xff] }
 0x184   : > { %4460 = vmatprep.subr.bf16.mxu0 %v8333_v6  ;;  %4078 = vmatpush1.bf16.msra.mxu1 %v8334_v4  ;;  %v8341_v6 = vpack.c.bf16 %v5585_v11, %v8206_v22  ;;  %v8342_v4 = vpack.c.bf16 %v5592_v2, %v5589_v28  ;;  %v8349_v11 = vld [vmem:[#allocation202_spill] sm:$0xff]  ;;  %v8360_v28 = vld [vmem:[#allocation212_spill] sm:$0xff] }
 0x185   : > { %4080 = vmatprep.subr.bf16.mxu1 %v8335_v12  ;;  %v8343_v12 = vld [vmem:[#allocation8_spill] sm:$0xff]  ;;  %v8351_v2 = vld [vmem:[#allocation14_spill] sm:$0xff] }
 0x186   : > { %v8361_v22 = vld [vmem:[#allocation28_spill] sm:$0xff] }
 0x187   : > { %4462 = vmatpush1.bf16.msra.mxu0 %v8336_v33  ;;  %v8344_v33 = vpack.c.bf16 %v5598_v8, %v5596_v29  ;;  %v8354_v8 = vld [vmem:[#allocation20_spill] sm:$0xff]  ;;  %v8356_v29 = vld [vmem:[#allocation206_spill] sm:$0xff] }
 0x188   : > { %4464 = vmatprep.subr.bf16.mxu0 %v8337_v19  ;;  %4082 = vmatpush1.bf16.msra.mxu1 %v8338_v9  ;;  %v8345_v19 = vld [vmem:[#allocation198_spill] sm:$0xff]  ;;  %v8346_v9 = vld [vmem:[#allocation11_spill] sm:$0xff] }
 0x189   : > { %4084 = vmatprep.subr.bf16.mxu1 %v8339_v50  ;;  %v8347_v50 = vld [vmem:[#allocation13_spill] sm:$0xff] }
 0x18b   : > { %4466 = vmatpush1.bf16.msra.mxu0 %v8340_v48  ;;  %v8348_v48 = vld [vmem:[#allocation15_spill] sm:$0xff] }
 0x18c   : > { %4468 = vmatprep.subr.bf16.mxu0 %v8341_v6  ;;  %4086 = vmatpush1.bf16.msra.mxu1 %v8342_v4  ;;  %v8350_v6 = vld [vmem:[#allocation200_spill] sm:$0xff] }
 0x18d   : > { %4088 = vmatprep.subr.bf16.mxu1 %v8343_v12  ;;  %v8352_v4 = vld [vmem:[#allocation204_spill] sm:$0xff] }
 0x18e   : > { %v8353_v12 = vld [vmem:[#allocation16_spill] sm:$0xff] }
 0x18f   : > { %4470 = vmatpush1.bf16.msra.mxu0 %v8344_v33  ;;  %1247 = vmatmul.mubr.f32.vlgmr.msra.gmra.mrb[0].mxu1 %v8345_v19  ;;  %v8355_v33 = vld [vmem:[#allocation25_spill] sm:$0xff] }
 0x190   : > { %4472 = vmatprep.subr.bf16.mxu0 %v8346_v9  ;;  %4090 = vmatpush1.bf16.msra.mxu1 %v8347_v50  ;;  %v8357_v9 = vld [vmem:[#allocation208_spill] sm:$0xff]  ;;  %v8358_v50 = vld [vmem:[#allocation210_spill] sm:$0xff] }
 0x191   : > { %4092 = vmatprep.subr.bf16.mxu1 %v8348_v48  ;;  %1254 = vmatprep.mubr.f32.mxu1 %v8349_v11  ;;  %v8359_v48 = vld [vmem:[#allocation23_spill] sm:$0xff] }
 0x192   : > { %2965 = vmatmul.mubr.f32.vlgmr.msra.gmra.mrb[0].mxu0 %v8350_v6 }
 0x193   : > { %4474 = vmatpush1.bf16.msra.mxu0 %v8351_v2  ;;  %2972 = vmatprep.mubr.f32.mxu0 %v8352_v4  ;;  %v8362_v2 = vld [vmem:[#allocation31_spill] sm:$0xff] }
 0x194   : > { %4476 = vmatprep.subr.bf16.mxu0 %v8353_v12  ;;  %4094 = vmatpush1.bf16.msra.mxu1 %v8354_v8  ;;  %v8364_v12 = vld [vmem:[#allocation214_spill] sm:$0xff]  ;;  %v8365_v8 = vld [vmem:[#allocation216_spill] sm:$0xff] }
 0x195   : > { %4096 = vmatprep.subr.bf16.mxu1 %v8355_v33  ;;  %1257 = vmatmul.mubr.f32.gmra.mrb[2].mxu1 %v8356_v29  ;;  %v8366_v33 = vld [vmem:[#allocation218_spill] sm:$0xff] }
 0x196   : > { %2975 = vmatmul.mubr.f32.gmra.mrb[2].mxu0 %v8357_v9  ;;  %1264 = vmatprep.mubr.f32.mxu1 %v8358_v50 }
 0x197   : > { %4478 = vmatpush1.bf16.msra.mxu0 %v8359_v48  ;;  %2982 = vmatprep.mubr.f32.mxu0 %v8360_v28  ;;  %v8370_v48 = vld [vmem:[#allocation44_spill] sm:$0xff] }
 0x198   : > { %4480 = vmatprep.subr.bf16.mxu0 %v8361_v22  ;;  %4098 = vmatpush1.bf16.msra.mxu1 %v8362_v2  ;;  %v8372_v22 = vld [vmem:[#allocation222_spill] sm:$0xff]  ;;  %v8373_v2 = vld [vmem:[#allocation224_spill] sm:$0xff] }
 0x199   : > { %4100 = vmatprep.subr.bf16.mxu1 %v8363_v45  ;;  %1267 = vmatmul.mubr.f32.gmra.mrb[4].mxu1 %v8364_v12  ;;  %v8374_v45 = vld [vmem:[#allocation226_spill] sm:$0xff] }
 0x19a   : > { %2985 = vmatmul.mubr.f32.gmra.mrb[4].mxu0 %v8365_v8  ;;  %1274 = vmatprep.mubr.f32.mxu1 %v8366_v33 }
 0x19b   : > { %4482 = vmatpush1.bf16.msra.mxu0 %v8367_v43  ;;  %2992 = vmatprep.mubr.f32.mxu0 %v8368_v53  ;;  %v8378_v43 = vld [vmem:[#allocation55_spill] sm:$0xff] }
 0x19c   : > { %4484 = vmatprep.subr.bf16.mxu0 %v8369_v35  ;;  %4102 = vmatpush1.bf16.msra.mxu1 %v8370_v48  ;;  %v8380_v35 = vld [vmem:[#allocation230_spill] sm:$0xff]  ;;  %v8381_v48 = vld [vmem:[#allocation232_spill] sm:$0xff] }
 0x19d   : > { %4104 = vmatprep.subr.bf16.mxu1 %v8371_v56  ;;  %1277 = vmatmul.mubr.f32.gmra.mrb[6].mxu1 %v8372_v22  ;;  %v8382_v56 = vld [vmem:[#allocation234_spill] sm:$0xff] }
 0x19e   : > { %2995 = vmatmul.mubr.f32.gmra.mrb[6].mxu0 %v8373_v2  ;;  %1284 = vmatprep.mubr.f32.mxu1 %v8374_v45 }
 0x19f   : > { %4486 = vmatpush1.bf16.msra.mxu0 %v8375_v21  ;;  %3002 = vmatprep.mubr.f32.mxu0 %v8376_v60  ;;  %v8386_v21 = vld [vmem:[#allocation67_spill] sm:$0xff] }
 0x1a0   : > { %4488 = vmatprep.subr.bf16.mxu0 %v8377_v49  ;;  %4106 = vmatpush1.bf16.msra.mxu1 %v8378_v43  ;;  %v8388_v49 = vld [vmem:[#allocation238_spill] sm:$0xff]  ;;  %v8389_v43 = vld [vmem:[#allocation240_spill] sm:$0xff] }
 0x1a1   : > { %4108 = vmatprep.subr.bf16.mxu1 %v8379_v1  ;;  %1287 = vmatmul.mubr.f32.gmra.mrb[8].mxu1 %v8380_v35  ;;  %v8390_v1 = vld [vmem:[#allocation242_spill] sm:$0xff] }
 0x1a2   : > { %3005 = vmatmul.mubr.f32.gmra.mrb[8].mxu0 %v8381_v48  ;;  %1294 = vmatprep.mubr.f32.mxu1 %v8382_v56 }
 0x1a3   : > { %4490 = vmatpush1.bf16.msra.mxu0 %v8383_v5  ;;  %3012 = vmatprep.mubr.f32.mxu0 %v8384_v55  ;;  %v8394_v5 = vld [vmem:[#allocation79_spill] sm:$0xff] }
 0x1a4   : > { %4492 = vmatprep.subr.bf16.mxu0 %v8385_v37  ;;  %4110 = vmatpush1.bf16.msra.mxu1 %v8386_v21  ;;  %v8396_v37 = vld [vmem:[#allocation246_spill] sm:$0xff]  ;;  %v8397_v21 = vld [vmem:[#allocation248_spill] sm:$0xff] }
 0x1a5   : > { %4112 = vmatprep.subr.bf16.mxu1 %v8387_v34  ;;  %1297 = vmatmul.mubr.f32.gmra.mrb[10].mxu1 %v8388_v49  ;;  %v8398_v34 = vld [vmem:[#allocation250_spill] sm:$0xff] }
 0x1a6   : > { %3015 = vmatmul.mubr.f32.gmra.mrb[10].mxu0 %v8389_v43  ;;  %1304 = vmatprep.mubr.f32.mxu1 %v8390_v1 }
 0x1a7   : > { %4494 = vmatpush1.bf16.msra.mxu0 %v8391_v51  ;;  %3022 = vmatprep.mubr.f32.mxu0 %v8392_v15  ;;  %v8402_v51 = vld [vmem:[#allocation91_spill] sm:$0xff] }
 0x1a8   : > { %4496 = vmatprep.subr.bf16.mxu0 %v8393_v63  ;;  %4114 = vmatpush1.bf16.msra.mxu1 %v8394_v5  ;;  %v8404_v63 = vld [vmem:[#allocation254_spill] sm:$0xff] }
 0x1a9   : > { %4116 = vmatprep.subr.bf16.mxu1 %v8395_v47  ;;  %1307 = vmatmul.mubr.f32.gmra.mrb[12].mxu1 %v8396_v37  ;;  %v8405_v47 = vand.u32 4294901760, %v8304_v32  ;;  %v8406_v5 = vld [vmem:[#allocation94_spill] sm:$0xff] }
 0x1aa   : > { %3025 = vmatmul.mubr.f32.gmra.mrb[12].mxu0 %v8397_v21  ;;  %1314 = vmatprep.mubr.f32.mxu1 %v8398_v34  ;;  %v8415_v32 = vld [vmem:[#allocation118_spill] sm:$0xff] }
 0x1ab   : > { %4498 = vmatpush1.bf16.msra.mxu0 %v8399_v24  ;;  %3032 = vmatprep.mubr.f32.mxu0 %v8400_v7  ;;  %v8408_v24 = vld [vmem:[#allocation101_spill] sm:$0xff] }
 0x1ac   : > { %4500 = vmatprep.subr.bf16.mxu0 %v8401_v20  ;;  %4118 = vmatpush1.bf16.msra.mxu1 %v8402_v51  ;;  %v8410_v20 = vld [vmem:[#allocation109_spill] sm:$0xff]  ;;  %v8411_v51 = vld [vmem:[#allocation106_spill] sm:$0xff] }
 0x1ad   : > { %4120 = vmatprep.subr.bf16.mxu1 %v8403_v59  ;;  %1317 = vmatmul.mubr.f32.gmra.mrb[14].mxu1 %v8404_v63  ;;  %v8412_v59 = vld [vmem:[#allocation113_spill] sm:$0xff] }
 0x1ae   : > { %3035 = vmatmul.mubr.f32.gmra.mrb[14].mxu0 %v6414_v0  ;;  %1454 = vmatprep.mubr.f32.mxu1 %v8405_v47  ;;  %v8416_v47 = vld [vmem:[#allocation125_spill] sm:$0xff] }
 0x1af   : > { %4502 = vmatpush1.bf16.msra.mxu0 %v8406_v5  ;;  %3172 = vmatprep.mubr.f32.mxu0 %v8407_v31  ;;  %v8418_v31 = vld [vmem:[#allocation133_spill] sm:$0xff] }
 0x1b0   : > { %4504 = vmatprep.subr.bf16.mxu0 %v8408_v24  ;;  %4122 = vmatpush1.bf16.msra.mxu1 %v8409_v57  ;;  %v8419_v24 = vld [vmem:[#allocation130_spill] sm:$0xff]  ;;  %v8420_v57 = vld [vmem:[#allocation137_spill] sm:$0xff] }
 0x1b1   : > { %4124 = vmatprep.subr.bf16.mxu1 %v8410_v20  ;;  %v8421_v20 = vld [vmem:[#allocation139_spill] sm:$0xff] }
 0x1b3   : > { %4506 = vmatpush1.bf16.msra.mxu0 %v8411_v51  ;;  %v8422_v51 = vld [vmem:[#allocation145_spill] sm:$0xff] }
 0x1b4   : > { %4508 = vmatprep.subr.bf16.mxu0 %v8412_v59  ;;  %4126 = vmatpush1.bf16.msra.mxu1 %v8413_v18  ;;  %v8423_v59 = vld [vmem:[#allocation142_spill] sm:$0xff]  ;;  %v8424_v18 = vld [vmem:[#allocation149_spill] sm:$0xff] }
 0x1b5   : > { %4128 = vmatprep.subr.bf16.mxu1 %v8414_v61  ;;  %v8425_v61 = vld [vmem:[#allocation151_spill] sm:$0xff] }
 0x1b7   : > { %4510 = vmatpush1.bf16.msra.mxu0 %v8415_v32  ;;  %v8426_v32 = vld [vmem:[#allocation157_spill] sm:$0xff] }
 0x1b8   : > { %4512 = vmatprep.subr.bf16.mxu0 %v8416_v47  ;;  %4130 = vmatpush1.bf16.msra.mxu1 %v8417_v62  ;;  %v8427_v47 = vld [vmem:[#allocation154_spill] sm:$0xff]  ;;  %v8428_v62 = vld [vmem:[#allocation161_spill] sm:$0xff] }
 0x1b9   : > { %4132 = vmatprep.subr.bf16.mxu1 %v8418_v31  ;;  %v8429_v31 = vld [vmem:[#allocation163_spill] sm:$0xff] }
 0x1bb   : > { %4514 = vmatpush1.bf16.msra.mxu0 %v8419_v24  ;;  %v8430_v24 = vld [vmem:[#allocation169_spill] sm:$0xff] }
 0x1bc   : > { %4516 = vmatprep.subr.bf16.mxu0 %v8420_v57  ;;  %4134 = vmatpush1.bf16.msra.mxu1 %v8421_v20  ;;  %v8431_v57 = vld [vmem:[#allocation166_spill] sm:$0xff]  ;;  %v8432_v20 = vld [vmem:[#allocation173_spill] sm:$0xff] }
 0x1bd   : > { %4136 = vmatprep.subr.bf16.mxu1 %v8422_v51  ;;  %v8433_v51 = vld [vmem:[#allocation175_spill] sm:$0xff] }
 0x1bf   : > { %4518 = vmatpush1.bf16.msra.mxu0 %v8423_v59  ;;  %v8434_v59 = vld [vmem:[#allocation181_spill] sm:$0xff] }
 0x1c0   : > { %4520 = vmatprep.subr.bf16.mxu0 %v8424_v18  ;;  %4138 = vmatpush1.bf16.msra.mxu1 %v8425_v61  ;;  %v8435_v61 = vand.u32 4294901760, %v5151_v16  ;;  %v8436_v18 = vld [vmem:[#allocation9_spill] sm:$0xff]  ;;  %v8445_v16 = vand.u32 4294901760, %v5176_v41 }
 0x1c1   : > { %4140 = vmatprep.subr.bf16.mxu1 %v8426_v32  ;;  %v8437_v32 = vand.u32 4294901760, %v8436_v18 }
 0x1c3   : > { %4522 = vmatpush1.bf16.msra.mxu0 %v8427_v47  ;;  %v4151_v5 = vpack.c.bf16 %v8437_v32, %v8435_v61  ;;  %v8438_v47 = vld [vmem:[#allocation178_spill] sm:$0xff]  ;;  %v8446_v61 = vand.u32 4294901760, %v5180_v46  ;;  %v8447_v32 = vld [vmem:[#allocation191_spill] sm:$0xff] }
 0x1c4   : > { %4524 = vmatprep.subr.bf16.mxu0 %v8428_v62  ;;  %4142 = vmatpush1.bf16.msra.mxu1 %v8429_v31  ;;  %v8439_v62 = vld [vmem:[#allocation186_spill] sm:$0xff]  ;;  %v8440_v31 = vld [vmem:[#allocation188_spill] sm:$0xff] }
 0x1c5   : > { %4144 = vmatprep.subr.bf16.mxu1 %v8430_v24  ;;  %v8441_v24 = vand.u32 4294901760, %v8211_v38  ;;  %v4155_v18 = vpack.c.bf16 %v8446_v61, %v8445_v16  ;;  %v8449_v38 = vand.u32 4294901760, %v5172_v39 }
 0x1c7   : > { %4526 = vmatpush1.bf16.msra.mxu0 %v8431_v57  ;;  %v8442_v57 = vand.u32 4294901760, %v8212_v36 }
 0x1c8   : > { %4528 = vmatprep.subr.bf16.mxu0 %v8432_v20  ;;  %4146 = vmatpush1.bf16.msra.mxu1 %v8433_v51  ;;  %v8443_v51 = vand.u32 4294901760, %v5163_v25  ;;  %v8451_v25 = vld [vmem:[#allocation17_spill] sm:$0xff] }
 0x1c9   : > { %4148 = vmatprep.subr.bf16.mxu1 %v8434_v59  ;;  %v4535_v20 = vpack.c.bf16 %v8442_v57, %v8441_v24  ;;  %v8444_v59 = vand.u32 4294901760, %v5166_v27  ;;  %v8450_v24 = vand.u32 4294901760, %v5174_v40  ;;  %v8452_v27 = vand.u32 4294901760, %v8451_v25 }
 0x1ca   : > { %v8463_v40 = vand.u32 4294901760, %v8349_v11 }
 0x1cb   : > { %4530 = vmatpush1.bf16.msra.mxu0 %v8438_v47  ;;  %v4153_v52 = vpack.c.bf16 %v8444_v59, %v8443_v51  ;;  %v4537_v36 = vpack.c.bf16 %v8450_v24, %v8449_v38  ;;  %v8453_v51 = vld [vmem:[#allocation18_spill] sm:$0xff]  ;;  %v8455_v59 = vld [vmem:[#allocation19_spill] sm:$0xff]  ;;  %v8467_v24 = vld [vmem:[#allocation24_spill] sm:$0xff] }
 0x1cc   : > { %4532 = vmatprep.subr.bf16.mxu0 %v8439_v62  ;;  %4150 = vmatpush1.bf16.msra.mxu1 %v8440_v31  ;;  %v8448_v31 = vand.u32 4294901760, %v8345_v19  ;;  %v8454_v57 = vand.u32 4294901760, %v8453_v51  ;;  %v8456_v46 = vand.u32 4294901760, %v8455_v59  ;;  %v8459_v19 = vld [vmem:[#allocation26_spill] sm:$0xff]  ;;  %v8468_v25 = vand.u32 4294901760, %v8467_v24  ;;  %v8487_v24 = vld [vmem:[#allocation36_spill] sm:$0xff] }
 0x1cd   : > { %4152 = vmatprep.subr.bf16.mxu1 %v4151_v5  ;;  %v8457_v5 = vld [vmem:[#allocation21_spill] sm:$0xff]  ;;  %v8469_v51 = vand.u32 4294901760, %v8352_v4  ;;  %v8482_v4 = vand.u32 4294901760, %v8356_v29 }
 0x1ce   : > { %v4539_v41 = vpack.c.bf16 %v8454_v57, %v8452_v27  ;;  %v8458_v16 = vand.u32 4294901760, %v8457_v5  ;;  %v8472_v57 = vld [vmem:[#allocation30_spill] sm:$0xff] }
 0x1cf   : > { %4534 = vmatpush1.bf16.msra.mxu0 %v8447_v32  ;;  %1458 = vmatmul.mubr.f32.vlgmr.msra.gmra.mrb[0].mxu1 %v8448_v31  ;;  %v8460_v31 = vand.u32 4294901760, %v8459_v19  ;;  %v8461_v32 = vld [vmem:[#allocation27_spill] sm:$0xff]  ;;  %v8473_v59 = vand.u32 4294901760, %v8472_v57  ;;  %v8478_v19 = vld [vmem:[#allocation38_spill] sm:$0xff] }
 0x1d0   : > { %4536 = vmatprep.subr.bf16.mxu0 %v4535_v20  ;;  %4154 = vmatpush1.bf16.msra.mxu1 %v4153_v52  ;;  %v4157_v61 = vpack.c.bf16 %v8458_v16, %v8456_v46  ;;  %v8462_v39 = vand.u32 4294901760, %v8461_v32  ;;  %v8464_v20 = vand.u32 4294901760, %v8350_v6  ;;  %v8465_v52 = vld [vmem:[#allocation22_spill] sm:$0xff]  ;;  %v8474_v46 = vld [vmem:[#allocation32_spill] sm:$0xff]  ;;  %v8476_v6 = vld [vmem:[#allocation33_spill] sm:$0xff] }
 0x1d1   : > { %4156 = vmatprep.subr.bf16.mxu1 %v4155_v18  ;;  %1466 = vmatprep.mubr.f32.mxu1 %v8463_v40  ;;  %v8466_v38 = vand.u32 4294901760, %v8465_v52  ;;  %v8470_v18 = vld [vmem:[#allocation29_spill] sm:$0xff]  ;;  %v8475_v5 = vand.u32 4294901760, %v8474_v46  ;;  %v8477_v16 = vand.u32 4294901760, %v8476_v6  ;;  %v8485_v52 = vld [vmem:[#allocation35_spill] sm:$0xff]  ;;  %v8498_v6 = vld [vmem:[#allocation50_spill] sm:$0xff] }
 0x1d2   : > { %v4159_v62 = vpack.c.bf16 %v8462_v39, %v8460_v31  ;;  %3176 = vmatmul.mubr.f32.vlgmr.msra.gmra.mrb[0].mxu0 %v8464_v20  ;;  %v8471_v32 = vand.u32 4294901760, %v8470_v18  ;;  %v8479_v31 = vand.u32 4294901760, %v8478_v19  ;;  %v8480_v39 = vld [vmem:[#allocation39_spill] sm:$0xff]  ;;  %v8490_v18 = vld [vmem:[#allocation41_spill] sm:$0xff] }
 0x1d3   : > { %4538 = vmatpush1.bf16.msra.mxu0 %v4537_v36  ;;  %v4541_v27 = vpack.c.bf16 %v8468_v25, %v8466_v38  ;;  %3184 = vmatprep.mubr.f32.mxu0 %v8469_v51  ;;  %v4161_v36 = vpack.c.bf16 %v8477_v16, %v8475_v5  ;;  %v8481_v40 = vand.u32 4294901760, %v8480_v39  ;;  %v8486_v38 = vand.u32 4294901760, %v8485_v52  ;;  %v8500_v19 = vld [vmem:[#allocation51_spill] sm:$0xff] }
 0x1d4   : > { %4540 = vmatprep.subr.bf16.mxu0 %v4539_v41  ;;  %4158 = vmatpush1.bf16.msra.mxu1 %v4157_v61  ;;  %v4543_v11 = vpack.c.bf16 %v8473_v59, %v8471_v32  ;;  %v8483_v41 = vand.u32 4294901760, %v8357_v9  ;;  %v8484_v61 = vand.u32 4294901760, %v8358_v50  ;;  %v8488_v25 = vand.u32 4294901760, %v8487_v24  ;;  %v8492_v32 = vld [vmem:[#allocation42_spill] sm:$0xff]  ;;  %v8494_v59 = vld [vmem:[#allocation43_spill] sm:$0xff]  ;;  %v8496_v50 = vld [vmem:[#allocation45_spill] sm:$0xff] }
 0x1d5   : > { %4160 = vmatprep.subr.bf16.mxu1 %v4159_v62  ;;  %v4163_v20 = vpack.c.bf16 %v8481_v40, %v8479_v31  ;;  %1470 = vmatmul.mubr.f32.gmra.mrb[2].mxu1 %v8482_v4  ;;  %v8489_v51 = vand.u32 4294901760, %v8360_v28  ;;  %v8491_v29 = vand.u32 4294901760, %v8490_v18  ;;  %v8493_v57 = vand.u32 4294901760, %v8492_v32  ;;  %v8505_v40 = vld [vmem:[#allocation47_spill] sm:$0xff]  ;;  %v8512_v24 = vld [vmem:[#allocation54_spill] sm:$0xff] }
 0x1d6   : > { %3188 = vmatmul.mubr.f32.gmra.mrb[2].mxu0 %v8483_v41  ;;  %1478 = vmatprep.mubr.f32.mxu1 %v8484_v61  ;;  %v4545_v62 = vpack.c.bf16 %v8488_v25, %v8486_v38  ;;  %v8495_v46 = vand.u32 4294901760, %v8494_v59  ;;  %v8497_v5 = vand.u32 4294901760, %v8496_v50  ;;  %v8499_v16 = vand.u32 4294901760, %v8498_v6  ;;  %v8507_v41 = vld [vmem:[#allocation48_spill] sm:$0xff]  ;;  %v8518_v32 = vld [vmem:[#allocation62_spill] sm:$0xff]  ;;  %v8520_v59 = vld [vmem:[#allocation63_spill] sm:$0xff] }
 0x1d7   : > { %4542 = vmatpush1.bf16.msra.mxu0 %v4541_v27  ;;  %3196 = vmatprep.mubr.f32.mxu0 %v8489_v51  ;;  %v4547_v9 = vpack.c.bf16 %v8493_v57, %v8491_v29  ;;  %v8501_v31 = vand.u32 4294901760, %v8500_v19  ;;  %v8502_v28 = vand.u32 4294901760, %v8364_v12  ;;  %v8506_v4 = vand.u32 4294901760, %v8505_v40  ;;  %v8510_v38 = vld [vmem:[#allocation52_spill] sm:$0xff] }
 0x1d8   : > { %4544 = vmatprep.subr.bf16.mxu0 %v4543_v11  ;;  %4162 = vmatpush1.bf16.msra.mxu1 %v4161_v36  ;;  %v4165_v27 = vpack.c.bf16 %v8497_v5, %v8495_v46  ;;  %v8503_v11 = vand.u32 4294901760, %v8365_v8  ;;  %v8504_v36 = vand.u32 4294901760, %v8366_v33  ;;  %v8508_v61 = vand.u32 4294901760, %v8507_v41  ;;  %v8514_v51 = vld [vmem:[#allocation56_spill] sm:$0xff]  ;;  %v8516_v33 = vld [vmem:[#allocation57_spill] sm:$0xff] }
 0x1d9   : > { %4164 = vmatprep.subr.bf16.mxu1 %v4163_v20  ;;  %v4167_v39 = vpack.c.bf16 %v8501_v31, %v8499_v16  ;;  %1482 = vmatmul.mubr.f32.gmra.mrb[4].mxu1 %v8502_v28  ;;  %v8509_v52 = vand.u32 4294901760, %v8368_v53  ;;  %v8511_v12 = vand.u32 4294901760, %v8510_v38  ;;  %v8513_v25 = vand.u32 4294901760, %v8512_v24  ;;  %v8527_v16 = vld [vmem:[#allocation60_spill] sm:$0xff]  ;;  %v8540_v38 = vld [vmem:[#allocation75_spill] sm:$0xff] }
 0x1da   : > { %3200 = vmatmul.mubr.f32.gmra.mrb[4].mxu0 %v8503_v11  ;;  %1490 = vmatprep.mubr.f32.mxu1 %v8504_v36  ;;  %v4549_v20 = vpack.c.bf16 %v8508_v61, %v8506_v4  ;;  %v8515_v18 = vand.u32 4294901760, %v8514_v51  ;;  %v8517_v29 = vand.u32 4294901760, %v8516_v33  ;;  %v8519_v57 = vand.u32 4294901760, %v8518_v32  ;;  %v8530_v28 = vld [vmem:[#allocation64_spill] sm:$0xff]  ;;  %v8532_v11 = vld [vmem:[#allocation66_spill] sm:$0xff]  ;;  %v8545_v51 = vld [vmem:[#allocation71_spill] sm:$0xff] }
 0x1db   : > { %4546 = vmatpush1.bf16.msra.mxu0 %v4545_v62  ;;  %3208 = vmatprep.mubr.f32.mxu0 %v8509_v52  ;;  %v4551_v8 = vpack.c.bf16 %v8513_v25, %v8511_v12  ;;  %v8521_v46 = vand.u32 4294901760, %v8520_v59  ;;  %v8522_v53 = vand.u32 4294901760, %v8372_v22  ;;  %v8524_v5 = vand.u32 4294901760, %v8374_v45  ;;  %v8534_v40 = vld [vmem:[#allocation68_spill] sm:$0xff]  ;;  %v8536_v45 = vld [vmem:[#allocation69_spill] sm:$0xff]  ;;  %v8552_v59 = vld [vmem:[#allocation78_spill] sm:$0xff] }
 0x1dc   : > { %4548 = vmatprep.subr.bf16.mxu0 %v4547_v9  ;;  %4166 = vmatpush1.bf16.msra.mxu1 %v4165_v27  ;;  %v4169_v62 = vpack.c.bf16 %v8517_v29, %v8515_v18  ;;  %v8523_v9 = vand.u32 4294901760, %v8373_v2  ;;  %v8525_v27 = vld [vmem:[#allocation59_spill] sm:$0xff]  ;;  %v8528_v19 = vand.u32 4294901760, %v8527_v16  ;;  %v8531_v22 = vand.u32 4294901760, %v8530_v28  ;;  %v8547_v33 = vld [vmem:[#allocation72_spill] sm:$0xff] }
 0x1dd   : > { %4168 = vmatprep.subr.bf16.mxu1 %v4167_v39  ;;  %v4171_v50 = vpack.c.bf16 %v8521_v46, %v8519_v57  ;;  %1494 = vmatmul.mubr.f32.gmra.mrb[6].mxu1 %v8522_v53  ;;  %v8526_v6 = vand.u32 4294901760, %v8525_v27  ;;  %v8529_v39 = vand.u32 4294901760, %v8376_v60  ;;  %v8533_v36 = vand.u32 4294901760, %v8532_v11  ;;  %v8550_v57 = vld [vmem:[#allocation76_spill] sm:$0xff]  ;;  %v8558_v27 = vld [vmem:[#allocation86_spill] sm:$0xff]  ;;  %v8560_v16 = vld [vmem:[#allocation87_spill] sm:$0xff] }
 0x1de   : > { %3212 = vmatmul.mubr.f32.gmra.mrb[6].mxu0 %v8523_v9  ;;  %1502 = vmatprep.mubr.f32.mxu1 %v8524_v5  ;;  %v8535_v4 = vand.u32 4294901760, %v8534_v40  ;;  %v8537_v41 = vand.u32 4294901760, %v8536_v45  ;;  %v8541_v12 = vand.u32 4294901760, %v8540_v38  ;;  %v8542_v60 = vand.u32 4294901760, %v8380_v35  ;;  %v8570_v45 = vld [vmem:[#allocation88_spill] sm:$0xff] }
 0x1df   : > { %4550 = vmatpush1.bf16.msra.mxu0 %v4549_v20  ;;  %v4553_v31 = vpack.c.bf16 %v8528_v19, %v8526_v6  ;;  %3220 = vmatprep.mubr.f32.mxu0 %v8529_v39  ;;  %v4555_v2 = vpack.c.bf16 %v8533_v36, %v8531_v22  ;;  %v8538_v20 = vld [vmem:[#allocation74_spill] sm:$0xff]  ;;  %v8543_v25 = vand.u32 4294901760, %v8381_v48  ;;  %v8546_v18 = vand.u32 4294901760, %v8545_v51  ;;  %v8565_v22 = vld [vmem:[#allocation83_spill] sm:$0xff]  ;;  %v8567_v36 = vld [vmem:[#allocation84_spill] sm:$0xff] }
 0x1e0   : > { %4552 = vmatprep.subr.bf16.mxu0 %v4551_v8  ;;  %4170 = vmatpush1.bf16.msra.mxu1 %v4169_v62  ;;  %v4173_v61 = vpack.c.bf16 %v8537_v41, %v8535_v4  ;;  %v8539_v52 = vand.u32 4294901760, %v8538_v20  ;;  %v8544_v8 = vand.u32 4294901760, %v8382_v56  ;;  %v8548_v29 = vand.u32 4294901760, %v8547_v33  ;;  %v8556_v56 = vld [vmem:[#allocation81_spill] sm:$0xff]  ;;  %v8572_v41 = vld [vmem:[#allocation90_spill] sm:$0xff]  ;;  %v8574_v20 = vld [vmem:[#allocation92_spill] sm:$0xff] }
 0x1e1   : > { %4172 = vmatprep.subr.bf16.mxu1 %v4171_v50  ;;  %1506 = vmatmul.mubr.f32.gmra.mrb[8].mxu1 %v8542_v60  ;;  %v8549_v32 = vand.u32 4294901760, %v8384_v55  ;;  %v8551_v35 = vand.u32 4294901760, %v8550_v57  ;;  %v8553_v46 = vand.u32 4294901760, %v8552_v59  ;;  %v8554_v50 = vld [vmem:[#allocation80_spill] sm:$0xff]  ;;  %v8557_v9 = vand.u32 4294901760, %v8556_v56 }
 0x1e2   : > { %v4175_v24 = vpack.c.bf16 %v8541_v12, %v8539_v52  ;;  %3224 = vmatmul.mubr.f32.gmra.mrb[8].mxu0 %v8543_v25  ;;  %1514 = vmatprep.mubr.f32.mxu1 %v8544_v8  ;;  %v4557_v62 = vpack.c.bf16 %v8548_v29, %v8546_v18  ;;  %v8555_v53 = vand.u32 4294901760, %v8554_v50  ;;  %v8559_v6 = vand.u32 4294901760, %v8558_v27  ;;  %v8580_v25 = vld [vmem:[#allocation99_spill] sm:$0xff]  ;;  %v8598_v27 = vld [vmem:[#allocation110_spill] sm:$0xff] }
 0x1e3   : > { %4554 = vmatpush1.bf16.msra.mxu0 %v4553_v31  ;;  %3232 = vmatprep.mubr.f32.mxu0 %v8549_v32  ;;  %v4559_v48 = vpack.c.bf16 %v8553_v46, %v8551_v35  ;;  %v8561_v19 = vand.u32 4294901760, %v8560_v16  ;;  %v8562_v55 = vand.u32 4294901760, %v8388_v49  ;;  %v8563_v39 = vand.u32 4294901760, %v8389_v43  ;;  %v8585_v29 = vld [vmem:[#allocation95_spill] sm:$0xff]  ;;  %v8587_v32 = vld [vmem:[#allocation96_spill] sm:$0xff] }
 0x1e4   : > { %4556 = vmatprep.subr.bf16.mxu0 %v4555_v2  ;;  %4174 = vmatpush1.bf16.msra.mxu1 %v4173_v61  ;;  %v4177_v5 = vpack.c.bf16 %v8557_v9, %v8555_v53  ;;  %v8564_v28 = vand.u32 4294901760, %v8390_v1  ;;  %v8566_v11 = vand.u32 4294901760, %v8565_v22  ;;  %v8568_v2 = vand.u32 4294901760, %v8567_v36  ;;  %v8576_v1 = vld [vmem:[#allocation93_spill] sm:$0xff]  ;;  %v8590_v46 = vld [vmem:[#allocation100_spill] sm:$0xff]  ;;  %v8600_v16 = vld [vmem:[#allocation111_spill] sm:$0xff] }
 0x1e5   : > { %4176 = vmatprep.subr.bf16.mxu1 %v4175_v24  ;;  %v4179_v31 = vpack.c.bf16 %v8561_v19, %v8559_v6  ;;  %1518 = vmatmul.mubr.f32.gmra.mrb[10].mxu1 %v8562_v55  ;;  %v8569_v4 = vand.u32 4294901760, %v8392_v15  ;;  %v8571_v49 = vand.u32 4294901760, %v8570_v45  ;;  %v8573_v61 = vand.u32 4294901760, %v8572_v41  ;;  %v8578_v24 = vld [vmem:[#allocation98_spill] sm:$0xff]  ;;  %v8594_v53 = vld [vmem:[#allocation104_spill] sm:$0xff] }
 0x1e6   : > { %3236 = vmatmul.mubr.f32.gmra.mrb[10].mxu0 %v8563_v39  ;;  %1526 = vmatprep.mubr.f32.mxu1 %v8564_v28  ;;  %v4561_v40 = vpack.c.bf16 %v8568_v2, %v8566_v11  ;;  %v8575_v52 = vand.u32 4294901760, %v8574_v20  ;;  %v8577_v38 = vand.u32 4294901760, %v8576_v1  ;;  %v8579_v60 = vand.u32 4294901760, %v8578_v24  ;;  %v8604_v39 = vld [vmem:[#allocation185_spill] sm:$0xff]  ;;  %v8605_v28 = vld [vmem:[#allocation107_spill] sm:$0xff]  ;;  %v8607_v11 = vld [vmem:[#allocation108_spill] sm:$0xff] }
 0x1e7   : > { %4558 = vmatpush1.bf16.msra.mxu0 %v4557_v62  ;;  %3244 = vmatprep.mubr.f32.mxu0 %v8569_v4  ;;  %v4563_v43 = vpack.c.bf16 %v8573_v61, %v8571_v49  ;;  %v8581_v8 = vand.u32 4294901760, %v8580_v25  ;;  %v8582_v15 = vand.u32 4294901760, %v8396_v37  ;;  %v8583_v18 = vand.u32 4294901760, %v8397_v21  ;;  %v8610_v4 = vld [vmem:[#allocation112_spill] sm:$0xff]  ;;  %v8612_v49 = vld [vmem:[#allocation114_spill] sm:$0xff]  ;;  %v8622_v25 = vld [vmem:[#allocation119_spill] sm:$0xff] }
 0x1e8   : > { %4560 = vmatprep.subr.bf16.mxu0 %v4559_v48  ;;  %4178 = vmatpush1.bf16.msra.mxu1 %v4177_v5  ;;  %v4181_v12 = vpack.c.bf16 %v8577_v38, %v8575_v52  ;;  %v8584_v33 = vand.u32 4294901760, %v8398_v34  ;;  %v8586_v62 = vand.u32 4294901760, %v8585_v29  ;;  %v8588_v57 = vand.u32 4294901760, %v8587_v32  ;;  %v8592_v48 = vld [vmem:[#allocation102_spill] sm:$0xff]  ;;  %v8596_v34 = vld [vmem:[#allocation105_spill] sm:$0xff]  ;;  %v8614_v61 = vld [vmem:[#allocation116_spill] sm:$0xff] }
 0x1e9   : > { %4180 = vmatprep.subr.bf16.mxu1 %v4179_v31  ;;  %v4183_v51 = vpack.c.bf16 %v8581_v8, %v8579_v60  ;;  %1530 = vmatmul.mubr.f32.gmra.mrb[12].mxu1 %v8582_v15  ;;  %v8589_v59 = vand.u32 4294901760, %v8400_v7  ;;  %v8591_v37 = vand.u32 4294901760, %v8590_v46  ;;  %v8593_v50 = vand.u32 4294901760, %v8592_v48  ;;  %v8618_v1 = vld [vmem:[#allocation122_spill] sm:$0xff] }
 0x1ea   : > { %3248 = vmatmul.mubr.f32.gmra.mrb[12].mxu0 %v8583_v18  ;;  %1538 = vmatprep.mubr.f32.mxu1 %v8584_v33  ;;  %v4565_v35 = vpack.c.bf16 %v8588_v57, %v8586_v62  ;;  %v8595_v56 = vand.u32 4294901760, %v8594_v53  ;;  %v8597_v9 = vand.u32 4294901760, %v8596_v34  ;;  %v8599_v6 = vand.u32 4294901760, %v8598_v27  ;;  %v8627_v29 = vld [vmem:[#allocation126_spill] sm:$0xff] }
 0x1eb   : > { %4562 = vmatpush1.bf16.msra.mxu0 %v4561_v40  ;;  %3256 = vmatprep.mubr.f32.mxu0 %v8589_v59  ;;  %v4567_v21 = vpack.c.bf16 %v8593_v50, %v8591_v37  ;;  %v8601_v19 = vand.u32 4294901760, %v8600_v16  ;;  %v8602_v7 = vand.u32 4294901760, %v8404_v63  ;;  %v8603_v55 = vand.u32 4294901760, %v6414_v0  ;;  %v8609_v40 = vld [vmem:[#allocation195_spill] sm:$0xff]  ;;  %v8644_v16 = vld [vmem:[#allocation144_spill] sm:$0xff] }
 0x1ec   : > { %4564 = vmatprep.subr.bf16.mxu0 %v4563_v43  ;;  %4182 = vmatpush1.bf16.msra.mxu1 %v4181_v12  ;;  %v4185_v5 = vpack.c.bf16 %v8597_v9, %v8595_v56  ;;  %v8606_v22 = vand.u32 4294901760, %v8605_v28  ;;  %v8608_v36 = vand.u32 4294901760, %v8607_v11  ;;  %v8611_v45 = vand.u32 4294901760, %v8610_v4  ;;  %v8616_v43 = vld [vmem:[#allocation117_spill] sm:$0xff]  ;;  %v8620_v12 = vld [vmem:[#allocation123_spill] sm:$0xff] }
 0x1ed   : > { %4184 = vmatprep.subr.bf16.mxu1 %v4183_v51  ;;  %v4187_v31 = vpack.c.bf16 %v8601_v19, %v8599_v6  ;;  %1542 = vmatmul.mubr.f32.gmra.mrb[14].mxu1 %v8602_v7  ;;  %v8613_v63 = vand.u32 4294901760, %v8612_v49  ;;  %v8615_v0 = vand.u32 4294901760, %v8614_v61  ;;  %v8617_v20 = vand.u32 4294901760, %v8616_v43  ;;  %v8624_v51 = vld [vmem:[#allocation120_spill] sm:$0xff]  ;;  %v8658_v49 = vld [vmem:[#allocation155_spill] sm:$0xff] }
 0x1ee   : > { %3260 = vmatmul.mubr.f32.gmra.mrb[14].mxu0 %v8603_v55  ;;  %1805 = vmatprep.mubr.f32.mxu1 %v8604_v39  ;;  %v4569_v2 = vpack.c.bf16 %v8608_v36, %v8606_v22  ;;  %v8619_v38 = vand.u32 4294901760, %v8618_v1  ;;  %v8621_v24 = vand.u32 4294901760, %v8620_v12  ;;  %v8623_v8 = vand.u32 4294901760, %v8622_v25  ;;  %v8650_v55 = vld [vmem:[#allocation152_spill] sm:$0xff]  ;;  %v8652_v22 = vld [vmem:[#allocation153_spill] sm:$0xff] }
 0x1ef   : > { %4566 = vmatpush1.bf16.msra.mxu0 %v4565_v35  ;;  %3523 = vmatprep.mubr.f32.mxu0 %v8609_v40  ;;  %v4571_v41 = vpack.c.bf16 %v8613_v63, %v8611_v45  ;;  %v4189_v52 = vpack.c.bf16 %v8617_v20, %v8615_v0  ;;  %v8625_v15 = vand.u32 4294901760, %v8624_v51  ;;  %v8626_v33 = vand.u32 4294901760, %v8314_v54  ;;  %v8630_v35 = vld [vmem:[#allocation129_spill] sm:$0xff]  ;;  %v8662_v43 = vld [vmem:[#allocation160_spill] sm:$0xff]  ;;  %v8670_v51 = vld [vmem:[#allocation170_spill] sm:$0xff] }
 0x1f0   : > { %4568 = vmatprep.subr.bf16.mxu0 %v4567_v21  ;;  %4186 = vmatpush1.bf16.msra.mxu1 %v4185_v5  ;;  %v4191_v60 = vpack.c.bf16 %v8621_v24, %v8619_v38  ;;  %v8628_v62 = vand.u32 4294901760, %v8627_v29  ;;  %v8629_v57 = vand.u32 4294901760, %v8316_v17  ;;  %v8631_v59 = vand.u32 4294901760, %v8630_v35  ;;  %v8666_v12 = vld [vmem:[#allocation164_spill] sm:$0xff] }
 0x1f1   : > { %4188 = vmatprep.subr.bf16.mxu1 %v4187_v31  ;;  %v4573_v18 = vpack.c.bf16 %v8625_v15, %v8623_v8  ;;  %v8632_v37 = vand.u32 4294901760, %v8318_v14  ;;  %v8633_v48 = vand.u32 4294901760, %v8319_v26  ;;  %v8634_v21 = vand.u32 4294901760, %v8320_v13 }
 0x1f2   : > { %v4575_v32 = vpack.c.bf16 %v8628_v62, %v8626_v33  ;;  %v4193_v46 = vpack.c.bf16 %v8631_v59, %v8629_v57  ;;  %v8635_v53 = vand.u32 4294901760, %v8321_v42  ;;  %v8636_v56 = vand.u32 4294901760, %v8322_v10  ;;  %v8642_v42 = vld [vmem:[#allocation143_spill] sm:$0xff]  ;;  %v8676_v57 = vld [vmem:[#allocation168_spill] sm:$0xff] }
 0x1f3   : > { %4570 = vmatpush1.bf16.msra.mxu0 %v4569_v2  ;;  %v4195_v50 = vpack.c.bf16 %v8633_v48, %v8632_v37  ;;  %v8637_v17 = vand.u32 4294901760, %v8323_v30  ;;  %v8638_v9 = vand.u32 4294901760, %v8324_v3  ;;  %v8639_v14 = vand.u32 4294901760, %v8325_v44  ;;  %v8646_v30 = vld [vmem:[#allocation148_spill] sm:$0xff]  ;;  %v8648_v3 = vld [vmem:[#allocation150_spill] sm:$0xff]  ;;  %v8656_v2 = vld [vmem:[#allocation159_spill] sm:$0xff] }
 0x1f4   : > { %4572 = vmatprep.subr.bf16.mxu0 %v4571_v41  ;;  %4190 = vmatpush1.bf16.msra.mxu1 %v4189_v52  ;;  %v4577_v54 = vpack.c.bf16 %v8635_v53, %v8634_v21  ;;  %v8640_v26 = vand.u32 4294901760, %v8226_v23  ;;  %v8641_v13 = vand.u32 4294901760, %v8227_v58  ;;  %v8643_v6 = vand.u32 4294901760, %v8642_v42  ;;  %v8654_v58 = vld [vmem:[#allocation158_spill] sm:$0xff]  ;;  %v8660_v41 = vld [vmem:[#allocation156_spill] sm:$0xff]  ;;  %v8674_v62 = vld [vmem:[#allocation167_spill] sm:$0xff] }
 0x1f5   : > { %4192 = vmatprep.subr.bf16.mxu1 %v4191_v60  ;;  %v4579_v34 = vpack.c.bf16 %v8637_v17, %v8636_v56  ;;  %v4197_v5 = vpack.c.bf16 %v8639_v14, %v8638_v9  ;;  %v8645_v19 = vand.u32 4294901760, %v8644_v16  ;;  %v8647_v31 = vand.u32 4294901760, %v8646_v30  ;;  %v8664_v52 = vld [vmem:[#allocation162_spill] sm:$0xff]  ;;  %v8668_v60 = vld [vmem:[#allocation165_spill] sm:$0xff]  ;;  %v8682_v53 = vld [vmem:[#allocation176_spill] sm:$0xff] }
 0x1f6   : > { %v4199_v27 = vpack.c.bf16 %v8641_v13, %v8640_v26  ;;  %v8649_v7 = vand.u32 4294901760, %v8648_v3  ;;  %v8651_v28 = vand.u32 4294901760, %v8650_v55  ;;  %v8653_v23 = vand.u32 4294901760, %v8652_v22  ;;  %v8680_v48 = vld [vmem:[#allocation174_spill] sm:$0xff]  ;;  %v8684_v56 = vld [vmem:[#allocation177_spill] sm:$0xff] }
 0x1f7   : > { %4574 = vmatpush1.bf16.msra.mxu0 %v4573_v18  ;;  %v4581_v10 = vpack.c.bf16 %v8645_v19, %v8643_v6  ;;  %v8655_v36 = vand.u32 4294901760, %v8654_v58  ;;  %v8657_v4 = vand.u32 4294901760, %v8656_v2  ;;  %v8659_v63 = vand.u32 4294901760, %v8658_v49  ;;  %v8672_v18 = vld [vmem:[#allocation171_spill] sm:$0xff]  ;;  %v8686_v9 = vld [vmem:[#allocation182_spill] sm:$0xff]  ;;  %v8692_v6 = vld [vmem:[#allocation180_spill] sm:$0xff] }
 0x1f8   : > { %4576 = vmatprep.subr.bf16.mxu0 %v4575_v32  ;;  %4194 = vmatpush1.bf16.msra.mxu1 %v4193_v46  ;;  %v4583_v44 = vpack.c.bf16 %v8649_v7, %v8647_v31  ;;  %v4201_v11 = vpack.c.bf16 %v8653_v23, %v8651_v28  ;;  %v8661_v61 = vand.u32 4294901760, %v8660_v41  ;;  %v8663_v20 = vand.u32 4294901760, %v8662_v43  ;;  %v8678_v46 = vld [vmem:[#allocation172_spill] sm:$0xff]  ;;  %v8696_v31 = vld [vmem:[#allocation187_spill] sm:$0xff]  ;;  %v8700_v28 = vld [vmem:[#allocation190_spill] sm:$0xff] }
 0x1f9   : > { %4196 = vmatprep.subr.bf16.mxu1 %v4195_v50  ;;  %v4203_v45 = vpack.c.bf16 %v8657_v4, %v8655_v36  ;;  %v8665_v1 = vand.u32 4294901760, %v8664_v52  ;;  %v8667_v24 = vand.u32 4294901760, %v8666_v12  ;;  %v8669_v25 = vand.u32 4294901760, %v8668_v60  ;;  %v8704_v36 = vld [vmem:[#allocation193_spill] sm:$0xff]  ;;  %v8707_v49 = vld [vmem:[#allocation196_spill] sm:$0xff]  ;;  %v8712_v43 = vld [vmem:[#allocation199_spill] sm:$0xff] }
 0x1fa   : > { %v4585_v0 = vpack.c.bf16 %v8661_v61, %v8659_v63  ;;  %v8671_v15 = vand.u32 4294901760, %v8670_v51  ;;  %v8673_v33 = vand.u32 4294901760, %v8672_v18  ;;  %v8675_v32 = vand.u32 4294901760, %v8674_v62  ;;  %v8708_v63 = vld [vmem:[#allocation11_spill] sm:$0xff]  ;;  %v8709_v41 = vld [vmem:[#allocation13_spill] sm:$0xff] }
 0x1fb   : > { %4578 = vmatpush1.bf16.msra.mxu0 %v4577_v54  ;;  %v4587_v38 = vpack.c.bf16 %v8665_v1, %v8663_v20  ;;  %v4205_v8 = vpack.c.bf16 %v8669_v25, %v8667_v24  ;;  %v8677_v35 = vand.u32 4294901760, %v8676_v57  ;;  %v8679_v37 = vand.u32 4294901760, %v8678_v46  ;;  %v8710_v61 = vld [vmem:[#allocation15_spill] sm:$0xff]  ;;  %v8713_v20 = vld [vmem:[#allocation14_spill] sm:$0xff]  ;;  %v8715_v1 = vld [vmem:[#allocation16_spill] sm:$0xff] }
 0x1fc   : > { %4580 = vmatprep.subr.bf16.mxu0 %v4579_v34  ;;  %4198 = vmatpush1.bf16.msra.mxu1 %v4197_v5  ;;  %v4207_v29 = vpack.c.bf16 %v8673_v33, %v8671_v15  ;;  %v8681_v50 = vand.u32 4294901760, %v8680_v48  ;;  %v8683_v54 = vand.u32 4294901760, %v8682_v53  ;;  %v8685_v17 = vand.u32 4294901760, %v8684_v56  ;;  %v8688_v5 = vld [vmem:[#allocation183_spill] sm:$0xff]  ;;  %v8717_v12 = vld [vmem:[#allocation25_spill] sm:$0xff]  ;;  %v8723_v15 = vld [vmem:[#allocation28_spill] sm:$0xff] }
 0x1fd   : > { %4200 = vmatprep.subr.bf16.mxu1 %v4199_v27  ;;  %v4589_v59 = vpack.c.bf16 %v8677_v35, %v8675_v32  ;;  %v8687_v14 = vand.u32 4294901760, %v8686_v9  ;;  %v8689_v26 = vand.u32 4294901760, %v8688_v5  ;;  %v8690_v27 = vld [vmem:[#allocation179_spill] sm:$0xff]  ;;  %v8693_v16 = vand.u32 4294901760, %v8692_v6  ;;  %v8718_v24 = vld [vmem:[#allocation205_spill] sm:$0xff]  ;;  %v8729_v57 = vld [vmem:[#allocation34_spill] sm:$0xff] }
 0x1fe   : > { %v4591_v21 = vpack.c.bf16 %v8681_v50, %v8679_v37  ;;  %v4209_v34 = vpack.c.bf16 %v8685_v17, %v8683_v54  ;;  %v8691_v42 = vand.u32 4294901760, %v8690_v27  ;;  %v8697_v3 = vand.u32 4294901760, %v8696_v31  ;;  %v8714_v52 = vld [vmem:[#allocation203_spill] sm:$0xff]  ;;  %v8720_v25 = vld [vmem:[#allocation209_spill] sm:$0xff]  ;;  %v8732_v46 = vld [vmem:[#allocation44_spill] sm:$0xff] }
 0x1ff   : > { %4582 = vmatpush1.bf16.msra.mxu0 %v4581_v10  ;;  %v4211_v13 = vpack.c.bf16 %v8689_v26, %v8687_v14  ;;  %v8694_v10 = vld [vmem:[#allocation184_spill] sm:$0xff]  ;;  %v8701_v22 = vand.u32 4294901760, %v8700_v28  ;;  %v8705_v2 = vand.u32 4294901760, %v8704_v36  ;;  %v8719_v60 = vld [vmem:[#allocation207_spill] sm:$0xff]  ;;  %v8725_v33 = vld [vmem:[#allocation37_spill] sm:$0xff] }
 0x200   : > { %4584 = vmatprep.subr.bf16.mxu0 %v4583_v44  ;;  %4202 = vmatpush1.bf16.msra.mxu1 %v4201_v11  ;;  %v4593_v19 = vpack.c.bf16 %v8693_v16, %v8691_v42  ;;  %v8695_v30 = vand.u32 4294901760, %v8694_v10  ;;  %v8698_v44 = vld [vmem:[#allocation189_spill] sm:$0xff]  ;;  %v8702_v11 = vld [vmem:[#allocation192_spill] sm:$0xff]  ;;  %v8722_v51 = vld [vmem:[#allocation211_spill] sm:$0xff] }
 0x201   : > { %4204 = vmatprep.subr.bf16.mxu1 %v4203_v45  ;;  %v8699_v55 = vand.u32 4294901760, %v8698_v44  ;;  %v8703_v58 = vand.u32 4294901760, %v8702_v11  ;;  %v8706_v45 = vld [vmem:[#allocation8_spill] sm:$0xff]  ;;  %v8724_v18 = vld [vmem:[#allocation31_spill] sm:$0xff]  ;;  %v8728_v32 = vld [vmem:[#allocation217_spill] sm:$0xff] }
 0x202   : > { %v4595_v7 = vpack.c.bf16 %v8697_v3, %v8695_v30  ;;  %v8727_v62 = vld [vmem:[#allocation215_spill] sm:$0xff]  ;;  %v8733_v37 = vld [vmem:[#allocation49_spill] sm:$0xff]  ;;  %v8737_v53 = vld [vmem:[#allocation46_spill] sm:$0xff] }
 0x203   : > { %4586 = vmatpush1.bf16.msra.mxu0 %v4585_v0  ;;  %v4213_v23 = vpack.c.bf16 %v8701_v22, %v8699_v55  ;;  %v4597_v4 = vpack.c.bf16 %v8705_v2, %v8703_v58  ;;  %v8711_v0 = vld [vmem:[#allocation201_spill] sm:$0xff]  ;;  %v8730_v35 = vld [vmem:[#allocation219_spill] sm:$0xff]  ;;  %v8745_v26 = vld [vmem:[#allocation58_spill] sm:$0xff] }
 0x204   : > { %4588 = vmatprep.subr.bf16.mxu0 %v4587_v38  ;;  %4206 = vmatpush1.bf16.msra.mxu1 %v4205_v8  ;;  %v8716_v38 = vld [vmem:[#allocation20_spill] sm:$0xff]  ;;  %v8721_v8 = vld [vmem:[#allocation23_spill] sm:$0xff]  ;;  %v8734_v48 = vld [vmem:[#allocation221_spill] sm:$0xff] }
 0x205   : > { %4208 = vmatprep.subr.bf16.mxu1 %v4207_v29  ;;  %v8726_v29 = vld [vmem:[#allocation213_spill] sm:$0xff]  ;;  %v8735_v50 = vld [vmem:[#allocation223_spill] sm:$0xff]  ;;  %v8753_v30 = vld [vmem:[#allocation70_spill] sm:$0xff] }
 0x206   : > { %v8738_v54 = vld [vmem:[#allocation227_spill] sm:$0xff]  ;;  %v8739_v56 = vld [vmem:[#allocation53_spill] sm:$0xff] }
 0x207   : > { %4590 = vmatpush1.bf16.msra.mxu0 %v4589_v59  ;;  %v8731_v59 = vld [vmem:[#allocation40_spill] sm:$0xff]  ;;  %v8740_v17 = vld [vmem:[#allocation55_spill] sm:$0xff]  ;;  %v8742_v9 = vld [vmem:[#allocation229_spill] sm:$0xff] }
 0x208   : > { %4592 = vmatprep.subr.bf16.mxu0 %v4591_v21  ;;  %4210 = vmatpush1.bf16.msra.mxu1 %v4209_v34  ;;  %v8736_v21 = vld [vmem:[#allocation225_spill] sm:$0xff]  ;;  %v8743_v14 = vld [vmem:[#allocation231_spill] sm:$0xff] }
 0x209   : > { %4212 = vmatprep.subr.bf16.mxu1 %v4211_v13  ;;  %v8741_v34 = vld [vmem:[#allocation61_spill] sm:$0xff]  ;;  %v8746_v13 = vld [vmem:[#allocation235_spill] sm:$0xff] }
 0x20a   : > { %v8744_v5 = vld [vmem:[#allocation233_spill] sm:$0xff]  ;;  %v8748_v42 = vld [vmem:[#allocation67_spill] sm:$0xff] }
 0x20b   : > { %4594 = vmatpush1.bf16.msra.mxu0 %v4593_v19  ;;  %v8747_v27 = vld [vmem:[#allocation65_spill] sm:$0xff]  ;;  %v8751_v19 = vld [vmem:[#allocation239_spill] sm:$0xff] }
 0x20c   : > { %4596 = vmatprep.subr.bf16.mxu0 %v4595_v7  ;;  %4214 = vmatpush1.bf16.msra.mxu1 %v4213_v23  ;;  %v8749_v6 = vld [vmem:[#allocation73_spill] sm:$0xff]  ;;  %v8754_v31 = vld [vmem:[#allocation243_spill] sm:$0xff]  ;;  %v8761_v23 = vld [vmem:[#allocation82_spill] sm:$0xff] }
 0x20d   : > { %4216 = vmatprep.subr.bf16.mxu1 %v8706_v45  ;;  %v8750_v16 = vld [vmem:[#allocation237_spill] sm:$0xff]  ;;  %v8756_v7 = vld [vmem:[#allocation79_spill] sm:$0xff] }
 0x20e   : > { %v8752_v10 = vld [vmem:[#allocation241_spill] sm:$0xff]  ;;  %v8759_v28 = vld [vmem:[#allocation247_spill] sm:$0xff] }
 0x20f   : > { %4598 = vmatpush1.bf16.msra.mxu0 %v4597_v4  ;;  %1807 = vmatmul.mubr.f32.vlgmr.msra.gmra.mrb[0].mxu1 %v8707_v49  ;;  %v8755_v3 = vld [vmem:[#allocation77_spill] sm:$0xff]  ;;  %v8762_v11 = vld [vmem:[#allocation251_spill] sm:$0xff] }
 0x210   : > { %4600 = vmatprep.subr.bf16.mxu0 %v8708_v63  ;;  %4218 = vmatpush1.bf16.msra.mxu1 %v8709_v41  ;;  %v8757_v44 = vld [vmem:[#allocation85_spill] sm:$0xff]  ;;  %v8764_v36 = vld [vmem:[#allocation91_spill] sm:$0xff]  ;;  %v8768_v63 = vld [vmem:[#allocation94_spill] sm:$0xff] }
 0x211   : > { %4220 = vmatprep.subr.bf16.mxu1 %v8710_v61  ;;  %1813 = vmatprep.mubr.f32.mxu1 %v8711_v0  ;;  %v8758_v55 = vld [vmem:[#allocation245_spill] sm:$0xff]  ;;  %v8767_v45 = vld [vmem:[#allocation255_spill] sm:$0xff] }
 0x212   : > { %3525 = vmatmul.mubr.f32.vlgmr.msra.gmra.mrb[0].mxu0 %v8712_v43  ;;  %v8760_v22 = vld [vmem:[#allocation249_spill] sm:$0xff]  ;;  %v8770_v61 = vld [vmem:[#allocation103_spill] sm:$0xff] }
 0x213   : > { %4602 = vmatpush1.bf16.msra.mxu0 %v8713_v20  ;;  %3531 = vmatprep.mubr.f32.mxu0 %v8714_v52  ;;  %v8763_v58 = vld [vmem:[#allocation89_spill] sm:$0xff] }
 0x214   : > { %4604 = vmatprep.subr.bf16.mxu0 %v8715_v1  ;;  %4222 = vmatpush1.bf16.msra.mxu1 %v8716_v38  ;;  %v8765_v2 = vld [vmem:[#allocation97_spill] sm:$0xff]  ;;  %v8772_v1 = vld [vmem:[#allocation106_spill] sm:$0xff] }
 0x215   : > { %4224 = vmatprep.subr.bf16.mxu1 %v8717_v12  ;;  %1815 = vmatmul.mubr.f32.gmra.mrb[2].mxu1 %v8718_v24  ;;  %v8766_v4 = vld [vmem:[#allocation253_spill] sm:$0xff]  ;;  %v8774_v12 = vld [vmem:[#allocation115_spill] sm:$0xff] }
 0x216   : > { %3533 = vmatmul.mubr.f32.gmra.mrb[2].mxu0 %v8719_v60  ;;  %1821 = vmatprep.mubr.f32.mxu1 %v8720_v25  ;;  %v8769_v41 = vld [vmem:[#allocation101_spill] sm:$0xff] }
 0x217   : > { %4606 = vmatpush1.bf16.msra.mxu0 %v8721_v8  ;;  %3539 = vmatprep.mubr.f32.mxu0 %v8722_v51  ;;  %v8771_v20 = vld [vmem:[#allocation109_spill] sm:$0xff] }
 0x218   : > { %4608 = vmatprep.subr.bf16.mxu0 %v8723_v15  ;;  %4226 = vmatpush1.bf16.msra.mxu1 %v8724_v18  ;;  %v8773_v38 = vld [vmem:[#allocation113_spill] sm:$0xff]  ;;  %v8776_v15 = vld [vmem:[#allocation118_spill] sm:$0xff]  ;;  %v8778_v18 = vld [vmem:[#allocation127_spill] sm:$0xff] }
 0x219   : > { %4228 = vmatprep.subr.bf16.mxu1 %v8725_v33  ;;  %1823 = vmatmul.mubr.f32.gmra.mrb[4].mxu1 %v8726_v29  ;;  %v8775_v8 = vld [vmem:[#allocation121_spill] sm:$0xff]  ;;  %v8780_v33 = vld [vmem:[#allocation130_spill] sm:$0xff] }
 0x21a   : > { %3541 = vmatmul.mubr.f32.gmra.mrb[4].mxu0 %v8727_v62  ;;  %1829 = vmatprep.mubr.f32.mxu1 %v8728_v32 }
 0x21b   : > { %4610 = vmatpush1.bf16.msra.mxu0 %v8729_v57  ;;  %3547 = vmatprep.mubr.f32.mxu0 %v8730_v35  ;;  %v8781_v57 = vld [vmem:[#allocation137_spill] sm:$0xff] }
 0x21c   : > { %4612 = vmatprep.subr.bf16.mxu0 %v8731_v59  ;;  %4230 = vmatpush1.bf16.msra.mxu1 %v8732_v46  ;;  %v8782_v59 = vld [vmem:[#allocation139_spill] sm:$0xff]  ;;  %v8783_v46 = vld [vmem:[#allocation145_spill] sm:$0xff] }
 0x21d   : > { %4232 = vmatprep.subr.bf16.mxu1 %v8733_v37  ;;  %1831 = vmatmul.mubr.f32.gmra.mrb[6].mxu1 %v8734_v48  ;;  %v8784_v37 = vld [vmem:[#allocation142_spill] sm:$0xff] }
 0x21e   : > { %3549 = vmatmul.mubr.f32.gmra.mrb[6].mxu0 %v8735_v50  ;;  %1837 = vmatprep.mubr.f32.mxu1 %v8736_v21 }
 0x21f   : > { %4614 = vmatpush1.bf16.msra.mxu0 %v8737_v53  ;;  %3555 = vmatprep.mubr.f32.mxu0 %v8738_v54  ;;  %v8785_v53 = vld [vmem:[#allocation149_spill] sm:$0xff] }
 0x220   : > { %4616 = vmatprep.subr.bf16.mxu0 %v8739_v56  ;;  %4234 = vmatpush1.bf16.msra.mxu1 %v8740_v17  ;;  %v8786_v56 = vld [vmem:[#allocation151_spill] sm:$0xff]  ;;  %v8787_v17 = vld [vmem:[#allocation157_spill] sm:$0xff] }
 0x221   : > { %4236 = vmatprep.subr.bf16.mxu1 %v8741_v34  ;;  %1839 = vmatmul.mubr.f32.gmra.mrb[8].mxu1 %v8742_v9  ;;  %v8788_v34 = vld [vmem:[#allocation154_spill] sm:$0xff] }
 0x222   : > { %3557 = vmatmul.mubr.f32.gmra.mrb[8].mxu0 %v8743_v14  ;;  %1845 = vmatprep.mubr.f32.mxu1 %v8744_v5 }
 0x223   : > { %4618 = vmatpush1.bf16.msra.mxu0 %v8745_v26  ;;  %3563 = vmatprep.mubr.f32.mxu0 %v8746_v13  ;;  %v8789_v26 = vld [vmem:[#allocation161_spill] sm:$0xff] }
 0x224   : > { %4620 = vmatprep.subr.bf16.mxu0 %v8747_v27  ;;  %4238 = vmatpush1.bf16.msra.mxu1 %v8748_v42  ;;  %v8790_v27 = vld [vmem:[#allocation163_spill] sm:$0xff]  ;;  %v8791_v42 = vld [vmem:[#allocation169_spill] sm:$0xff] }
 0x225   : > { %4240 = vmatprep.subr.bf16.mxu1 %v8749_v6  ;;  %1847 = vmatmul.mubr.f32.gmra.mrb[10].mxu1 %v8750_v16  ;;  %v8792_v6 = vld [vmem:[#allocation166_spill] sm:$0xff] }
 0x226   : > { %3565 = vmatmul.mubr.f32.gmra.mrb[10].mxu0 %v8751_v19  ;;  %1853 = vmatprep.mubr.f32.mxu1 %v8752_v10 }
 0x227   : > { %4622 = vmatpush1.bf16.msra.mxu0 %v8753_v30  ;;  %3571 = vmatprep.mubr.f32.mxu0 %v8754_v31  ;;  %v8793_v30 = vld [vmem:[#allocation173_spill] sm:$0xff] }
 0x228   : > { %4624 = vmatprep.subr.bf16.mxu0 %v8755_v3  ;;  %4242 = vmatpush1.bf16.msra.mxu1 %v8756_v7  ;;  %v8794_v3 = vld [vmem:[#allocation175_spill] sm:$0xff]  ;;  %v8795_v7 = vld [vmem:[#allocation181_spill] sm:$0xff] }
 0x229   : > { %4244 = vmatprep.subr.bf16.mxu1 %v8757_v44  ;;  %1855 = vmatmul.mubr.f32.gmra.mrb[12].mxu1 %v8758_v55  ;;  %v8796_v44 = vld [vmem:[#allocation186_spill] sm:$0xff] }
 0x22a   : > { %3573 = vmatmul.mubr.f32.gmra.mrb[12].mxu0 %v8759_v28  ;;  %1861 = vmatprep.mubr.f32.mxu1 %v8760_v22 }
 0x22b   : > { %4626 = vmatpush1.bf16.msra.mxu0 %v8761_v23  ;;  %3579 = vmatprep.mubr.f32.mxu0 %v8762_v11  ;;  %v8797_v23 = vld [vmem:[#allocation188_spill] sm:$0xff] }
 0x22c   : > { %4628 = vmatprep.subr.bf16.mxu0 %v8763_v58  ;;  %4246 = vmatpush1.bf16.msra.mxu1 %v8764_v36  ;;  %v8798_v58 = vld [vmem:[#allocation191_spill] sm:$0xff] }
 0x22d   : > { %4248 = vmatprep.subr.bf16.mxu1 %v8765_v2  ;;  %1863 = vmatmul.mubr.f32.gmra.mrb[14].mxu1 %v8766_v4 }
 0x22e   : > { %3581 = vmatmul.mubr.f32.gmra.mrb[14].mxu0 %v8767_v45  ;;  %1998 = vmatprep.mubr.f32.mxu1 %v8604_v39  ;;  %v8777_v39 = vld [vmem:[#allocation125_spill] sm:$0xff] }
 0x22f   : > { %4630 = vmatpush1.bf16.msra.mxu0 %v8768_v63  ;;  %3716 = vmatprep.mubr.f32.mxu0 %v8609_v40  ;;  %v8779_v40 = vld [vmem:[#allocation133_spill] sm:$0xff] }
 0x230   : > { %4632 = vmatprep.subr.bf16.mxu0 %v8769_v41  ;;  %4250 = vmatpush1.bf16.msra.mxu1 %v8770_v61 }
 0x231   : > { %4252 = vmatprep.subr.bf16.mxu1 %v8771_v20 }
 0x233   : > { %4634 = vmatpush1.bf16.msra.mxu0 %v8772_v1 }
 0x234   : > { %4636 = vmatprep.subr.bf16.mxu0 %v8773_v38  ;;  %4254 = vmatpush1.bf16.msra.mxu1 %v8774_v12 }
 0x235   : > { %4256 = vmatprep.subr.bf16.mxu1 %v8775_v8 }
 0x237   : > { %4638 = vmatpush1.bf16.msra.mxu0 %v8776_v15 }
 0x238   : > { %4640 = vmatprep.subr.bf16.mxu0 %v8777_v39  ;;  %4258 = vmatpush1.bf16.msra.mxu1 %v8778_v18 }
 0x239   : > { %4260 = vmatprep.subr.bf16.mxu1 %v8779_v40 }
 0x23b   : > { %4642 = vmatpush1.bf16.msra.mxu0 %v8780_v33 }
 0x23c   : > { %4644 = vmatprep.subr.bf16.mxu0 %v8781_v57  ;;  %4262 = vmatpush1.bf16.msra.mxu1 %v8782_v59 }
 0x23d   : > { %4264 = vmatprep.subr.bf16.mxu1 %v8783_v46 }
 0x23f   : > { %4646 = vmatpush1.bf16.msra.mxu0 %v8784_v37 }
 0x240   : > { %4648 = vmatprep.subr.bf16.mxu0 %v8785_v53  ;;  %4266 = vmatpush1.bf16.msra.mxu1 %v8786_v56 }
 0x241   : > { %4268 = vmatprep.subr.bf16.mxu1 %v8787_v17 }
 0x243   : > { %4650 = vmatpush1.bf16.msra.mxu0 %v8788_v34 }
 0x244   : > { %4652 = vmatprep.subr.bf16.mxu0 %v8789_v26  ;;  %4270 = vmatpush1.bf16.msra.mxu1 %v8790_v27 }
 0x245   : > { %4272 = vmatprep.subr.bf16.mxu1 %v8791_v42 }
 0x247   : > { %4654 = vmatpush1.bf16.msra.mxu0 %v8792_v6 }
 0x248   : > { %4656 = vmatprep.subr.bf16.mxu0 %v8793_v30  ;;  %4274 = vmatpush1.bf16.msra.mxu1 %v8794_v3 }
 0x249   : > { %4276 = vmatprep.subr.bf16.mxu1 %v8795_v7 }
 0x24b   : > { %4658 = vmatpush1.bf16.msra.mxu0 %v8438_v47 }
 0x24c   : > { %4660 = vmatprep.subr.bf16.mxu0 %v8796_v44  ;;  %4278 = vmatpush1.bf16.msra.mxu1 %v8797_v23 }
 0x24f   : > { %4662 = vmatpush1.bf16.msra.mxu0 %v8798_v58  ;;  %2000 = vmatmul.mubr.f32.vlgmr.msra.gmra.mrb[0].mxu1 %v8707_v49 }
 0x250   : > { %2006 = vmatprep.mubr.f32.mxu1 %v8711_v0 }
 0x252   : > { %3718 = vmatmul.mubr.f32.vlgmr.msra.gmra.mrb[0].mxu0 %v8712_v43 }
 0x253   : > { %3724 = vmatprep.mubr.f32.mxu0 %v8714_v52  ;;  %2008 = vmatmul.mubr.f32.gmra.mrb[2].mxu1 %v8718_v24 }
 0x254   : > { %2014 = vmatprep.mubr.f32.mxu1 %v8720_v25 }
 0x256   : > { %3726 = vmatmul.mubr.f32.gmra.mrb[2].mxu0 %v8719_v60 }
 0x257   : > { %3732 = vmatprep.mubr.f32.mxu0 %v8722_v51  ;;  %2016 = vmatmul.mubr.f32.gmra.mrb[4].mxu1 %v8726_v29 }
 0x258   : > { %2022 = vmatprep.mubr.f32.mxu1 %v8728_v32 }
 0x25a   : > { %3734 = vmatmul.mubr.f32.gmra.mrb[4].mxu0 %v8727_v62 }
 0x25b   : > { %3740 = vmatprep.mubr.f32.mxu0 %v8730_v35  ;;  %2024 = vmatmul.mubr.f32.gmra.mrb[6].mxu1 %v8734_v48 }
 0x25c   : > { %2030 = vmatprep.mubr.f32.mxu1 %v8736_v21 }
 0x25e   : > { %3742 = vmatmul.mubr.f32.gmra.mrb[6].mxu0 %v8735_v50 }
 0x25f   : > { %3748 = vmatprep.mubr.f32.mxu0 %v8738_v54  ;;  %2032 = vmatmul.mubr.f32.gmra.mrb[8].mxu1 %v8742_v9 }
 0x260   : > { %2038 = vmatprep.mubr.f32.mxu1 %v8744_v5 }
 0x262   : > { %3750 = vmatmul.mubr.f32.gmra.mrb[8].mxu0 %v8743_v14 }
 0x263   : > { %3756 = vmatprep.mubr.f32.mxu0 %v8746_v13  ;;  %2040 = vmatmul.mubr.f32.gmra.mrb[10].mxu1 %v8750_v16 }
 0x264   : > { %2046 = vmatprep.mubr.f32.mxu1 %v8752_v10 }
 0x266   : > { %3758 = vmatmul.mubr.f32.gmra.mrb[10].mxu0 %v8751_v19 }
 0x267   : > { %3764 = vmatprep.mubr.f32.mxu0 %v8754_v31  ;;  %2048 = vmatmul.mubr.f32.gmra.mrb[12].mxu1 %v8758_v55 }
 0x268   : > { %2054 = vmatprep.mubr.f32.mxu1 %v8760_v22 }
 0x26a   : > { %3766 = vmatmul.mubr.f32.gmra.mrb[12].mxu0 %v8759_v28 }
 0x26b   : > { %3772 = vmatprep.mubr.f32.mxu0 %v8762_v11  ;;  %2056 = vmatmul.mubr.f32.gmra.mrb[14].mxu1 %v8766_v4 }
 0x26e   : > { %3774 = vmatmul.mubr.f32.gmra.mrb[14].mxu0 %v8767_v45 }
 0x322   : > { %v2001_v47 = vpop.f32.mrb[0].mxu1 }
 0x323   : > { %v2003_v49 = vpop.f32.mrb[1].mxu1 }
 0x325   : > { %v3719_v0 = vpop.f32.mrb[0].mxu0 }
 0x326   : > { %v4663_v43 = vadd.f32 %v3719_v0, %v2001_v47  ;;  %v3721_v52 = vpop.f32.mrb[1].mxu0  ;;  %v2009_v24 = vpop.f32.mrb[2].mxu1 }
 0x327   : > { %v4664_v60 = vadd.f32 %v3721_v52, %v2003_v49  ;;  %v2011_v25 = vpop.f32.mrb[3].mxu1 }
 0x328   : > { %3780 = vst [vmem:[%s7186_s29] sm:$0xff] %v4663_v43 }
 0x329   : > { %3781 = vst [vmem:[%s7186_s29 + $0x8] sm:$0xff] %v4664_v60  ;;  %v3727_v51 = vpop.f32.mrb[2].mxu0 }
 0x32a   : > { %v4665_v29 = vadd.f32 %v3727_v51, %v2009_v24  ;;  %v3729_v62 = vpop.f32.mrb[3].mxu0  ;;  %v2017_v32 = vpop.f32.mrb[4].mxu1 }
 0x32b   : > { %v4666_v35 = vadd.f32 %v3729_v62, %v2011_v25  ;;  %v2019_v48 = vpop.f32.mrb[5].mxu1 }
 0x32c   : > { %3782 = vst [vmem:[%s7186_s29 + $0x10] sm:$0xff] %v4665_v29 }
 0x32d   : > { %3783 = vst [vmem:[%s7186_s29 + $0x18] sm:$0xff] %v4666_v35  ;;  %v3735_v50 = vpop.f32.mrb[4].mxu0 }
 0x32e   : > { %v4667_v21 = vadd.f32 %v3735_v50, %v2017_v32  ;;  %v3737_v54 = vpop.f32.mrb[5].mxu0  ;;  %v2025_v9 = vpop.f32.mrb[6].mxu1 }
 0x32f   : > { %v4668_v14 = vadd.f32 %v3737_v54, %v2019_v48  ;;  %v2027_v5 = vpop.f32.mrb[7].mxu1 }
 0x330   : > { %3784 = vst [vmem:[%s7186_s29 + $0x20] sm:$0xff] %v4667_v21 }
 0x331   : > { %3785 = vst [vmem:[%s7186_s29 + $0x28] sm:$0xff] %v4668_v14  ;;  %v3743_v13 = vpop.f32.mrb[6].mxu0 }
 0x332   : > { %v4669_v16 = vadd.f32 %v3743_v13, %v2025_v9  ;;  %v3745_v19 = vpop.f32.mrb[7].mxu0  ;;  %v2033_v10 = vpop.f32.mrb[8].mxu1 }
 0x333   : > { %v4670_v31 = vadd.f32 %v3745_v19, %v2027_v5  ;;  %v2035_v55 = vpop.f32.mrb[9].mxu1 }
 0x334   : > { %3786 = vst [vmem:[%s7186_s29 + $0x30] sm:$0xff] %v4669_v16 }
 0x335   : > { %3787 = vst [vmem:[%s7186_s29 + $0x38] sm:$0xff] %v4670_v31  ;;  %v3751_v28 = vpop.f32.mrb[8].mxu0 }
 0x336   : > { %v4671_v22 = vadd.f32 %v3751_v28, %v2033_v10  ;;  %v3753_v11 = vpop.f32.mrb[9].mxu0  ;;  %v2041_v36 = vpop.f32.mrb[10].mxu1 }
 0x337   : > { %v4672_v2 = vadd.f32 %v3753_v11, %v2035_v55  ;;  %v2043_v4 = vpop.f32.mrb[11].mxu1 }
 0x338   : > { %3788 = vst [vmem:[%s7186_s29 + $0x40] sm:$0xff] %v4671_v22 }
 0x339   : > { %3789 = vst [vmem:[%s7186_s29 + $0x48] sm:$0xff] %v4672_v2  ;;  %v3759_v45 = vpop.f32.mrb[10].mxu0 }
 0x33a   : > { %v4673_v63 = vadd.f32 %v3759_v45, %v2041_v36  ;;  %v3761_v41 = vpop.f32.mrb[11].mxu0  ;;  %v2049_v61 = vpop.f32.mrb[12].mxu1 }
 0x33b   : > { %v4674_v20 = vadd.f32 %v3761_v41, %v2043_v4  ;;  %v2051_v1 = vpop.f32.mrb[13].mxu1 }
 0x33c   : > { %3790 = vst [vmem:[%s7186_s29 + $0x50] sm:$0xff] %v4673_v63 }
 0x33d   : > { %3791 = vst [vmem:[%s7186_s29 + $0x58] sm:$0xff] %v4674_v20  ;;  %v3767_v38 = vpop.f32.mrb[12].mxu0 }
 0x33e   : > { %v4675_v12 = vadd.f32 %v3767_v38, %v2049_v61  ;;  %v3769_v8 = vpop.f32.mrb[13].mxu0  ;;  %v2057_v15 = vpop.f32.mrb[14].mxu1 }
 0x33f   : > { %v4676_v39 = vadd.f32 %v3769_v8, %v2051_v1  ;;  %v2059_v18 = vpop.f32.mrb[15].mxu1 }
 0x340   : > { %3792 = vst [vmem:[%s7186_s29 + $0x60] sm:$0xff] %v4675_v12 }
 0x341   : > { %3793 = vst [vmem:[%s7186_s29 + $0x68] sm:$0xff] %v4676_v39  ;;  %v3775_v40 = vpop.f32.mrb[14].mxu0 }
 0x342   : > { %v4677_v33 = vadd.f32 %v3775_v40, %v2057_v15  ;;  %v3777_v57 = vpop.f32.mrb[15].mxu0 }
 0x343   : > { %v4678_v59 = vadd.f32 %v3777_v57, %v2059_v18 }
 0x344   : > { %3794 = vst [vmem:[%s7186_s29 + $0x70] sm:$0xff] %v4677_v33 }
 0x345   : > { %3795 = vst [vmem:[%s7186_s29 + $0x78] sm:$0xff] %v4678_v59 }
 0x346 PF: > { %p13_p3 = scmp.ge.s32.totalorder %s5034_s14, 4   ;;  %s8799_s9 = smov %s4982_s10 }
 0x347   : > { %s8800_s10 = smov %s4986_s11  ;;  %s8801_s11 = smov %s5044_s17 }
 0x348   : > { %s8802_s12 = smov %s5034_s14  ;;  %15 = sbr.rel (!%p13_p3) target bundleno = 4 (0x4), region = 72 }
 0x34f   :  { %3820 = vsyncpa [#allocation3], 1 }
 0x350   :  { %3822 = vsyncpa [#allocation3 + $0x1], 1 }
 0x351   :  { %3823 = vsyncpa [#allocation5], 1 }

// kernel: custom-call.2
= control target key start
LH: loop header
LB: loop body
LE: loop exit
PB: predicated region body
PF: predicated region fallthrough
CT: control target
= control target key end

     0   :  { %s126_s0 = inlined_call_operand.vmem [shape: f32[2,4,2,8,128], index: 0, kind: input, shape index: {}]   ;;  %s127_s1 = inlined_call_operand.vmem [shape: f32[2,4,2,8,128], index: 1, kind: input, shape index: {}]   ;;  %s128_s2 = inlined_call_operand.hbm [shape: c64[2,4,2,8,128], index: 2, kind: output, shape index: {}]  }
   0x1   :  { %s87_s11 = scalar_lea.hbm %s128_s2, 2048 }
   0x2   :  { %4 = vsyncpa [#allocation0], 0  ;;  %s5_s14 = sshll.u32 %s126_s0, 4  ;;  %s6_s14 = int_to_ptr.vmem [resolvable:$true] %s5_s14 }
   0x3   :  { %s18_s15 = scalar_lea.vmem %s6_s14, 2048  ;;  %p23_p1 = scmp.lt.s32.totalorder %s6_s14, %s6_s14 }
   0x4   :  { %p19_p0 = scmp.ne.s32.totalorder %s6_s14, %s18_s15  ;;  %p24_p2 = scmp.lt.s32.totalorder %s18_s15, %s18_s15 }
   0x6   :  { %p25_p3 = por %p24_p2, %p23_p1 }
   0x8   :  { %p26_p4 = pnand %p25_p3, %p19_p0 }
   0xa   :  { %29 = shalt.err (!%p26_p4)  }
   0xb   :  { %p31_p5 = scmp.ne.s32.totalorder %s128_s2, %s87_s11  ;;  %s32_s0 = scalar_lea.hbm %s128_s2, 4096 }
   0xc   :  { %p33_p6 = scmp.lt.u32.totalorder %s32_s0, %s87_s11  ;;  %p34_p7 = scmp.lt.u32.totalorder %s87_s11, %s128_s2 }
   0xe   :  { %p35_p8 = por %p34_p7, %p33_p6 }
  0x10   :  { %p36_p9 = pnand %p35_p8, %p31_p5 }
  0x12   :  { %39 = shalt.err (!%p36_p9)  }
  0x13   :  { %8 = dma.vmem_to_hbm [thread:$0]  %s6_s14, 2048, %s128_s2, [#allocation0] }
  0x14   :  { %65 = dma.done.wait [#allocation0], 2048  }
  0x15   :  { %66 = vsyncadd [#allocation0], 4294965248 }
  0x16   :  { %10 = vsyncpa [#allocation0], 1 }
  0x17   :  { %11 = vsyncpa [#allocation1], 0  ;;  %s12_s28 = sshll.u32 %s127_s1, 4  ;;  %s13_s28 = int_to_ptr.vmem [resolvable:$true] %s12_s28 }
  0x18   :  { %s40_s29 = scalar_lea.vmem %s13_s28, 2048  ;;  %p45_p11 = scmp.lt.s32.totalorder %s13_s28, %s13_s28 }
  0x19   :  { %p41_p10 = scmp.ne.s32.totalorder %s13_s28, %s40_s29  ;;  %p46_p12 = scmp.lt.s32.totalorder %s40_s29, %s40_s29 }
  0x1b   :  { %p47_p13 = por %p46_p12, %p45_p11 }
  0x1d   :  { %p48_p0 = pnand %p47_p13, %p41_p10 }
  0x1f   :  { %51 = shalt.err (!%p48_p0)  }
  0x20   :  { %p53_p1 = scmp.ne.s32.totalorder %s87_s11, %s32_s0  ;;  %p56_p2 = scmp.lt.u32.totalorder %s32_s0, %s32_s0 }
  0x22   :  { %p57_p3 = por %p56_p2, %p34_p7 }
  0x24   :  { %p59_p4 = por %p57_p3, %p33_p6 }
  0x26   :  { %p60_p5 = pnand %p59_p4, %p53_p1 }
  0x28   :  { %63 = shalt.err (!%p60_p5)  }
  0x29   :  { %15 = dma.vmem_to_hbm [thread:$0]  %s13_s28, 2048, %s87_s11, [#allocation1] }
  0x2a   :  { %67 = dma.done.wait [#allocation1], 2048  }
  0x2b   :  { %68 = vsyncadd [#allocation1], 4294965248 }
  0x2c   :  { %17 = vsyncpa [#allocation1], 1 }

</bundles_post_ra>
